<compile_context>
chip_gen: v5e
topology: v5e:2x2
jax: 0.10.0
libtpu: 0.0.40
codegen_flags: <defaults>
</compile_context>

<pallas_src>
import functools

import jax
import jax.numpy as jnp
from jax.experimental import pallas as pl
from jax.experimental.pallas import tpu as pltpu
from jax.scipy.linalg import block_diag

EPS = 1e-5  # PyTorch BatchNorm1d default eps

# Row indices inside the packed (16, P) bias / BN-vector blob.
(V_B_IN, V_G1, V_BE1, V_B_GCN,
 V_B_R, V_B_Z, V_B_IG, V_B_HG,
 V_G2, V_BE2, V_G3, V_BE3,
 V_B_H1, V_GH1, V_BEH1, V_B_OUT) = range(16)


def qwenet_kernel(x_ref, ahat_ref, wsq_ref, wgru_ref, vec_ref, o_ref,
                  *, max_bp_iter, n_nodes, n_graphs, p):
    """One grid step = n_graphs independent graphs folded into an (M, P) slab.

    x_ref    : (M, P)  lane-padded node features, M = n_graphs * n_nodes
    ahat_ref : (M, M)  block-diagonal normalized adjacency (bf16)
    wsq_ref  : (4P, P) bf16 blob [w_in; w_gcn; w_h1; w_out]
    wgru_ref : (2P, 4P) bf16 fused GRU gate blob
    vec_ref  : (16, P) f32 biases / BN vectors
    """
    f32 = jnp.float32
    bf16 = jnp.bfloat16
    m = n_graphs * n_nodes
    inv_n = 1.0 / float(n_nodes)

    # --- small (1, P) parameter rows (cheap, load once) ---
    vec = vec_ref[...]
    b_in = vec[V_B_IN:V_B_IN + 1]
    g1, be1 = vec[V_G1:V_G1 + 1], vec[V_BE1:V_BE1 + 1]
    b_gcn = vec[V_B_GCN:V_B_GCN + 1]
    b_r = vec[V_B_R:V_B_R + 1]          # = b_ir + b_hr (pre-folded)
    b_z = vec[V_B_Z:V_B_Z + 1]          # = b_iz + b_hz (pre-folded)
    b_ig = vec[V_B_IG:V_B_IG + 1]       # input-side bias of the n gate
    b_hg = vec[V_B_HG:V_B_HG + 1]       # hidden-side bias of the n gate
    g2, be2 = vec[V_G2:V_G2 + 1], vec[V_BE2:V_BE2 + 1]
    g3, be3 = vec[V_G3:V_G3 + 1], vec[V_BE3:V_BE3 + 1]
    b_h1 = vec[V_B_H1:V_B_H1 + 1]
    gh1, beh1 = vec[V_GH1:V_GH1 + 1], vec[V_BEH1:V_BEH1 + 1]
    b_out = vec[V_B_OUT:V_B_OUT + 1]

    def bn(v, gamma, beta):
        # BatchNorm1d, training mode, biased per-graph batch stats.
        # Affine form: y = v*scale + shift with scale/shift computed on the
        # small (n_graphs, 1, P) stat rows before touching the full tile.
        v3 = v.reshape(n_graphs, n_nodes, p)        # sublane-aligned (16 % 8 == 0)
        s = jnp.sum(v3, axis=1, keepdims=True)
        sq = jnp.sum(v3 * v3, axis=1, keepdims=True)
        mean = s * inv_n
        var = jnp.maximum(sq * inv_n - mean * mean, 0.0)
        scale = gamma * jax.lax.rsqrt(var + EPS)     # rsqrt -> EUP (free slot)
        shift = beta - mean * scale
        return (v3 * scale + shift).reshape(m, p)

    # ---- decoder.inputLayer: Linear -> LeakyReLU(0)==ReLU -> BatchNorm1d ----
    x = x_ref[...]
    h = jnp.dot(x.astype(bf16), wsq_ref[0:p, :], preferred_element_type=f32) + b_in
    h = jnp.maximum(h, 0.0)
    h = bn(h, g1, be1)
    max_x = h

    ahat = ahat_ref[...]                             # (M, M) bf16, block diagonal

    # ---- decoder BP loop (unrolled at trace time; maxBpIter small & static) ----
    for _ in range(max_bp_iter):
        pre_x = h
        # GCNConv: A_hat @ (X W) + b  (block-diagonal A_hat == per-graph propagation)
        xw = jnp.dot(h.astype(bf16), wsq_ref[p:2 * p, :], preferred_element_type=f32)
        gcn = jnp.dot(ahat, xw.astype(bf16), preferred_element_type=f32) + b_gcn
        # GRUCell(input=pre_x, hidden=gcn): single fused K=2P gate matmul.
        cat = jnp.concatenate([pre_x, gcn], axis=1).astype(bf16)    # (M, 2P)
        g_all = jnp.dot(cat, wgru_ref[...], preferred_element_type=f32)  # (M, 4P)
        r = jax.nn.sigmoid(g_all[:, 0:p] + b_r)
        z = jax.nn.sigmoid(g_all[:, p:2 * p] + b_z)
        ng = jnp.tanh(g_all[:, 2 * p:3 * p] + b_ig + r * (g_all[:, 3 * p:4 * p] + b_hg))
        h = (1.0 - z) * ng + z * gcn
        # decoder.outThisCycle BN
        h = bn(h, g2, be2)
        # running elementwise max (torch.max(torch.stack(...), 0)[0])
        max_x = jnp.maximum(max_x, h)

    # ---- decoder.outputLayer BN ----
    h = bn(max_x, g3, be3)

    # ---- encoder.hidden1: Linear -> BatchNorm1d -> LeakyReLU(0)==ReLU ----
    e = jnp.dot(h.astype(bf16), wsq_ref[2 * p:3 * p, :], preferred_element_type=f32) + b_h1
    e = bn(e, gh1, beh1)
    e = jnp.maximum(e, 0.0)

    # encoder_auxFeatDim == 0 -> no concat with aux_feat
    # ---- encoder.out: Linear (lane-dense padded output; sliced in wrapper) ----
    o_ref[...] = jnp.dot(e.astype(bf16), wsq_ref[3 * p:4 * p, :],
                         preferred_element_type=f32) + b_out


def build_ahat(edge_index, n):
    """Dense normalized adjacency D^{-1/2}(A + I)D^{-1/2} used by GCNConv."""
    src = edge_index[0]
    dst = edge_index[1]
    a = jnp.zeros((n, n), jnp.float32)
    a = a.at[dst, src].add(1.0)             # A[target, source] += 1
    a = a + jnp.eye(n, dtype=jnp.float32)   # add self loops
    deg = jnp.sum(a, axis=1)
    dinv = jnp.where(deg > 0, jax.lax.rsqrt(deg), 0.0)
    return a * dinv[:, None] * dinv[None, :]


def init_params(key, node_feat_dim, emb, hidden1, out_dim):
    """Deterministic parameter init (PyTorch-style uniform fan-in bounds)."""
    ks = jax.random.split(key, 20)

    def u(k, shape, fan_in):
        bound = 1.0 / jnp.sqrt(jnp.float32(fan_in))
        return jax.random.uniform(k, shape, jnp.float32, -bound, bound)

    ones = lambda d: jnp.ones((1, d), jnp.float32)
    zeros = lambda d: jnp.zeros((1, d), jnp.float32)

    return (
        # decoder.inputLayer
        u(ks[0], (node_feat_dim, emb), node_feat_dim),      # w_in
        u(ks[1], (1, emb), node_feat_dim),                  # b_in
        ones(emb), zeros(emb),                              # g1, be1
        # decoder.nodeConv (GCNConv): weight + zero-init bias
        u(ks[2], (emb, emb), emb), zeros(emb),              # w_gcn, b_gcn
        # decoder.combine (GRUCell) per-gate (r, z, n): input then hidden weights
        u(ks[3], (emb, emb), emb), u(ks[4], (emb, emb), emb), u(ks[5], (emb, emb), emb),
        u(ks[6], (1, emb), emb), u(ks[7], (1, emb), emb), u(ks[8], (1, emb), emb),
        u(ks[9], (emb, emb), emb), u(ks[10], (emb, emb), emb), u(ks[11], (emb, emb), emb),
        u(ks[12], (1, emb), emb), u(ks[13], (1, emb), emb), u(ks[14], (1, emb), emb),
        # decoder.outThisCycle / decoder.outputLayer BN
        ones(emb), zeros(emb), ones(emb), zeros(emb),       # g2, be2, g3, be3
        # encoder.hidden1
        u(ks[15], (emb, hidden1), emb), u(ks[16], (1, hidden1), emb),
        ones(hidden1), zeros(hidden1),                      # gh1, beh1
        # encoder.out
        u(ks[17], (hidden1, out_dim), hidden1), u(ks[18], (1, out_dim), hidden1),
    )


def pack_params(params, p):
    """Zero-pad every feature dim to `p` lanes and pack into 3 VMEM blobs.

    Weights are stored in bfloat16 (MXU native); biases / BN vectors stay f32.
    Padded weight rows/cols are exactly zero so valid channels are unaffected.
    """
    (w_in, b_in, g1, be1,
     w_gcn, b_gcn,
     w_ir, w_iz, w_ig, b_ir, b_iz, b_ig,
     w_hr, w_hz, w_hg, b_hr, b_hz, b_hg,
     g2, be2, g3, be3,
     w_h1, b_h1, gh1, beh1,
     w_out, b_out) = params

    def pad_sq(w):
        r, c = w.shape
        return jnp.zeros((p, p), jnp.float32).at[:r, :c].set(w)

    def pad_row(v):
        c = v.shape[1]
        return jnp.zeros((1, p), jnp.float32).at[:, :c].set(v)

    wsq = jnp.concatenate(
        [pad_sq(w_in), pad_sq(w_gcn), pad_sq(w_h1), pad_sq(w_out)],
        axis=0).astype(jnp.bfloat16)                                   # (4P, P)

    # Fused GRU gate blob (2P, 4P), consumed as [pre_x | gcn] @ W:
    #   rows [0:P]  -> input-side (pre_x) weights, rows [P:2P] -> hidden-side (gcn)
    #   col groups: [W_ir;W_hr] | [W_iz;W_hz] | [W_in;0] | [0;W_hn]
    wgru = jnp.zeros((2 * p, 4 * p), jnp.float32)

    def put(blk, row0, col0, w):
        r, c = w.shape
        return blk.at[row0:row0 + r, col0:col0 + c].set(w)

    wgru = put(wgru, 0, 0 * p, w_ir); wgru = put(wgru, p, 0 * p, w_hr)
    wgru = put(wgru, 0, 1 * p, w_iz); wgru = put(wgru, p, 1 * p, w_hz)
    wgru = put(wgru, 0, 2 * p, w_ig)
    wgru = put(wgru, p, 3 * p, w_hg)
    wgru = wgru.astype(jnp.bfloat16)                                   # (2P, 4P)

    vecs = jnp.concatenate(
        [pad_row(b_in), pad_row(g1), pad_row(be1), pad_row(b_gcn),
         pad_row(b_ir + b_hr), pad_row(b_iz + b_hz),       # pre-folded r/z biases
         pad_row(b_ig), pad_row(b_hg),
         pad_row(g2), pad_row(be2), pad_row(g3), pad_row(be3),
         pad_row(b_h1), pad_row(gh1), pad_row(beh1), pad_row(b_out)],
        axis=0)                                                        # (16, P) f32
    return wsq, wgru, vecs


def _grid_steps(num_graphs):
    """2 half-batch grid steps on v7x (2 TensorCores per chip), 1 elsewhere."""
    kind = ""
    try:
        kind = jax.devices()[0].device_kind.lower()
    except Exception:
        pass
    if num_graphs >= 2 and num_graphs % 2 == 0 and ("v7" in kind or "7x" in kind):
        return 2
    return 1


def qwenet_forward(x_pad, ahat, wsq, wgru, vecs, *, max_bp_iter, p, grid_steps=1):
    """Batch-folded forward: all graphs of a grid step share one (M, P) slab."""
    b, n, _ = x_pad.shape
    g = grid_steps
    assert b % g == 0
    bg = b // g               # graphs per grid step
    mg = bg * n               # rows per grid step

    # Fold batch into the matmul M dimension.
    x_slab = x_pad.reshape(g, mg, p)
    # Block-diagonal normalized adjacency per grid step (off-diag blocks = 0
    # keeps per-graph propagation exact).
    ahat_blk = jnp.stack(
        [block_diag(*[ahat[gi * bg + k] for k in range(bg)]) for gi in range(g)]
    ).astype(jnp.bfloat16)                                             # (g, mg, mg)

    kern = functools.partial(qwenet_kernel, max_bp_iter=max_bp_iter,
                             n_nodes=n, n_graphs=bg, p=p)

    # Advisory cost estimate so XLA can overlap this tiny call with the
    # surrounding adjacency build.
    matmul_flops = (2 * mg * p * p * (1 + max_bp_iter + 2)
                    + max_bp_iter * (2 * mg * mg * p + 2 * mg * (2 * p) * (4 * p)))
    cost = pl.CostEstimate(
        flops=g * matmul_flops,
        transcendentals=g * (mg * p * 3 * max_bp_iter + 6 * p),
        bytes_accessed=int(x_slab.size * 4 + ahat_blk.size * 2 + wsq.size * 2
                           + wgru.size * 2 + vecs.size * 4 + g * mg * p * 4))

    out = pl.pallas_call(
        kern,
        out_shape=jax.ShapeDtypeStruct((g, mg, p), jnp.float32),
        grid_spec=pltpu.PrefetchScalarGridSpec(
            num_scalar_prefetch=0,
            grid=(g,),
            in_specs=[
                pl.BlockSpec((None, mg, p), lambda i: (i, 0, 0)),      # activation slab
                pl.BlockSpec((None, mg, mg), lambda i: (i, 0, 0)),     # block-diag A_hat
                pl.BlockSpec((4 * p, p), lambda i: (0, 0)),            # square-weight blob
                pl.BlockSpec((2 * p, 4 * p), lambda i: (0, 0)),        # fused GRU weights
                pl.BlockSpec((16, p), lambda i: (0, 0)),               # bias / BN vectors
            ],
            out_specs=pl.BlockSpec((None, mg, p), lambda i: (i, 0, 0)),
        ),
        compiler_params=pltpu.CompilerParams(
            dimension_semantics=("parallel",)),     # half-batches -> both TCs on v7x
        cost_estimate=cost,
    )(x_slab, ahat_blk, wsq, wgru, vecs)
    return out.reshape(b, n, p)


if __name__ == "__main__":
    # Shapes consistent with the module's forward:
    #   decoder_nodeFeatDim=8, decoder_embeddingSize=32 (== encoder_inDim),
    #   encoder_numHidden1=32, encoder_outDim=4, encoder_auxFeatDim=0, maxBpIter=3.
    # B independent graphs of N nodes are folded behind one pallas_call.
    B = 4
    N = 16
    NODE_FEAT_DIM = 8
    EMB = 32
    HIDDEN1 = 32
    OUT_DIM = 4
    MAX_BP_ITER = 3
    NUM_EDGES = 32
    P = 128  # lane-padded feature width

    key = jax.random.PRNGKey(0)
    kx, ks, kd, kp = jax.random.split(key, 4)

    x = jax.random.normal(kx, (B, N, NODE_FEAT_DIM), jnp.float32)
    src = jax.random.randint(ks, (B, NUM_EDGES), 0, N)
    dst = jax.random.randint(kd, (B, NUM_EDGES), 0, N)
    edge_index = jnp.stack([src, dst], axis=1).astype(jnp.int32)   # (B, 2, E)

    # Lane-pad node features; build per-graph dense normalized adjacency.
    x_pad = jnp.zeros((B, N, P), jnp.float32).at[:, :, :NODE_FEAT_DIM].set(x)
    ahat = jax.vmap(build_ahat, in_axes=(0, None))(edge_index, N)   # (B, N, N)

    params = init_params(kp, NODE_FEAT_DIM, EMB, HIDDEN1, OUT_DIM)
    wsq, wgru, vecs = pack_params(params, P)

    out_pad = qwenet_forward(x_pad, ahat, wsq, wgru, vecs,
                             max_bp_iter=MAX_BP_ITER, p=P,
                             grid_steps=_grid_steps(B))
    out = out_pad[:, :, :OUT_DIM]   # drop lane padding
    out = jax.block_until_ready(out)
    assert out.shape == (B, N, OUT_DIM) and out.dtype == jnp.float32
    assert bool(jnp.all(jnp.isfinite(out)))
    print("KERNEL_OK")
</pallas_src>

<mosaic_0001>
module attributes {stable_mosaic.version = 11 : i64} {
  func.func @qwenet_kernel(%arg0: i32, %arg1: memref<1x64x128xf32, #tpu.memory_space<vmem>>, %arg2: memref<1x64x64xbf16, #tpu.memory_space<vmem>>, %arg3: memref<512x128xbf16, #tpu.memory_space<vmem>>, %arg4: memref<256x512xbf16, #tpu.memory_space<vmem>>, %arg5: memref<16x128xf32, #tpu.memory_space<vmem>>, %arg6: memref<1x64x128xf32, #tpu.memory_space<vmem>>) attributes {dimension_semantics = [#tpu.dimension_semantics<parallel>], iteration_bounds = array<i64: 1>, scalar_prefetch = 0 : i64, scratch_operands = 0 : i64, tpu.core_type = #tpu.core_type<tc>, window_params = [{transform_indices = @transform_0, window_bounds = array<i64: 1, 64, 128>}, {transform_indices = @transform_1, window_bounds = array<i64: 1, 64, 64>}, {pipeline_mode = #tpu.pipeline_mode<synchronous>, transform_indices = @transform_2, window_bounds = array<i64: 512, 128>}, {pipeline_mode = #tpu.pipeline_mode<synchronous>, transform_indices = @transform_3, window_bounds = array<i64: 256, 512>}, {pipeline_mode = #tpu.pipeline_mode<synchronous>, transform_indices = @transform_4, window_bounds = array<i64: 16, 128>}, {transform_indices = @transform_5, window_bounds = array<i64: 1, 64, 128>}]} {
    %c0 = arith.constant 0 : index
    %c0_0 = arith.constant 0 : index
    %0 = vector.load %arg5[%c0, %c0_0] : memref<16x128xf32, #tpu.memory_space<vmem>>, vector<16x128xf32>
    %1 = vector.extract_strided_slice %0 {offsets = [0, 0], sizes = [1, 128], strides = [1, 1]} : vector<16x128xf32> to vector<1x128xf32>
    %2 = vector.extract_strided_slice %0 {offsets = [1, 0], sizes = [1, 128], strides = [1, 1]} : vector<16x128xf32> to vector<1x128xf32>
    %3 = vector.extract_strided_slice %0 {offsets = [2, 0], sizes = [1, 128], strides = [1, 1]} : vector<16x128xf32> to vector<1x128xf32>
    %4 = vector.extract_strided_slice %0 {offsets = [3, 0], sizes = [1, 128], strides = [1, 1]} : vector<16x128xf32> to vector<1x128xf32>
    %5 = vector.extract_strided_slice %0 {offsets = [4, 0], sizes = [1, 128], strides = [1, 1]} : vector<16x128xf32> to vector<1x128xf32>
    %6 = vector.extract_strided_slice %0 {offsets = [5, 0], sizes = [1, 128], strides = [1, 1]} : vector<16x128xf32> to vector<1x128xf32>
    %7 = vector.extract_strided_slice %0 {offsets = [6, 0], sizes = [1, 128], strides = [1, 1]} : vector<16x128xf32> to vector<1x128xf32>
    %8 = vector.extract_strided_slice %0 {offsets = [7, 0], sizes = [1, 128], strides = [1, 1]} : vector<16x128xf32> to vector<1x128xf32>
    %9 = vector.extract_strided_slice %0 {offsets = [8, 0], sizes = [1, 128], strides = [1, 1]} : vector<16x128xf32> to vector<1x128xf32>
    %10 = vector.extract_strided_slice %0 {offsets = [9, 0], sizes = [1, 128], strides = [1, 1]} : vector<16x128xf32> to vector<1x128xf32>
    %11 = vector.extract_strided_slice %0 {offsets = [10, 0], sizes = [1, 128], strides = [1, 1]} : vector<16x128xf32> to vector<1x128xf32>
    %12 = vector.extract_strided_slice %0 {offsets = [11, 0], sizes = [1, 128], strides = [1, 1]} : vector<16x128xf32> to vector<1x128xf32>
    %13 = vector.extract_strided_slice %0 {offsets = [12, 0], sizes = [1, 128], strides = [1, 1]} : vector<16x128xf32> to vector<1x128xf32>
    %14 = vector.extract_strided_slice %0 {offsets = [13, 0], sizes = [1, 128], strides = [1, 1]} : vector<16x128xf32> to vector<1x128xf32>
    %15 = vector.extract_strided_slice %0 {offsets = [14, 0], sizes = [1, 128], strides = [1, 1]} : vector<16x128xf32> to vector<1x128xf32>
    %16 = vector.extract_strided_slice %0 {offsets = [15, 0], sizes = [1, 128], strides = [1, 1]} : vector<16x128xf32> to vector<1x128xf32>
    %c0_1 = arith.constant 0 : index
    %c0_2 = arith.constant 0 : index
    %c0_3 = arith.constant 0 : index
    %17 = vector.load %arg1[%c0_1, %c0_2, %c0_3] : memref<1x64x128xf32, #tpu.memory_space<vmem>>, vector<1x64x128xf32>
    %18 = vector.shape_cast %17 : vector<1x64x128xf32> to vector<64x128xf32>
    %19 = arith.truncf %18 : vector<64x128xf32> to vector<64x128xbf16>
    %c0_4 = arith.constant 0 : index
    %c0_5 = arith.constant 0 : index
    %20 = vector.load %arg3[%c0_4, %c0_5] : memref<512x128xbf16, #tpu.memory_space<vmem>>, vector<128x128xbf16>
    %cst = arith.constant dense<0.000000e+00> : vector<64x128xf32>
    %21 = tpu.matmul %19, %20, %cst {dimension_numbers = #tpu.dot_dimension_numbers<[1], [0], [0], [1], [0, 0, 1, 1], [], []>} : vector<64x128xbf16>, vector<128x128xbf16>, vector<64x128xf32> -> vector<64x128xf32>
    %22 = vector.broadcast %1 : vector<1x128xf32> to vector<64x128xf32>
    %23 = arith.addf %21, %22 : vector<64x128xf32>
    %cst_6 = arith.constant 0.000000e+00 : f32
    %24 = vector.broadcast %cst_6 : f32 to vector<64x128xf32>
    %25 = arith.maximumf %23, %24 : vector<64x128xf32>
    %26 = vector.shape_cast %25 : vector<64x128xf32> to vector<4x16x128xf32>
    %cst_7 = arith.constant dense<0.000000e+00> : vector<4x128xf32>
    %27 = vector.multi_reduction <add>, %26, %cst_7 [1] : vector<4x16x128xf32> to vector<4x128xf32>
    %28 = vector.shape_cast %27 : vector<4x128xf32> to vector<4x1x128xf32>
    %29 = arith.mulf %26, %26 : vector<4x16x128xf32>
    %cst_8 = arith.constant dense<0.000000e+00> : vector<4x128xf32>
    %30 = vector.multi_reduction <add>, %29, %cst_8 [1] : vector<4x16x128xf32> to vector<4x128xf32>
    %31 = vector.shape_cast %30 : vector<4x128xf32> to vector<4x1x128xf32>
    %cst_9 = arith.constant 6.250000e-02 : f32
    %32 = vector.broadcast %cst_9 : f32 to vector<4x1x128xf32>
    %33 = arith.mulf %28, %32 : vector<4x1x128xf32>
    %cst_10 = arith.constant 6.250000e-02 : f32
    %34 = vector.broadcast %cst_10 : f32 to vector<4x1x128xf32>
    %35 = arith.mulf %31, %34 : vector<4x1x128xf32>
    %36 = arith.mulf %33, %33 : vector<4x1x128xf32>
    %37 = arith.subf %35, %36 : vector<4x1x128xf32>
    %cst_11 = arith.constant 0.000000e+00 : f32
    %38 = vector.broadcast %cst_11 : f32 to vector<4x1x128xf32>
    %39 = arith.maximumf %37, %38 : vector<4x1x128xf32>
    %cst_12 = arith.constant 9.99999974E-6 : f32
    %40 = vector.broadcast %cst_12 : f32 to vector<4x1x128xf32>
    %41 = arith.addf %39, %40 : vector<4x1x128xf32>
    %42 = math.rsqrt %41 : vector<4x1x128xf32>
    %43 = vector.shape_cast %2 : vector<1x128xf32> to vector<1x1x128xf32>
    %44 = vector.broadcast %43 : vector<1x1x128xf32> to vector<4x1x128xf32>
    %45 = arith.mulf %44, %42 : vector<4x1x128xf32>
    %46 = arith.mulf %33, %45 : vector<4x1x128xf32>
    %47 = vector.shape_cast %3 : vector<1x128xf32> to vector<1x1x128xf32>
    %48 = vector.broadcast %47 : vector<1x1x128xf32> to vector<4x1x128xf32>
    %49 = arith.subf %48, %46 : vector<4x1x128xf32>
    %50 = vector.broadcast %45 : vector<4x1x128xf32> to vector<4x16x128xf32>
    %51 = arith.mulf %26, %50 : vector<4x16x128xf32>
    %52 = vector.broadcast %49 : vector<4x1x128xf32> to vector<4x16x128xf32>
    %53 = arith.addf %51, %52 : vector<4x16x128xf32>
    %54 = vector.shape_cast %53 : vector<4x16x128xf32> to vector<64x128xf32>
    %c0_13 = arith.constant 0 : index
    %c0_14 = arith.constant 0 : index
    %c0_15 = arith.constant 0 : index
    %55 = vector.load %arg2[%c0_13, %c0_14, %c0_15] : memref<1x64x64xbf16, #tpu.memory_space<vmem>>, vector<1x64x64xbf16>
    %56 = vector.shape_cast %55 : vector<1x64x64xbf16> to vector<64x64xbf16>
    %57 = arith.truncf %54 : vector<64x128xf32> to vector<64x128xbf16>
    %c128 = arith.constant 128 : index
    %c0_16 = arith.constant 0 : index
    %58 = vector.load %arg3[%c128, %c0_16] : memref<512x128xbf16, #tpu.memory_space<vmem>>, vector<128x128xbf16>
    %cst_17 = arith.constant dense<0.000000e+00> : vector<64x128xf32>
    %59 = tpu.matmul %57, %58, %cst_17 {dimension_numbers = #tpu.dot_dimension_numbers<[1], [0], [0], [1], [0, 0, 1, 1], [], []>} : vector<64x128xbf16>, vector<128x128xbf16>, vector<64x128xf32> -> vector<64x128xf32>
    %60 = arith.truncf %59 : vector<64x128xf32> to vector<64x128xbf16>
    %cst_18 = arith.constant dense<0.000000e+00> : vector<64x128xf32>
    %61 = tpu.matmul %56, %60, %cst_18 {dimension_numbers = #tpu.dot_dimension_numbers<[1], [0], [0], [1], [0, 0, 1, 1], [], []>} : vector<64x64xbf16>, vector<64x128xbf16>, vector<64x128xf32> -> vector<64x128xf32>
    %62 = vector.broadcast %4 : vector<1x128xf32> to vector<64x128xf32>
    %63 = arith.addf %61, %62 : vector<64x128xf32>
    %64 = tpu.concatenate %54, %63 in 1 : vector<64x128xf32>, vector<64x128xf32> -> vector<64x256xf32>
    %65 = arith.truncf %64 : vector<64x256xf32> to vector<64x256xbf16>
    %c0_19 = arith.constant 0 : index
    %c0_20 = arith.constant 0 : index
    %66 = vector.load %arg4[%c0_19, %c0_20] : memref<256x512xbf16, #tpu.memory_space<vmem>>, vector<256x512xbf16>
    %cst_21 = arith.constant dense<0.000000e+00> : vector<64x512xf32>
    %67 = tpu.matmul %65, %66, %cst_21 {dimension_numbers = #tpu.dot_dimension_numbers<[1], [0], [0], [1], [0, 0, 1, 1], [], []>} : vector<64x256xbf16>, vector<256x512xbf16>, vector<64x512xf32> -> vector<64x512xf32>
    %68 = vector.extract_strided_slice %67 {offsets = [0, 0], sizes = [64, 128], strides = [1, 1]} : vector<64x512xf32> to vector<64x128xf32>
    %69 = vector.broadcast %5 : vector<1x128xf32> to vector<64x128xf32>
    %70 = arith.addf %68, %69 : vector<64x128xf32>
    %71 = arith.negf %70 : vector<64x128xf32>
    %72 = math.exp %71 : vector<64x128xf32>
    %cst_22 = arith.constant 1.000000e+00 : f32
    %73 = vector.broadcast %cst_22 : f32 to vector<64x128xf32>
    %74 = arith.addf %73, %72 : vector<64x128xf32>
    %75 = arith.divf %73, %74 : vector<64x128xf32>
    %76 = vector.extract_strided_slice %67 {offsets = [0, 128], sizes = [64, 128], strides = [1, 1]} : vector<64x512xf32> to vector<64x128xf32>
    %77 = vector.broadcast %6 : vector<1x128xf32> to vector<64x128xf32>
    %78 = arith.addf %76, %77 : vector<64x128xf32>
    %79 = arith.negf %78 : vector<64x128xf32>
    %80 = math.exp %79 : vector<64x128xf32>
    %cst_23 = arith.constant 1.000000e+00 : f32
    %81 = vector.broadcast %cst_23 : f32 to vector<64x128xf32>
    %82 = arith.addf %81, %80 : vector<64x128xf32>
    %83 = arith.divf %81, %82 : vector<64x128xf32>
    %84 = vector.extract_strided_slice %67 {offsets = [0, 256], sizes = [64, 128], strides = [1, 1]} : vector<64x512xf32> to vector<64x128xf32>
    %85 = vector.broadcast %7 : vector<1x128xf32> to vector<64x128xf32>
    %86 = arith.addf %84, %85 : vector<64x128xf32>
    %87 = vector.extract_strided_slice %67 {offsets = [0, 384], sizes = [64, 128], strides = [1, 1]} : vector<64x512xf32> to vector<64x128xf32>
    %88 = vector.broadcast %8 : vector<1x128xf32> to vector<64x128xf32>
    %89 = arith.addf %87, %88 : vector<64x128xf32>
    %90 = arith.mulf %75, %89 : vector<64x128xf32>
    %91 = arith.addf %86, %90 : vector<64x128xf32>
    %92 = math.tanh %91 : vector<64x128xf32>
    %cst_24 = arith.constant 1.000000e+00 : f32
    %93 = vector.broadcast %cst_24 : f32 to vector<64x128xf32>
    %94 = arith.subf %93, %83 : vector<64x128xf32>
    %95 = arith.mulf %94, %92 : vector<64x128xf32>
    %96 = arith.mulf %83, %63 : vector<64x128xf32>
    %97 = arith.addf %95, %96 : vector<64x128xf32>
    %98 = vector.shape_cast %97 : vector<64x128xf32> to vector<4x16x128xf32>
    %cst_25 = arith.constant dense<0.000000e+00> : vector<4x128xf32>
    %99 = vector.multi_reduction <add>, %98, %cst_25 [1] : vector<4x16x128xf32> to vector<4x128xf32>
    %100 = vector.shape_cast %99 : vector<4x128xf32> to vector<4x1x128xf32>
    %101 = arith.mulf %98, %98 : vector<4x16x128xf32>
    %cst_26 = arith.constant dense<0.000000e+00> : vector<4x128xf32>
    %102 = vector.multi_reduction <add>, %101, %cst_26 [1] : vector<4x16x128xf32> to vector<4x128xf32>
    %103 = vector.shape_cast %102 : vector<4x128xf32> to vector<4x1x128xf32>
    %cst_27 = arith.constant 6.250000e-02 : f32
    %104 = vector.broadcast %cst_27 : f32 to vector<4x1x128xf32>
    %105 = arith.mulf %100, %104 : vector<4x1x128xf32>
    %cst_28 = arith.constant 6.250000e-02 : f32
    %106 = vector.broadcast %cst_28 : f32 to vector<4x1x128xf32>
    %107 = arith.mulf %103, %106 : vector<4x1x128xf32>
    %108 = arith.mulf %105, %105 : vector<4x1x128xf32>
    %109 = arith.subf %107, %108 : vector<4x1x128xf32>
    %cst_29 = arith.constant 0.000000e+00 : f32
    %110 = vector.broadcast %cst_29 : f32 to vector<4x1x128xf32>
    %111 = arith.maximumf %109, %110 : vector<4x1x128xf32>
    %cst_30 = arith.constant 9.99999974E-6 : f32
    %112 = vector.broadcast %cst_30 : f32 to vector<4x1x128xf32>
    %113 = arith.addf %111, %112 : vector<4x1x128xf32>
    %114 = math.rsqrt %113 : vector<4x1x128xf32>
    %115 = vector.shape_cast %9 : vector<1x128xf32> to vector<1x1x128xf32>
    %116 = vector.broadcast %115 : vector<1x1x128xf32> to vector<4x1x128xf32>
    %117 = arith.mulf %116, %114 : vector<4x1x128xf32>
    %118 = arith.mulf %105, %117 : vector<4x1x128xf32>
    %119 = vector.shape_cast %10 : vector<1x128xf32> to vector<1x1x128xf32>
    %120 = vector.broadcast %119 : vector<1x1x128xf32> to vector<4x1x128xf32>
    %121 = arith.subf %120, %118 : vector<4x1x128xf32>
    %122 = vector.broadcast %117 : vector<4x1x128xf32> to vector<4x16x128xf32>
    %123 = arith.mulf %98, %122 : vector<4x16x128xf32>
    %124 = vector.broadcast %121 : vector<4x1x128xf32> to vector<4x16x128xf32>
    %125 = arith.addf %123, %124 : vector<4x16x128xf32>
    %126 = vector.shape_cast %125 : vector<4x16x128xf32> to vector<64x128xf32>
    %127 = arith.maximumf %54, %126 : vector<64x128xf32>
    %128 = arith.truncf %126 : vector<64x128xf32> to vector<64x128xbf16>
    %c128_31 = arith.constant 128 : index
    %c0_32 = arith.constant 0 : index
    %129 = vector.load %arg3[%c128_31, %c0_32] : memref<512x128xbf16, #tpu.memory_space<vmem>>, vector<128x128xbf16>
    %cst_33 = arith.constant dense<0.000000e+00> : vector<64x128xf32>
    %130 = tpu.matmul %128, %129, %cst_33 {dimension_numbers = #tpu.dot_dimension_numbers<[1], [0], [0], [1], [0, 0, 1, 1], [], []>} : vector<64x128xbf16>, vector<128x128xbf16>, vector<64x128xf32> -> vector<64x128xf32>
    %131 = arith.truncf %130 : vector<64x128xf32> to vector<64x128xbf16>
    %cst_34 = arith.constant dense<0.000000e+00> : vector<64x128xf32>
    %132 = tpu.matmul %56, %131, %cst_34 {dimension_numbers = #tpu.dot_dimension_numbers<[1], [0], [0], [1], [0, 0, 1, 1], [], []>} : vector<64x64xbf16>, vector<64x128xbf16>, vector<64x128xf32> -> vector<64x128xf32>
    %133 = vector.broadcast %4 : vector<1x128xf32> to vector<64x128xf32>
    %134 = arith.addf %132, %133 : vector<64x128xf32>
    %135 = tpu.concatenate %126, %134 in 1 : vector<64x128xf32>, vector<64x128xf32> -> vector<64x256xf32>
    %136 = arith.truncf %135 : vector<64x256xf32> to vector<64x256xbf16>
    %c0_35 = arith.constant 0 : index
    %c0_36 = arith.constant 0 : index
    %137 = vector.load %arg4[%c0_35, %c0_36] : memref<256x512xbf16, #tpu.memory_space<vmem>>, vector<256x512xbf16>
    %cst_37 = arith.constant dense<0.000000e+00> : vector<64x512xf32>
    %138 = tpu.matmul %136, %137, %cst_37 {dimension_numbers = #tpu.dot_dimension_numbers<[1], [0], [0], [1], [0, 0, 1, 1], [], []>} : vector<64x256xbf16>, vector<256x512xbf16>, vector<64x512xf32> -> vector<64x512xf32>
    %139 = vector.extract_strided_slice %138 {offsets = [0, 0], sizes = [64, 128], strides = [1, 1]} : vector<64x512xf32> to vector<64x128xf32>
    %140 = vector.broadcast %5 : vector<1x128xf32> to vector<64x128xf32>
    %141 = arith.addf %139, %140 : vector<64x128xf32>
    %142 = arith.negf %141 : vector<64x128xf32>
    %143 = math.exp %142 : vector<64x128xf32>
    %cst_38 = arith.constant 1.000000e+00 : f32
    %144 = vector.broadcast %cst_38 : f32 to vector<64x128xf32>
    %145 = arith.addf %144, %143 : vector<64x128xf32>
    %146 = arith.divf %144, %145 : vector<64x128xf32>
    %147 = vector.extract_strided_slice %138 {offsets = [0, 128], sizes = [64, 128], strides = [1, 1]} : vector<64x512xf32> to vector<64x128xf32>
    %148 = vector.broadcast %6 : vector<1x128xf32> to vector<64x128xf32>
    %149 = arith.addf %147, %148 : vector<64x128xf32>
    %150 = arith.negf %149 : vector<64x128xf32>
    %151 = math.exp %150 : vector<64x128xf32>
    %cst_39 = arith.constant 1.000000e+00 : f32
    %152 = vector.broadcast %cst_39 : f32 to vector<64x128xf32>
    %153 = arith.addf %152, %151 : vector<64x128xf32>
    %154 = arith.divf %152, %153 : vector<64x128xf32>
    %155 = vector.extract_strided_slice %138 {offsets = [0, 256], sizes = [64, 128], strides = [1, 1]} : vector<64x512xf32> to vector<64x128xf32>
    %156 = vector.broadcast %7 : vector<1x128xf32> to vector<64x128xf32>
    %157 = arith.addf %155, %156 : vector<64x128xf32>
    %158 = vector.extract_strided_slice %138 {offsets = [0, 384], sizes = [64, 128], strides = [1, 1]} : vector<64x512xf32> to vector<64x128xf32>
    %159 = vector.broadcast %8 : vector<1x128xf32> to vector<64x128xf32>
    %160 = arith.addf %158, %159 : vector<64x128xf32>
    %161 = arith.mulf %146, %160 : vector<64x128xf32>
    %162 = arith.addf %157, %161 : vector<64x128xf32>
    %163 = math.tanh %162 : vector<64x128xf32>
    %cst_40 = arith.constant 1.000000e+00 : f32
    %164 = vector.broadcast %cst_40 : f32 to vector<64x128xf32>
    %165 = arith.subf %164, %154 : vector<64x128xf32>
    %166 = arith.mulf %165, %163 : vector<64x128xf32>
    %167 = arith.mulf %154, %134 : vector<64x128xf32>
    %168 = arith.addf %166, %167 : vector<64x128xf32>
    %169 = vector.shape_cast %168 : vector<64x128xf32> to vector<4x16x128xf32>
    %cst_41 = arith.constant dense<0.000000e+00> : vector<4x128xf32>
    %170 = vector.multi_reduction <add>, %169, %cst_41 [1] : vector<4x16x128xf32> to vector<4x128xf32>
    %171 = vector.shape_cast %170 : vector<4x128xf32> to vector<4x1x128xf32>
    %172 = arith.mulf %169, %169 : vector<4x16x128xf32>
    %cst_42 = arith.constant dense<0.000000e+00> : vector<4x128xf32>
    %173 = vector.multi_reduction <add>, %172, %cst_42 [1] : vector<4x16x128xf32> to vector<4x128xf32>
    %174 = vector.shape_cast %173 : vector<4x128xf32> to vector<4x1x128xf32>
    %cst_43 = arith.constant 6.250000e-02 : f32
    %175 = vector.broadcast %cst_43 : f32 to vector<4x1x128xf32>
    %176 = arith.mulf %171, %175 : vector<4x1x128xf32>
    %cst_44 = arith.constant 6.250000e-02 : f32
    %177 = vector.broadcast %cst_44 : f32 to vector<4x1x128xf32>
    %178 = arith.mulf %174, %177 : vector<4x1x128xf32>
    %179 = arith.mulf %176, %176 : vector<4x1x128xf32>
    %180 = arith.subf %178, %179 : vector<4x1x128xf32>
    %cst_45 = arith.constant 0.000000e+00 : f32
    %181 = vector.broadcast %cst_45 : f32 to vector<4x1x128xf32>
    %182 = arith.maximumf %180, %181 : vector<4x1x128xf32>
    %cst_46 = arith.constant 9.99999974E-6 : f32
    %183 = vector.broadcast %cst_46 : f32 to vector<4x1x128xf32>
    %184 = arith.addf %182, %183 : vector<4x1x128xf32>
    %185 = math.rsqrt %184 : vector<4x1x128xf32>
    %186 = vector.shape_cast %9 : vector<1x128xf32> to vector<1x1x128xf32>
    %187 = vector.broadcast %186 : vector<1x1x128xf32> to vector<4x1x128xf32>
    %188 = arith.mulf %187, %185 : vector<4x1x128xf32>
    %189 = arith.mulf %176, %188 : vector<4x1x128xf32>
    %190 = vector.shape_cast %10 : vector<1x128xf32> to vector<1x1x128xf32>
    %191 = vector.broadcast %190 : vector<1x1x128xf32> to vector<4x1x128xf32>
    %192 = arith.subf %191, %189 : vector<4x1x128xf32>
    %193 = vector.broadcast %188 : vector<4x1x128xf32> to vector<4x16x128xf32>
    %194 = arith.mulf %169, %193 : vector<4x16x128xf32>
    %195 = vector.broadcast %192 : vector<4x1x128xf32> to vector<4x16x128xf32>
    %196 = arith.addf %194, %195 : vector<4x16x128xf32>
    %197 = vector.shape_cast %196 : vector<4x16x128xf32> to vector<64x128xf32>
    %198 = arith.maximumf %127, %197 : vector<64x128xf32>
    %199 = arith.truncf %197 : vector<64x128xf32> to vector<64x128xbf16>
    %c128_47 = arith.constant 128 : index
    %c0_48 = arith.constant 0 : index
    %200 = vector.load %arg3[%c128_47, %c0_48] : memref<512x128xbf16, #tpu.memory_space<vmem>>, vector<128x128xbf16>
    %cst_49 = arith.constant dense<0.000000e+00> : vector<64x128xf32>
    %201 = tpu.matmul %199, %200, %cst_49 {dimension_numbers = #tpu.dot_dimension_numbers<[1], [0], [0], [1], [0, 0, 1, 1], [], []>} : vector<64x128xbf16>, vector<128x128xbf16>, vector<64x128xf32> -> vector<64x128xf32>
    %202 = arith.truncf %201 : vector<64x128xf32> to vector<64x128xbf16>
    %cst_50 = arith.constant dense<0.000000e+00> : vector<64x128xf32>
    %203 = tpu.matmul %56, %202, %cst_50 {dimension_numbers = #tpu.dot_dimension_numbers<[1], [0], [0], [1], [0, 0, 1, 1], [], []>} : vector<64x64xbf16>, vector<64x128xbf16>, vector<64x128xf32> -> vector<64x128xf32>
    %204 = vector.broadcast %4 : vector<1x128xf32> to vector<64x128xf32>
    %205 = arith.addf %203, %204 : vector<64x128xf32>
    %206 = tpu.concatenate %197, %205 in 1 : vector<64x128xf32>, vector<64x128xf32> -> vector<64x256xf32>
    %207 = arith.truncf %206 : vector<64x256xf32> to vector<64x256xbf16>
    %c0_51 = arith.constant 0 : index
    %c0_52 = arith.constant 0 : index
    %208 = vector.load %arg4[%c0_51, %c0_52] : memref<256x512xbf16, #tpu.memory_space<vmem>>, vector<256x512xbf16>
    %cst_53 = arith.constant dense<0.000000e+00> : vector<64x512xf32>
    %209 = tpu.matmul %207, %208, %cst_53 {dimension_numbers = #tpu.dot_dimension_numbers<[1], [0], [0], [1], [0, 0, 1, 1], [], []>} : vector<64x256xbf16>, vector<256x512xbf16>, vector<64x512xf32> -> vector<64x512xf32>
    %210 = vector.extract_strided_slice %209 {offsets = [0, 0], sizes = [64, 128], strides = [1, 1]} : vector<64x512xf32> to vector<64x128xf32>
    %211 = vector.broadcast %5 : vector<1x128xf32> to vector<64x128xf32>
    %212 = arith.addf %210, %211 : vector<64x128xf32>
    %213 = arith.negf %212 : vector<64x128xf32>
    %214 = math.exp %213 : vector<64x128xf32>
    %cst_54 = arith.constant 1.000000e+00 : f32
    %215 = vector.broadcast %cst_54 : f32 to vector<64x128xf32>
    %216 = arith.addf %215, %214 : vector<64x128xf32>
    %217 = arith.divf %215, %216 : vector<64x128xf32>
    %218 = vector.extract_strided_slice %209 {offsets = [0, 128], sizes = [64, 128], strides = [1, 1]} : vector<64x512xf32> to vector<64x128xf32>
    %219 = vector.broadcast %6 : vector<1x128xf32> to vector<64x128xf32>
    %220 = arith.addf %218, %219 : vector<64x128xf32>
    %221 = arith.negf %220 : vector<64x128xf32>
    %222 = math.exp %221 : vector<64x128xf32>
    %cst_55 = arith.constant 1.000000e+00 : f32
    %223 = vector.broadcast %cst_55 : f32 to vector<64x128xf32>
    %224 = arith.addf %223, %222 : vector<64x128xf32>
    %225 = arith.divf %223, %224 : vector<64x128xf32>
    %226 = vector.extract_strided_slice %209 {offsets = [0, 256], sizes = [64, 128], strides = [1, 1]} : vector<64x512xf32> to vector<64x128xf32>
    %227 = vector.broadcast %7 : vector<1x128xf32> to vector<64x128xf32>
    %228 = arith.addf %226, %227 : vector<64x128xf32>
    %229 = vector.extract_strided_slice %209 {offsets = [0, 384], sizes = [64, 128], strides = [1, 1]} : vector<64x512xf32> to vector<64x128xf32>
    %230 = vector.broadcast %8 : vector<1x128xf32> to vector<64x128xf32>
    %231 = arith.addf %229, %230 : vector<64x128xf32>
    %232 = arith.mulf %217, %231 : vector<64x128xf32>
    %233 = arith.addf %228, %232 : vector<64x128xf32>
    %234 = math.tanh %233 : vector<64x128xf32>
    %cst_56 = arith.constant 1.000000e+00 : f32
    %235 = vector.broadcast %cst_56 : f32 to vector<64x128xf32>
    %236 = arith.subf %235, %225 : vector<64x128xf32>
    %237 = arith.mulf %236, %234 : vector<64x128xf32>
    %238 = arith.mulf %225, %205 : vector<64x128xf32>
    %239 = arith.addf %237, %238 : vector<64x128xf32>
    %240 = vector.shape_cast %239 : vector<64x128xf32> to vector<4x16x128xf32>
    %cst_57 = arith.constant dense<0.000000e+00> : vector<4x128xf32>
    %241 = vector.multi_reduction <add>, %240, %cst_57 [1] : vector<4x16x128xf32> to vector<4x128xf32>
    %242 = vector.shape_cast %241 : vector<4x128xf32> to vector<4x1x128xf32>
    %243 = arith.mulf %240, %240 : vector<4x16x128xf32>
    %cst_58 = arith.constant dense<0.000000e+00> : vector<4x128xf32>
    %244 = vector.multi_reduction <add>, %243, %cst_58 [1] : vector<4x16x128xf32> to vector<4x128xf32>
    %245 = vector.shape_cast %244 : vector<4x128xf32> to vector<4x1x128xf32>
    %cst_59 = arith.constant 6.250000e-02 : f32
    %246 = vector.broadcast %cst_59 : f32 to vector<4x1x128xf32>
    %247 = arith.mulf %242, %246 : vector<4x1x128xf32>
    %cst_60 = arith.constant 6.250000e-02 : f32
    %248 = vector.broadcast %cst_60 : f32 to vector<4x1x128xf32>
    %249 = arith.mulf %245, %248 : vector<4x1x128xf32>
    %250 = arith.mulf %247, %247 : vector<4x1x128xf32>
    %251 = arith.subf %249, %250 : vector<4x1x128xf32>
    %cst_61 = arith.constant 0.000000e+00 : f32
    %252 = vector.broadcast %cst_61 : f32 to vector<4x1x128xf32>
    %253 = arith.maximumf %251, %252 : vector<4x1x128xf32>
    %cst_62 = arith.constant 9.99999974E-6 : f32
    %254 = vector.broadcast %cst_62 : f32 to vector<4x1x128xf32>
    %255 = arith.addf %253, %254 : vector<4x1x128xf32>
    %256 = math.rsqrt %255 : vector<4x1x128xf32>
    %257 = vector.shape_cast %9 : vector<1x128xf32> to vector<1x1x128xf32>
    %258 = vector.broadcast %257 : vector<1x1x128xf32> to vector<4x1x128xf32>
    %259 = arith.mulf %258, %256 : vector<4x1x128xf32>
    %260 = arith.mulf %247, %259 : vector<4x1x128xf32>
    %261 = vector.shape_cast %10 : vector<1x128xf32> to vector<1x1x128xf32>
    %262 = vector.broadcast %261 : vector<1x1x128xf32> to vector<4x1x128xf32>
    %263 = arith.subf %262, %260 : vector<4x1x128xf32>
    %264 = vector.broadcast %259 : vector<4x1x128xf32> to vector<4x16x128xf32>
    %265 = arith.mulf %240, %264 : vector<4x16x128xf32>
    %266 = vector.broadcast %263 : vector<4x1x128xf32> to vector<4x16x128xf32>
    %267 = arith.addf %265, %266 : vector<4x16x128xf32>
    %268 = vector.shape_cast %267 : vector<4x16x128xf32> to vector<64x128xf32>
    %269 = arith.maximumf %198, %268 : vector<64x128xf32>
    %270 = vector.shape_cast %269 : vector<64x128xf32> to vector<4x16x128xf32>
    %cst_63 = arith.constant dense<0.000000e+00> : vector<4x128xf32>
    %271 = vector.multi_reduction <add>, %270, %cst_63 [1] : vector<4x16x128xf32> to vector<4x128xf32>
    %272 = vector.shape_cast %271 : vector<4x128xf32> to vector<4x1x128xf32>
    %273 = arith.mulf %270, %270 : vector<4x16x128xf32>
    %cst_64 = arith.constant dense<0.000000e+00> : vector<4x128xf32>
    %274 = vector.multi_reduction <add>, %273, %cst_64 [1] : vector<4x16x128xf32> to vector<4x128xf32>
    %275 = vector.shape_cast %274 : vector<4x128xf32> to vector<4x1x128xf32>
    %cst_65 = arith.constant 6.250000e-02 : f32
    %276 = vector.broadcast %cst_65 : f32 to vector<4x1x128xf32>
    %277 = arith.mulf %272, %276 : vector<4x1x128xf32>
    %cst_66 = arith.constant 6.250000e-02 : f32
    %278 = vector.broadcast %cst_66 : f32 to vector<4x1x128xf32>
    %279 = arith.mulf %275, %278 : vector<4x1x128xf32>
    %280 = arith.mulf %277, %277 : vector<4x1x128xf32>
    %281 = arith.subf %279, %280 : vector<4x1x128xf32>
    %cst_67 = arith.constant 0.000000e+00 : f32
    %282 = vector.broadcast %cst_67 : f32 to vector<4x1x128xf32>
    %283 = arith.maximumf %281, %282 : vector<4x1x128xf32>
    %cst_68 = arith.constant 9.99999974E-6 : f32
    %284 = vector.broadcast %cst_68 : f32 to vector<4x1x128xf32>
    %285 = arith.addf %283, %284 : vector<4x1x128xf32>
    %286 = math.rsqrt %285 : vector<4x1x128xf32>
    %287 = vector.shape_cast %11 : vector<1x128xf32> to vector<1x1x128xf32>
    %288 = vector.broadcast %287 : vector<1x1x128xf32> to vector<4x1x128xf32>
    %289 = arith.mulf %288, %286 : vector<4x1x128xf32>
    %290 = arith.mulf %277, %289 : vector<4x1x128xf32>
    %291 = vector.shape_cast %12 : vector<1x128xf32> to vector<1x1x128xf32>
    %292 = vector.broadcast %291 : vector<1x1x128xf32> to vector<4x1x128xf32>
    %293 = arith.subf %292, %290 : vector<4x1x128xf32>
    %294 = vector.broadcast %289 : vector<4x1x128xf32> to vector<4x16x128xf32>
    %295 = arith.mulf %270, %294 : vector<4x16x128xf32>
    %296 = vector.broadcast %293 : vector<4x1x128xf32> to vector<4x16x128xf32>
    %297 = arith.addf %295, %296 : vector<4x16x128xf32>
    %298 = vector.shape_cast %297 : vector<4x16x128xf32> to vector<64x128xf32>
    %299 = arith.truncf %298 : vector<64x128xf32> to vector<64x128xbf16>
    %c256 = arith.constant 256 : index
    %c0_69 = arith.constant 0 : index
    %300 = vector.load %arg3[%c256, %c0_69] : memref<512x128xbf16, #tpu.memory_space<vmem>>, vector<128x128xbf16>
    %cst_70 = arith.constant dense<0.000000e+00> : vector<64x128xf32>
    %301 = tpu.matmul %299, %300, %cst_70 {dimension_numbers = #tpu.dot_dimension_numbers<[1], [0], [0], [1], [0, 0, 1, 1], [], []>} : vector<64x128xbf16>, vector<128x128xbf16>, vector<64x128xf32> -> vector<64x128xf32>
    %302 = vector.broadcast %13 : vector<1x128xf32> to vector<64x128xf32>
    %303 = arith.addf %301, %302 : vector<64x128xf32>
    %304 = vector.shape_cast %303 : vector<64x128xf32> to vector<4x16x128xf32>
    %cst_71 = arith.constant dense<0.000000e+00> : vector<4x128xf32>
    %305 = vector.multi_reduction <add>, %304, %cst_71 [1] : vector<4x16x128xf32> to vector<4x128xf32>
    %306 = vector.shape_cast %305 : vector<4x128xf32> to vector<4x1x128xf32>
    %307 = arith.mulf %304, %304 : vector<4x16x128xf32>
    %cst_72 = arith.constant dense<0.000000e+00> : vector<4x128xf32>
    %308 = vector.multi_reduction <add>, %307, %cst_72 [1] : vector<4x16x128xf32> to vector<4x128xf32>
    %309 = vector.shape_cast %308 : vector<4x128xf32> to vector<4x1x128xf32>
    %cst_73 = arith.constant 6.250000e-02 : f32
    %310 = vector.broadcast %cst_73 : f32 to vector<4x1x128xf32>
    %311 = arith.mulf %306, %310 : vector<4x1x128xf32>
    %cst_74 = arith.constant 6.250000e-02 : f32
    %312 = vector.broadcast %cst_74 : f32 to vector<4x1x128xf32>
    %313 = arith.mulf %309, %312 : vector<4x1x128xf32>
    %314 = arith.mulf %311, %311 : vector<4x1x128xf32>
    %315 = arith.subf %313, %314 : vector<4x1x128xf32>
    %cst_75 = arith.constant 0.000000e+00 : f32
    %316 = vector.broadcast %cst_75 : f32 to vector<4x1x128xf32>
    %317 = arith.maximumf %315, %316 : vector<4x1x128xf32>
    %cst_76 = arith.constant 9.99999974E-6 : f32
    %318 = vector.broadcast %cst_76 : f32 to vector<4x1x128xf32>
    %319 = arith.addf %317, %318 : vector<4x1x128xf32>
    %320 = math.rsqrt %319 : vector<4x1x128xf32>
    %321 = vector.shape_cast %14 : vector<1x128xf32> to vector<1x1x128xf32>
    %322 = vector.broadcast %321 : vector<1x1x128xf32> to vector<4x1x128xf32>
    %323 = arith.mulf %322, %320 : vector<4x1x128xf32>
    %324 = arith.mulf %311, %323 : vector<4x1x128xf32>
    %325 = vector.shape_cast %15 : vector<1x128xf32> to vector<1x1x128xf32>
    %326 = vector.broadcast %325 : vector<1x1x128xf32> to vector<4x1x128xf32>
    %327 = arith.subf %326, %324 : vector<4x1x128xf32>
    %328 = vector.broadcast %323 : vector<4x1x128xf32> to vector<4x16x128xf32>
    %329 = arith.mulf %304, %328 : vector<4x16x128xf32>
    %330 = vector.broadcast %327 : vector<4x1x128xf32> to vector<4x16x128xf32>
    %331 = arith.addf %329, %330 : vector<4x16x128xf32>
    %332 = vector.shape_cast %331 : vector<4x16x128xf32> to vector<64x128xf32>
    %cst_77 = arith.constant 0.000000e+00 : f32
    %333 = vector.broadcast %cst_77 : f32 to vector<64x128xf32>
    %334 = arith.maximumf %332, %333 : vector<64x128xf32>
    %335 = arith.truncf %334 : vector<64x128xf32> to vector<64x128xbf16>
    %c384 = arith.constant 384 : index
    %c0_78 = arith.constant 0 : index
    %336 = vector.load %arg3[%c384, %c0_78] : memref<512x128xbf16, #tpu.memory_space<vmem>>, vector<128x128xbf16>
    %cst_79 = arith.constant dense<0.000000e+00> : vector<64x128xf32>
    %337 = tpu.matmul %335, %336, %cst_79 {dimension_numbers = #tpu.dot_dimension_numbers<[1], [0], [0], [1], [0, 0, 1, 1], [], []>} : vector<64x128xbf16>, vector<128x128xbf16>, vector<64x128xf32> -> vector<64x128xf32>
    %338 = vector.broadcast %16 : vector<1x128xf32> to vector<64x128xf32>
    %339 = arith.addf %337, %338 : vector<64x128xf32>
    %c0_80 = arith.constant 0 : index
    %c0_81 = arith.constant 0 : index
    %c0_82 = arith.constant 0 : index
    %340 = vector.load %arg6[%c0_80, %c0_81, %c0_82] : memref<1x64x128xf32, #tpu.memory_space<vmem>>, vector<1x64x128xf32>
    %341 = vector.shape_cast %340 : vector<1x64x128xf32> to vector<64x128xf32>
    %342 = vector.shape_cast %339 : vector<64x128xf32> to vector<1x64x128xf32>
    tpu.vector_store %arg6[%c0_80, %c0_81, %c0_82], %342 {strides = array<i32>} : memref<1x64x128xf32, #tpu.memory_space<vmem>>, vector<1x64x128xf32>,
    return
  }
  func.func @transform_0(%arg0: i32) -> (i32, i32, i32) {
    %c0_i32 = arith.constant 0 : i32
    %c0_i32_0 = arith.constant 0 : i32
    %c0_i32_1 = arith.constant 0 : i32
    return %arg0, %c0_i32, %c0_i32_0 : i32, i32, i32
  }
  func.func @transform_1(%arg0: i32) -> (i32, i32, i32) {
    %c0_i32 = arith.constant 0 : i32
    %c0_i32_0 = arith.constant 0 : i32
    %c0_i32_1 = arith.constant 0 : i32
    return %arg0, %c0_i32, %c0_i32_0 : i32, i32, i32
  }
  func.func @transform_2(%arg0: i32) -> (i32, i32) {
    %c0_i32 = arith.constant 0 : i32
    %c0_i32_0 = arith.constant 0 : i32
    %c0_i32_1 = arith.constant 0 : i32
    return %c0_i32, %c0_i32_0 : i32, i32
  }
  func.func @transform_3(%arg0: i32) -> (i32, i32) {
    %c0_i32 = arith.constant 0 : i32
    %c0_i32_0 = arith.constant 0 : i32
    %c0_i32_1 = arith.constant 0 : i32
    return %c0_i32, %c0_i32_0 : i32, i32
  }
  func.func @transform_4(%arg0: i32) -> (i32, i32) {
    %c0_i32 = arith.constant 0 : i32
    %c0_i32_0 = arith.constant 0 : i32
    %c0_i32_1 = arith.constant 0 : i32
    return %c0_i32, %c0_i32_0 : i32, i32
  }
  func.func @transform_5(%arg0: i32) -> (i32, i32, i32) {
    %c0_i32 = arith.constant 0 : i32
    %c0_i32_0 = arith.constant 0 : i32
    %c0_i32_1 = arith.constant 0 : i32
    return %arg0, %c0_i32, %c0_i32_0 : i32, i32, i32
  }
}

</mosaic_0001>

<bundles_post_ra>
// kernel: tpu_custom_call.1
= control target key start
LH: loop header
LB: loop body
LE: loop exit
PB: predicated region body
PF: predicated region fallthrough
CT: control target
= control target key end

     0   :  { %10 = vsyncpa [#allocation3], 0  ;;  %s8181_s0 = inlined_call_operand.hbm [shape: f32[1,64,128], index: 0, kind: input, shape index: {}]   ;;  %s8182_s1 = inlined_call_operand.hbm [shape: bf16[1,64,64], index: 1, kind: input, shape index: {}]   ;;  %s8183_s2 = inlined_call_operand.hbm [shape: bf16[512,128], index: 2, kind: input, shape index: {}]   ;;  %s8184_s3 = inlined_call_operand.hbm [shape: bf16[256,512], index: 3, kind: input, shape index: {}]   ;;  %s8185_s4 = inlined_call_operand.hbm [shape: f32[16,128], index: 4, kind: input, shape index: {}]   ;;  %s8186_s5 = inlined_call_operand.hbm [shape: f32[1,64,128], index: 5, kind: output, shape index: {}]  }
   0x1   :  { %11 = vsyncpa [#allocation6], 0 }
   0x2   :  { %12 = vsyncpa [#allocation9], 0  ;;  %s31_s20 = sshll.u32 %s8182_s1, 4  ;;  %s32_s20 = int_to_ptr.hbm [resolvable:$true] %s31_s20 }
   0x3   :  { %13 = vsyncpa [#allocation4], 0  ;;  %s5149_s21 = smov [#allocation5]   ;;  %s57_s25 = sshll.u32 %s8184_s3, 4  ;;  %s58_s25 = int_to_ptr.hbm [resolvable:$true] %s57_s25 }
   0x4   :  { %s33_s22 = sshll.u32 %s5149_s21, 4  ;;  %s5150_s26 = smov 64   ;;  %s34_s22 = int_to_ptr.vmem [resolvable:$true] %s33_s22 }
   0x5   :  { %s5151_s27 = smov 4   ;;  %s5152_s28 = smov [#allocation8]  }
   0x6   :  { %39 = dma.hbm_to_vmem [thread:$0]  %s32_s20, 512, %s34_s22, [#allocation6], %s5150_s26, %s5150_s26, %s5151_s27  }
   0x7   :  { %s59_s29 = sshll.u32 %s5152_s28, 4  ;;  %s5153_s30 = smov 256   ;;  %s60_s29 = int_to_ptr.vmem [resolvable:$true] %s59_s29 }
   0x8   :  { %s5154_s6 = smov 16   ;;  %s18_s8 = sshll.u32 %s8181_s0, 4  ;;  %s19_s8 = int_to_ptr.hbm [resolvable:$true] %s18_s8 }
   0x9   :  { %65 = dma.hbm_to_vmem [thread:$0]  %s58_s25, 8192, %s60_s29, [#allocation9], %s5153_s30, %s5153_s30, %s5154_s6  }
   0xa   :  { %s5155_s9 = smov [#allocation2]   ;;  %s44_s12 = sshll.u32 %s8183_s2, 4  ;;  %s45_s12 = int_to_ptr.hbm [resolvable:$true] %s44_s12 }
   0xb   :  { %s20_s10 = sshll.u32 %s5155_s9, 4  ;;  %s5156_s13 = smov 128   ;;  %s21_s10 = int_to_ptr.vmem [resolvable:$true] %s20_s10 }
   0xc   :  { %s5157_s14 = smov 8   ;;  %s5158_s15 = smov [#allocation7]  }
   0xd   :  { %26 = dma.hbm_to_vmem [thread:$0]  %s19_s8, 1024, %s21_s10, [#allocation3], %s5156_s13, %s5156_s13, %s5157_s14  }
   0xe   :  { %s46_s16 = sshll.u32 %s5158_s15, 4  ;;  %s70_s0 = sshll.u32 %s8185_s4, 4  ;;  %s47_s16 = int_to_ptr.vmem [resolvable:$true] %s46_s16  ;;  %s71_s0 = int_to_ptr.hbm [resolvable:$true] %s70_s0 }
   0xf   :  { %52 = dma.hbm_to_vmem [thread:$0]  %s45_s12, 4096, %s47_s16, [#allocation6], %s5150_s26, %s5150_s26, %s5151_s27  }
  0x10   :  { %s5159_s19 = smov [#allocation10]  }
  0x11   :  { %s72_s20 = sshll.u32 %s5159_s19, 4  ;;  %s73_s20 = int_to_ptr.vmem [resolvable:$true] %s72_s20 }
  0x12   :  { %78 = dma.hbm_to_vmem [thread:$0]  %s71_s0, 256, %s73_s20, [#allocation9], %s5156_s13, %s5156_s13, %s5157_s14  }
  0x13   :  { %5141 = dma.done.wait [#allocation3], 1024  }
  0x14   :  { %5142 = vsyncadd [#allocation3], 4294966272 }
  0x15   :  { %5143 = dma.done.wait [#allocation6], 4608  }
  0x16   :  { %5144 = vsyncadd [#allocation6], 4294962688 }
  0x17   :  { %5145 = dma.done.wait [#allocation9], 8448  }
  0x18   :  { %5146 = vsyncadd [#allocation9], 4294958848  ;;  %v4572_v0 = vld [vmem:[#allocation7 + $0x38] sm:$0xff]  ;;  %v4571_v1 = vld [vmem:[#allocation7 + $0x30] sm:$0xff]  ;;  %vm522_vm12 = vcmask 523264   ;;  %s5160_s2 = smov [#allocation11]  }
  0x19   :  { %179 = vmatpush.bf16.msra.mxu0 %v4572_v0  ;;  %v4570_v2 = vld [vmem:[#allocation7 + $0x28] sm:$0xff]  ;;  %v4569_v3 = vld [vmem:[#allocation7 + $0x20] sm:$0xff]  ;;  %v4568_v4 = vld [vmem:[#allocation7 + $0x18] sm:$0xff]  ;;  %s4088_s4 = sshll.u32 %s5160_s2, 4  ;;  %s4090_s23 = sshll.u32 %s8186_s5, 4  ;;  %s4089_s4 = int_to_ptr.vmem [resolvable:$true] %s4088_s4  ;;  %s4091_s23 = int_to_ptr.hbm [resolvable:$true] %s4090_s23 }
  0x1a   :  { %v4567_v5 = vld [vmem:[#allocation7 + $0x10] sm:$0xff]  ;;  %v4566_v6 = vld [vmem:[#allocation7 + $0x8] sm:$0xff]  ;;  %v4565_v7 = vld [vmem:[#allocation7] sm:$0xff] }
  0x1b   :  { %v102_v8 = vld [vmem:[#allocation2] sm:$0xff]  ;;  %v103_v9 = vld [vmem:[#allocation2 + $0x8] sm:$0xff]  ;;  %v104_v11 = vld [vmem:[#allocation2 + $0x10] sm:$0xff] }
  0x1c   :  { %v110_v10 = vpack.c.bf16 %v103_v9, %v102_v8  ;;  %v105_v12 = vld [vmem:[#allocation2 + $0x18] sm:$0xff]  ;;  %v106_v14 = vld [vmem:[#allocation2 + $0x20] sm:$0xff]  ;;  %v107_v15 = vld [vmem:[#allocation2 + $0x28] sm:$0xff] }
  0x1d   :  { %180 = vmatpush.bf16.msra.mxu0 %v4571_v1  ;;  %v111_v13 = vpack.c.bf16 %v105_v12, %v104_v11  ;;  %v112_v16 = vpack.c.bf16 %v107_v15, %v106_v14  ;;  %v108_v17 = vld [vmem:[#allocation2 + $0x30] sm:$0xff]  ;;  %v109_v18 = vld [vmem:[#allocation2 + $0x38] sm:$0xff]  ;;  %v5212_v20 = vld [vmem:[#allocation10] sm:$0xff] }
  0x1e   :  { %v113_v19 = vpack.c.bf16 %v109_v18, %v108_v17  ;;  %v5215_v22 = vperm.slane %v5212_v20, 0  ;;  %v4303_v23 = vld [vmem:[#allocation8 + $0xe0] sm:$0xf]  ;;  %v4615_v24 = vld [vmem:[#allocation8 + $0xec] sm:$0xf0]  ;;  %v5218_v26 = vld [vmem:[#allocation7 + $0x78] sm:$0xff] }
  0x1f   :  { %v5220_v27 = vor.u32 %v4615_v24, %v4303_v23  ;;  %468 = vmatpush.bf16.msra.mxu1 %v5218_v26  ;;  %v4287_v29 = vld [vmem:[#allocation8 + $0xc0] sm:$0xf]  ;;  %v4611_v30 = vld [vmem:[#allocation8 + $0xcc] sm:$0xf0]  ;;  %v5241_v41 = vld [vmem:[#allocation7 + $0x68] sm:$0xff] }
  0x20   :  { %v5227_v33 = vld [vmem:[#allocation7 + $0x70] sm:$0xff]  ;;  %v5229_v34 = vor.u32 %v4611_v30, %v4287_v29  ;;  %v4271_v36 = vld [vmem:[#allocation8 + $0xa0] sm:$0xf]  ;;  %v5254_v59 = vld [vmem:[#allocation7 + $0x58] sm:$0xff] }
  0x21   :  { %181 = vmatpush.bf16.msra.mxu0 %v4570_v2  ;;  %8283 = vst [vmem:[#allocation16_spill] sm:$0xff] %v5220_v27  ;;  %952 = vmatpush.bf16.msra.mxu3 %v5220_v27  ;;  %v4607_v37 = vld [vmem:[#allocation8 + $0xac] sm:$0xf0]  ;;  %v4255_v46 = vld [vmem:[#allocation8 + $0x80] sm:$0xf]  ;;  %v5281_v18 = vld [vmem:[#allocation7 + $0x48] sm:$0xff] }
  0x22   :  { %8284 = vst [vmem:[#allocation17_spill] sm:$0xff] %v5229_v34  ;;  %v5243_v42 = vor.u32 %v4607_v37, %v4271_v36  ;;  %v4603_v47 = vld [vmem:[#allocation8 + $0x8c] sm:$0xf0]  ;;  %v5247_v50 = vld [vmem:[#allocation7 + $0x60] sm:$0xff] }
  0x23   :  { %469 = vmatpush.bf16.msra.mxu1 %v5227_v33  ;;  %v5249_v51 = vor.u32 %v4603_v47, %v4255_v46  ;;  %v4239_v55 = vld [vmem:[#allocation8 + $0x60] sm:$0xf]  ;;  %v4599_v56 = vld [vmem:[#allocation8 + $0x6c] sm:$0xf0] }
  0x24   :  { %8285 = vst [vmem:[#allocation18_spill] sm:$0xff] %v5243_v42  ;;  %v5256_v60 = vor.u32 %v4599_v56, %v4239_v55  ;;  %v4591_v17 = vld [vmem:[#allocation8 + $0x2c] sm:$0xf0]  ;;  %v5287_v37 = vld [vmem:[#allocation7 + $0x40] sm:$0xff] }
  0x25   :  { %182 = vmatpush.bf16.msra.mxu0 %v4569_v3  ;;  %953 = vmatpush.bf16.msra.mxu3 %v5229_v34  ;;  %8286 = vst [vmem:[#allocation19_spill] sm:$0xff] %v5249_v51  ;;  %v4587_v36 = vld [vmem:[#allocation8 + $0xc] sm:$0xf0] }
  0x26   :  { %8287 = vst [vmem:[#allocation20_spill] sm:$0xff] %v5256_v60 }
  0x27   :  { %470 = vmatpush.bf16.msra.mxu1 %v5241_v41 }
  0x29   :  { %183 = vmatpush.bf16.msra.mxu0 %v4568_v4  ;;  %954 = vmatpush.bf16.msra.mxu3 %v5243_v42  ;;  %v4223_v4 = vld [vmem:[#allocation8 + $0x40] sm:$0xf] }
  0x2b   :  { %471 = vmatpush.bf16.msra.mxu1 %v5247_v50 }
  0x2d   :  { %184 = vmatpush.bf16.msra.mxu0 %v4567_v5  ;;  %955 = vmatpush.bf16.msra.mxu3 %v5249_v51  ;;  %v4595_v5 = vld [vmem:[#allocation8 + $0x4c] sm:$0xf0] }
  0x2f   :  { %472 = vmatpush.bf16.msra.mxu1 %v5254_v59 }
  0x31   :  { %185 = vmatpush.bf16.msra.mxu0 %v4566_v6  ;;  %956 = vmatpush.bf16.msra.mxu3 %v5256_v60  ;;  %v5263_v6 = vld [vmem:[#allocation7 + $0x50] sm:$0xff] }
  0x33   :  { %473 = vmatpush.bf16.msra.mxu1 %v5263_v6 }
  0x35   :  { %186 = vmatpush.bf16.msra.mxu0 %v4565_v7  ;;  %v5265_v7 = vor.u32 %v4595_v5, %v4223_v4 }
  0x37   :  { %8288 = vst [vmem:[#allocation21_spill] sm:$0xff] %v5265_v7  ;;  %957 = vmatpush.bf16.msra.mxu3 %v5265_v7  ;;  %474 = vmatpush.bf16.msra.mxu1 %v5281_v18 }
  0x38   :  { %187 = vmatmul.bf16.vlgmr.msra.gmra.mxu0 %v110_v10 }
  0x3b   :  { %475 = vmatpush.bf16.msra.mxu1 %v5287_v37 }
  0x48   :  { %192 = vmatmul.bf16.gmra.mxu0 %v111_v13 }
  0x58   :  { %197 = vmatmul.bf16.gmra.mxu0 %v112_v16  ;;  %v4207_v16 = vld [vmem:[#allocation8 + $0x20] sm:$0xf] }
  0x68   :  { %202 = vmatmul.bf16.gmra.mxu0 %v113_v19  ;;  %v5283_v19 = vor.u32 %v4591_v17, %v4207_v16 }
  0x6a   :  { %8289 = vst [vmem:[#allocation22_spill] sm:$0xff] %v5283_v19  ;;  %958 = vmatpush.bf16.msra.mxu3 %v5283_v19 }
  0xb5   :  { %v188_v21 = vpop.f32.mrf.mxu0 }
  0xb6   :  { %v189_v25 = vadd.f32 %v188_v21, %v5215_v22 }
  0xb8   :  { %v5224_v31 = vmax.f32 %v189_v25, 0.0 }
  0xba   :  { %v244_v38 = vmul.f32 %v5224_v31, %v5224_v31 }
  0xbd   :  { %v190_v28 = vpop.f32.mrf.mxu0 }
  0xbe   :  { %v191_v32 = vadd.f32 %v190_v28, %v5215_v22 }
  0xc0   :  { %v5231_v35 = vmax.f32 %v191_v32, 0.0  ;;  %v4191_v32 = vld [vmem:[#allocation8] sm:$0xf] }
  0xc2   :  { %v216_v39 = vadd.f32 %v5231_v35, %v5224_v31  ;;  %v245_v40 = vmul.f32 %v5231_v35, %v5231_v35 }
  0xc4   :  { %v217_v43 = vrot.slane %v216_v39, 4  ;;  %v252_v44 = vadd.f32 %v245_v40, %v244_v38  ;;  %v5289_v38 = vor.u32 %v4587_v36, %v4191_v32 }
  0xc5   :  { %v193_v45 = vpop.f32.mrf.mxu0 }
  0xc6   :  { %v218_v48 = vadd.f32 %v217_v43, %v216_v39  ;;  %v253_v49 = vrot.slane %v252_v44, 4  ;;  %v194_v54 = vadd.f32 %v193_v45, %v5215_v22  ;;  %8290 = vst [vmem:[#allocation23_spill] sm:$0xff] %v5289_v38  ;;  %959 = vmatpush.bf16.msra.mxu3 %v5289_v38 }
  0xc8   :  { %v219_v52 = vrot.slane %v218_v48, 2  ;;  %v254_v53 = vadd.f32 %v253_v49, %v252_v44  ;;  %v5260_v63 = vmax.f32 %v194_v54, 0.0 }
  0xca   :  { %v220_v57 = vadd.f32 %v219_v52, %v218_v48  ;;  %v255_v58 = vrot.slane %v254_v53, 2  ;;  %v246_v11 = vmul.f32 %v5260_v63, %v5260_v63 }
  0xcc   :  { %v221_v61 = vrot.slane %v220_v57, 1  ;;  %v256_v62 = vadd.f32 %v255_v58, %v254_v53 }
  0xcd   :  { %v195_v0 = vpop.f32.mrf.mxu0 }
  0xce   :  { %v222_v1 = vadd.f32 %v221_v61, %v220_v57  ;;  %v257_v2 = vrot.slane %v256_v62, 1  ;;  %v196_v3 = vadd.f32 %v195_v0, %v5215_v22 }
  0xd0   :  { %v258_v8 = vadd.f32 %v257_v2, %v256_v62  ;;  %v5267_v9 = vmul.f32 0.0625, %v222_v1  ;;  %v5269_v10 = vmax.f32 %v196_v3, 0.0 }
  0xd2   :  { %v284_v12 = vmul.f32 0.0625, %v258_v8  ;;  %v288_v13 = vmul.f32 %v5267_v9, %v5267_v9  ;;  %v223_v14 = vadd.f32 %v5269_v10, %v5260_v63  ;;  %v247_v15 = vmul.f32 %v5269_v10, %v5269_v10 }
  0xd4   :  { %v292_v21 = vsub.f32 %v284_v12, %v288_v13  ;;  %v224_v23 = vrot.slane %v223_v14, 4  ;;  %v259_v24 = vadd.f32 %v247_v15, %v246_v11 }
  0xd5   :  { %v198_v25 = vpop.f32.mrf.mxu0 }
  0xd6   :  { %v296_v28 = vmax.f32 %v292_v21, 0.0  ;;  %v225_v29 = vadd.f32 %v224_v23, %v223_v14  ;;  %v260_v30 = vrot.slane %v259_v24, 4  ;;  %v199_v44 = vadd.f32 %v198_v25, %v5215_v22 }
  0xd8   :  { %v300_v39 = vadd.f32 1e-05, %v296_v28  ;;  %v226_v40 = vrot.slane %v225_v29, 2  ;;  %v261_v43 = vadd.f32 %v260_v30, %v259_v24  ;;  %v5294_v49 = vmax.f32 %v199_v44, 0.0 }
  0xda   :  { %4689 = vrsqrt.f32 %v300_v39  ;;  %v227_v45 = vadd.f32 %v226_v40, %v225_v29  ;;  %v262_v46 = vrot.slane %v261_v43, 2  ;;  %v248_v0 = vmul.f32 %v5294_v49, %v5294_v49 }
  0xdb   :  { %vm310_vm1 = vweird.f32 %v300_v39 }
  0xdc   :  { %v228_v47 = vrot.slane %v227_v45, 1  ;;  %v263_v48 = vadd.f32 %v262_v46, %v261_v43 }
  0xdd   :  { %v200_v52 = vpop.f32.mrf.mxu0 }
  0xde   :  { %v229_v53 = vadd.f32 %v228_v47, %v227_v45  ;;  %v264_v54 = vrot.slane %v263_v48, 1  ;;  %v201_v55 = vadd.f32 %v200_v52, %v5215_v22 }
  0xe0   :  { %v4690_v56 = vpop.eup %4689  ;;  %v265_v57 = vadd.f32 %v264_v54, %v263_v48  ;;  %v5297_v58 = vmul.f32 0.0625, %v229_v53  ;;  %v5299_v61 = vmax.f32 %v201_v55, 0.0 }
  0xe1   :  { %v305_v62 = vmul.f32 %v4690_v56, %v300_v39  ;;  %vm311_vm0 = vweird.f32 %v4690_v56 }
  0xe2   :  { %v285_v1 = vmul.f32 0.0625, %v265_v57  ;;  %v289_v2 = vmul.f32 %v5297_v58, %v5297_v58  ;;  %v230_v3 = vadd.f32 %v5299_v61, %v5294_v49  ;;  %v249_v4 = vmul.f32 %v5299_v61, %v5299_v61  ;;  %vm312_vm2 = vmor %vm310_vm1, %vm311_vm0 }
  0xe3   :  { %v306_v5 = vmul.f32 %v4690_v56, %v305_v62 }
  0xe4   :  { %v293_v8 = vsub.f32 %v285_v1, %v289_v2  ;;  %v231_v11 = vrot.slane %v230_v3, 4  ;;  %v266_v12 = vadd.f32 %v249_v4, %v248_v0 }
  0xe5   :  { %v307_v13 = vmul.f32 0.5, %v306_v5  ;;  %v203_v14 = vpop.f32.mrf.mxu0 }
  0xe6   :  { %v297_v15 = vmax.f32 %v293_v8, 0.0  ;;  %v232_v16 = vadd.f32 %v231_v11, %v230_v3  ;;  %v267_v17 = vrot.slane %v266_v12, 4  ;;  %v204_v32 = vadd.f32 %v203_v14, %v5215_v22 }
  0xe7   :  { %v308_v21 = vsub.f32 1.5, %v307_v13 }
  0xe8   :  { %v301_v23 = vadd.f32 1e-05, %v297_v15  ;;  %v233_v24 = vrot.slane %v232_v16, 2  ;;  %v268_v25 = vadd.f32 %v267_v17, %v266_v12  ;;  %v5312_v52 = vmax.f32 %v204_v32, 0.0 }
  0xe9   :  { %v309_v28 = vmul.f32 %v4690_v56, %v308_v21 }
  0xea   :  { %4691 = vrsqrt.f32 %v301_v23  ;;  %v234_v29 = vadd.f32 %v233_v24, %v232_v16  ;;  %v269_v30 = vrot.slane %v268_v25, 2  ;;  %vm320_vm4 = vweird.f32 %v301_v23 }
  0xeb   :  { %v313_v36 = vsel %vm312_vm2, %v4690_v56, %v309_v28 }
  0xec   :  { %v344_v40 = vmul.f32 %v313_v36, %v5212_v20  ;;  %v235_v43 = vrot.slane %v234_v29, 1  ;;  %v270_v44 = vadd.f32 %v269_v30, %v268_v25 }
  0xed   :  { %v205_v45 = vpop.f32.mrf.mxu0 }
  0xee   :  { %v348_v46 = vmul.f32 %v344_v40, %v5267_v9  ;;  %v236_v47 = vadd.f32 %v235_v43, %v234_v29  ;;  %v271_v48 = vrot.slane %v270_v44, 1  ;;  %v206_v39 = vadd.f32 %v205_v45, %v5215_v22  ;;  %v4616_v43 = vld [vmem:[#allocation8 + $0xf4] sm:$0xf0] }
  0xef   :  { %v368_v55 = vperm.slane %v344_v40, 1  ;;  %v250_v9 = vmul.f32 %v5312_v52, %v5312_v52  ;;  %v4311_v40 = vld [vmem:[#allocation8 + $0xe8] sm:$0xf] }
  0xf0   :  { %v4692_v53 = vpop.eup %4691  ;;  %v356_v54 = vrot.slane %v348_v46, 7  ;;  %v272_v57 = vadd.f32 %v271_v48, %v270_v44  ;;  %v5315_v0 = vmul.f32 0.0625, %v236_v47  ;;  %v5317_v56 = vmax.f32 %v206_v39, 0.0 }
  0xf1   :  { %v315_v62 = vmul.f32 %v4692_v53, %v301_v23  ;;  %v372_v8 = vmul.f32 %v368_v55, %v5224_v31  ;;  %v373_v11 = vmul.f32 %v368_v55, %v5231_v35  ;;  %vm321_vm3 = vweird.f32 %v4692_v53  ;;  %v4295_v55 = vld [vmem:[#allocation8 + $0xc8] sm:$0xf] }
  0xf2   :  { %v364_v1 = vsub.f32 %v5212_v20, %v356_v54  ;;  %v286_v2 = vmul.f32 0.0625, %v272_v57  ;;  %v290_v4 = vmul.f32 %v5315_v0, %v5315_v0  ;;  %v237_v22 = vadd.f32 %v5317_v56, %v5312_v52  ;;  %vm322_vm5 = vmor %vm320_vm4, %vm321_vm3  ;;  %v4612_v57 = vld [vmem:[#allocation8 + $0xd4] sm:$0xf0] }
  0xf3   :  { %v316_v3 = vmul.f32 %v4692_v53, %v315_v62  ;;  %v251_v5 = vmul.f32 %v5317_v56, %v5317_v56  ;;  %v5341_v48 = vor.u32 %v4616_v43, %v4311_v40 }
  0xf4   :  { %v380_v12 = vperm.slane %v364_v1, 2  ;;  %v294_v14 = vsub.f32 %v286_v2, %v290_v4  ;;  %v238_v15 = vrot.slane %v237_v22, 4  ;;  %v5345_v2 = vor.u32 %v4612_v57, %v4295_v55  ;;  %v4231_v55 = vld [vmem:[#allocation8 + $0x48] sm:$0xf]  ;;  %v4596_v57 = vld [vmem:[#allocation8 + $0x54] sm:$0xf0] }
  0xf5   :  { %v317_v13 = vmul.f32 0.5, %v316_v3  ;;  %v273_v16 = vadd.f32 %v251_v5, %v250_v9  ;;  %8293 = vst [vmem:[#allocation26_spill] sm:$0xff] %v5341_v48  ;;  %1068 = vmatpush.bf16.msrb.mxu3 %v5341_v48 }
  0xf6   :  { %v5330_v17 = vadd.f32 %v380_v12, %v372_v8  ;;  %v5332_v21 = vadd.f32 %v380_v12, %v373_v11  ;;  %v298_v25 = vmax.f32 %v294_v14, 0.0  ;;  %v239_v28 = vadd.f32 %v238_v15, %v237_v22  ;;  %8294 = vst [vmem:[#allocation27_spill] sm:$0xff] %v5345_v2  ;;  %v4608_v11 = vld [vmem:[#allocation8 + $0xb4] sm:$0xf0] }
  0xf7   :  { %v318_v24 = vsub.f32 1.5, %v317_v13  ;;  %v274_v29 = vrot.slane %v273_v16, 4 }
  0xf8   :  { %8291 = vst [vmem:[#allocation24_spill] sm:$0xff] %v5330_v17  ;;  %v5336_v30 = vpack.c.bf16 %v5332_v21, %v5330_v17  ;;  %v302_v35 = vadd.f32 1e-05, %v298_v25  ;;  %v240_v32 = vrot.slane %v239_v28, 2 }
  0xf9   :  { %8292 = vst [vmem:[#allocation25_spill] sm:$0xff] %v5332_v21  ;;  %v319_v31 = vmul.f32 %v4692_v53, %v318_v24  ;;  %v275_v36 = vadd.f32 %v274_v29, %v273_v16  ;;  %1069 = vmatpush.bf16.msrb.mxu3 %v5345_v2 }
  0xfa   :  { %476 = vmatmul.bf16.vlgmr.msra.gmra.mxu1 %v5336_v30  ;;  %960 = vmatmul.bf16.vlgmr.msra.gmra.mxu3 %v5336_v30  ;;  %4693 = vrsqrt.f32 %v302_v35  ;;  %v241_v45 = vadd.f32 %v240_v32, %v239_v28  ;;  %vm330_vm7 = vweird.f32 %v302_v35 }
  0xfb   :  { %v323_v44 = vsel %vm322_vm5, %v4692_v53, %v319_v31  ;;  %v276_v47 = vrot.slane %v275_v36, 2 }
  0xfc   :  { %v345_v46 = vmul.f32 %v323_v44, %v5212_v20  ;;  %v242_v23 = vrot.slane %v241_v45, 1 }
  0xfd   :  { %v277_v54 = vadd.f32 %v276_v47, %v275_v36  ;;  %v4263_v36 = vld [vmem:[#allocation8 + $0x88] sm:$0xf] }
  0xfe   :  { %v349_v39 = vmul.f32 %v345_v46, %v5297_v58  ;;  %v369_v62 = vperm.slane %v345_v46, 1  ;;  %v243_v1 = vadd.f32 %v242_v23, %v241_v45  ;;  %v4279_v58 = vld [vmem:[#allocation8 + $0xa8] sm:$0xf]  ;;  %v4600_v23 = vld [vmem:[#allocation8 + $0x74] sm:$0xf0] }
  0xff   :  { %v278_v9 = vrot.slane %v277_v54, 1  ;;  %v5354_v14 = vor.u32 %v4608_v11, %v4279_v58  ;;  %v4247_v47 = vld [vmem:[#allocation8 + $0x68] sm:$0xf] }
 0x100   :  { %v357_v53 = vrot.slane %v349_v39, 7  ;;  %v4694_v3 = vpop.eup %4693  ;;  %v5347_v4 = vmul.f32 0.0625, %v243_v1  ;;  %v374_v12 = vmul.f32 %v369_v62, %v5260_v63  ;;  %v375_v15 = vmul.f32 %v369_v62, %v5269_v10  ;;  %v4604_v63 = vld [vmem:[#allocation8 + $0x94] sm:$0xf0] }
 0x101   :  { %v325_v5 = vmul.f32 %v4694_v3, %v302_v35  ;;  %v279_v8 = vadd.f32 %v278_v9, %v277_v54  ;;  %8295 = vst [vmem:[#allocation28_spill] sm:$0xff] %v5354_v14  ;;  %1070 = vmatpush.bf16.msrb.mxu3 %v5354_v14  ;;  %v5362_v40 = vor.u32 %v4604_v63, %v4263_v36  ;;  %vm331_vm6 = vweird.f32 %v4694_v3  ;;  %v4592_v9 = vld [vmem:[#allocation8 + $0x34] sm:$0xf0] }
 0x102   :  { %v365_v22 = vsub.f32 %v5212_v20, %v357_v53  ;;  %v291_v13 = vmul.f32 %v5347_v4, %v5347_v4  ;;  %vm332_vm8 = vmor %vm330_vm7, %vm331_vm6  ;;  %v5371_v39 = vor.u32 %v4600_v23, %v4247_v47  ;;  %v5376_v1 = vor.u32 %v4596_v57, %v4231_v55  ;;  %v4215_v53 = vld [vmem:[#allocation8 + $0x28] sm:$0xf] }
 0x103   :  { %v326_v24 = vmul.f32 %v4694_v3, %v325_v5  ;;  %v287_v25 = vmul.f32 0.0625, %v279_v8  ;;  %8298 = vst [vmem:[#allocation31_spill] sm:$0xff] %v5362_v40 }
 0x104   :  { %v381_v16 = vperm.slane %v365_v22, 2  ;;  %8299 = vst [vmem:[#allocation32_spill] sm:$0xff] %v5371_v39 }
 0x105   :  { %v327_v31 = vmul.f32 0.5, %v326_v24  ;;  %v295_v32 = vsub.f32 %v287_v25, %v291_v13  ;;  %1071 = vmatpush.bf16.msrb.mxu3 %v5362_v40  ;;  %8300 = vst [vmem:[#allocation33_spill] sm:$0xff] %v5376_v1  ;;  %v4588_v24 = vld [vmem:[#allocation8 + $0x14] sm:$0xf0] }
 0x106   :  { %v5357_v28 = vadd.f32 %v381_v16, %v374_v12  ;;  %v5359_v29 = vadd.f32 %v381_v16, %v375_v15  ;;  %v4199_v16 = vld [vmem:[#allocation8 + $0x8] sm:$0xf] }
 0x107   :  { %v328_v10 = vsub.f32 1.5, %v327_v31  ;;  %v299_v44 = vmax.f32 %v295_v32, 0.0  ;;  %v5389_v36 = vor.u32 %v4588_v24, %v4199_v16  ;;  %v4241_v16 = vld [vmem:[#allocation8 + $0x70] sm:$0xf0] }
 0x108   :  { %8296 = vst [vmem:[#allocation29_spill] sm:$0xff] %v5357_v28  ;;  %v5366_v43 = vpack.c.bf16 %v5359_v29, %v5357_v28  ;;  %v4642_v28 = vld [vmem:[#allocation8 + $0x1cc] sm:$0xf] }
 0x109   :  { %8297 = vst [vmem:[#allocation30_spill] sm:$0xff] %v5359_v29  ;;  %v329_v45 = vmul.f32 %v4694_v3, %v328_v10  ;;  %v303_v46 = vadd.f32 1e-05, %v299_v44  ;;  %1072 = vmatpush.bf16.msrb.mxu3 %v5371_v39 }
 0x10a   :  { %481 = vmatmul.bf16.gmra.mxu1 %v5366_v43  ;;  %965 = vmatmul.bf16.gmra.mxu3 %v5366_v43  ;;  %8304 = vst [vmem:[#allocation37_spill] sm:$0xff] %v5389_v36 }
 0x10b   :  { %v333_v54 = vsel %vm332_vm8, %v4694_v3, %v329_v45  ;;  %4695 = vrsqrt.f32 %v303_v46  ;;  %v5380_v3 = vor.u32 %v4592_v9, %v4215_v53  ;;  %vm340_vm10 = vweird.f32 %v303_v46 }
 0x10c   :  { %v346_v62 = vmul.f32 %v333_v54, %v5212_v20 }
 0x10d   :  { %1073 = vmatpush.bf16.msrb.mxu3 %v5376_v1  ;;  %8301 = vst [vmem:[#allocation34_spill] sm:$0xff] %v5380_v3 }
 0x10e   :  { %v350_v35 = vmul.f32 %v346_v62, %v5315_v0  ;;  %v370_v5 = vperm.slane %v346_v62, 1 }
 0x110   :  { %v358_v22 = vrot.slane %v350_v35, 7  ;;  %v376_v12 = vmul.f32 %v370_v5, %v5294_v49  ;;  %v377_v0 = vmul.f32 %v370_v5, %v5299_v61  ;;  %v4613_v35 = vld [vmem:[#allocation8 + $0xe4] sm:$0xf]  ;;  %v4273_v5 = vld [vmem:[#allocation8 + $0xb0] sm:$0xf0] }
 0x111   :  { %v4696_v8 = vpop.eup %4695  ;;  %1074 = vmatpush.bf16.msrb.mxu3 %v5380_v3 }
 0x112   :  { %v366_v58 = vsub.f32 %v5212_v20, %v358_v22  ;;  %v335_v11 = vmul.f32 %v4696_v8, %v303_v46  ;;  %vm341_vm9 = vweird.f32 %v4696_v8  ;;  %v4605_v22 = vld [vmem:[#allocation8 + $0xa4] sm:$0xf] }
 0x113   :  { %vm342_vm11 = vmor %vm340_vm10, %vm341_vm9 }
 0x114   :  { %v382_v13 = vperm.slane %v366_v58, 2  ;;  %v336_v15 = vmul.f32 %v4696_v8, %v335_v11  ;;  %v5431_v58 = vor.u32 %v4605_v22, %v4273_v5  ;;  %v4601_v11 = vld [vmem:[#allocation8 + $0x84] sm:$0xf]  ;;  %v4606_v5 = vld [vmem:[#allocation8 + $0xac] sm:$0xf] }
 0x115   :  { %1075 = vmatpush.bf16.msrb.mxu3 %v5389_v36 }
 0x116   :  { %v5384_v25 = vadd.f32 %v382_v13, %v376_v12  ;;  %v5386_v31 = vadd.f32 %v382_v13, %v377_v0  ;;  %v337_v32 = vmul.f32 0.5, %v336_v15  ;;  %8309 = vst [vmem:[#allocation42_spill] sm:$0xff] %v5431_v58  ;;  %v4257_v12 = vld [vmem:[#allocation8 + $0x90] sm:$0xf0]  ;;  %v4597_v15 = vld [vmem:[#allocation8 + $0x64] sm:$0xf] }
 0x117   :  { %v5434_v0 = vor.u32 %v4601_v11, %v4257_v12  ;;  %v4602_v12 = vld [vmem:[#allocation8 + $0x8c] sm:$0xf] }
 0x118   :  { %8302 = vst [vmem:[#allocation35_spill] sm:$0xff] %v5384_v25  ;;  %v5393_v63 = vpack.c.bf16 %v5386_v31, %v5384_v25  ;;  %v338_v49 = vsub.f32 1.5, %v337_v32  ;;  %v5437_v32 = vor.u32 %v4597_v15, %v4241_v16  ;;  %v4598_v16 = vld [vmem:[#allocation8 + $0x6c] sm:$0xf] }
 0x119   :  { %8303 = vst [vmem:[#allocation36_spill] sm:$0xff] %v5386_v31  ;;  %1768 = vmatpush.bf16.msra.mxu3 %v5218_v26 }
 0x11a   :  { %v339_v61 = vmul.f32 %v4696_v8, %v338_v49  ;;  %486 = vmatmul.bf16.gmra.mxu1 %v5393_v63  ;;  %970 = vmatmul.bf16.gmra.mxu3 %v5393_v63  ;;  %8310 = vst [vmem:[#allocation43_spill] sm:$0xff] %v5434_v0  ;;  %v4593_v49 = vld [vmem:[#allocation8 + $0x44] sm:$0xf] }
 0x11b   :  { %8311 = vst [vmem:[#allocation44_spill] sm:$0xff] %v5437_v32 }
 0x11c   :  { %v343_v10 = vsel %vm342_vm11, %v4696_v8, %v339_v61  ;;  %v4225_v61 = vld [vmem:[#allocation8 + $0x50] sm:$0xf0] }
 0x11d   :  { %v347_v44 = vmul.f32 %v343_v10, %v5212_v20  ;;  %1769 = vmatpush.bf16.msra.mxu3 %v5227_v33 }
 0x11f   :  { %v351_v45 = vmul.f32 %v347_v44, %v5347_v4  ;;  %v371_v23 = vperm.slane %v347_v44, 1  ;;  %v5440_v44 = vor.u32 %v4593_v49, %v4225_v61  ;;  %v4594_v61 = vld [vmem:[#allocation8 + $0x4c] sm:$0xf] }
 0x121   :  { %v359_v47 = vrot.slane %v351_v45, 7  ;;  %1770 = vmatpush.bf16.msra.mxu3 %v5241_v41  ;;  %v378_v54 = vmul.f32 %v371_v23, %v5312_v52  ;;  %v379_v55 = vmul.f32 %v371_v23, %v5317_v56  ;;  %8312 = vst [vmem:[#allocation45_spill] sm:$0xff] %v5440_v44  ;;  %v4589_v45 = vld [vmem:[#allocation8 + $0x24] sm:$0xf] }
 0x123   :  { %v367_v46 = vsub.f32 %v5212_v20, %v359_v47  ;;  %v4209_v47 = vld [vmem:[#allocation8 + $0x30] sm:$0xf0] }
 0x125   :  { %v383_v57 = vperm.slane %v367_v46, 2  ;;  %1771 = vmatpush.bf16.msra.mxu3 %v5247_v50  ;;  %v5443_v46 = vor.u32 %v4589_v45, %v4209_v47  ;;  %v4590_v47 = vld [vmem:[#allocation8 + $0x2c] sm:$0xf] }
 0x127   :  { %v5406_v62 = vadd.f32 %v383_v57, %v378_v54  ;;  %v5408_v26 = vadd.f32 %v383_v57, %v379_v55  ;;  %8313 = vst [vmem:[#allocation46_spill] sm:$0xff] %v5443_v46  ;;  %v4585_v54 = vld [vmem:[#allocation8 + $0x4] sm:$0xf]  ;;  %v4193_v55 = vld [vmem:[#allocation8 + $0x10] sm:$0xf0] }
 0x129   :  { %8305 = vst [vmem:[#allocation38_spill] sm:$0xff] %v5406_v62  ;;  %v5413_v33 = vpack.c.bf16 %v5408_v26, %v5406_v62  ;;  %1772 = vmatpush.bf16.msra.mxu3 %v5254_v59  ;;  %v4337_v62 = vld [vmem:[#allocation8 + $0x130] sm:$0xf0] }
 0x12a   :  { %8306 = vst [vmem:[#allocation39_spill] sm:$0xff] %v5408_v26 }
 0x12b   :  { %491 = vmatmul.bf16.gmra.mxu1 %v5413_v33  ;;  %975 = vmatmul.bf16.gmra.mxu3 %v5413_v33 }
 0x12d   :  { %1773 = vmatpush.bf16.msra.mxu3 %v5263_v6  ;;  %v4305_v6 = vld [vmem:[#allocation8 + $0xf0] sm:$0xf0] }
 0x12e   :  { %v5425_v53 = vor.u32 %v4613_v35, %v4305_v6  ;;  %v4573_v35 = vld [vmem:[#allocation5] sm:$0xff] }
 0x130   :  { %8307 = vst [vmem:[#allocation40_spill] sm:$0xff] %v5425_v53 }
 0x131   :  { %1774 = vmatpush.bf16.msra.mxu3 %v5281_v18  ;;  %v4609_v18 = vld [vmem:[#allocation8 + $0xc4] sm:$0xf] }
 0x135   :  { %1775 = vmatpush.bf16.msra.mxu3 %v5287_v37  ;;  %v4289_v37 = vld [vmem:[#allocation8 + $0xd0] sm:$0xf0] }
 0x136   :  { %v5428_v9 = vor.u32 %v4609_v18, %v4289_v37  ;;  %v4610_v18 = vld [vmem:[#allocation8 + $0xcc] sm:$0xf]  ;;  %v4297_v37 = vld [vmem:[#allocation8 + $0xd8] sm:$0xf0] }
 0x137   :  { %v5465_v22 = vor.u32 %v4610_v18, %v4297_v37  ;;  %v4415_v18 = vld [vmem:[#allocation8 + $0x1c0] sm:$0xf]  ;;  %v4643_v37 = vld [vmem:[#allocation8 + $0x1cc] sm:$0xf0] }
 0x138   :  { %8308 = vst [vmem:[#allocation41_spill] sm:$0xff] %v5428_v9 }
 0x13b   :  { %1076 = vmatmul.bf16.vlgmr.msrb.gmra.mxu3 %v5336_v30 }
 0x13c   :  { %1892 = vmatpush.bf16.msrb.mxu3 %v5425_v53 }
 0x140   :  { %1893 = vmatpush.bf16.msrb.mxu3 %v5428_v9 }
 0x144   :  { %1894 = vmatpush.bf16.msrb.mxu3 %v5431_v58 }
 0x148   :  { %1895 = vmatpush.bf16.msrb.mxu3 %v5434_v0 }
 0x14b   :  { %1081 = vmatmul.bf16.gmra.mxu3 %v5366_v43 }
 0x14c   :  { %1896 = vmatpush.bf16.msrb.mxu3 %v5437_v32 }
 0x150   :  { %1897 = vmatpush.bf16.msrb.mxu3 %v5440_v44 }
 0x154   :  { %1898 = vmatpush.bf16.msrb.mxu3 %v5443_v46 }
 0x15b   :  { %1086 = vmatmul.bf16.gmra.mxu3 %v5393_v63 }
 0x16b   :  { %1091 = vmatmul.bf16.gmra.mxu3 %v5413_v33 }
 0x177   :  { %v477_v41 = vpop.f32.mrf.mxu1 }
 0x17f   :  { %v479_v50 = vpop.f32.mrf.mxu1 }
 0x180   :  { %v497_v57 = vpack.c.bf16 %v479_v50, %v477_v41  ;;  %v4574_v41 = vld [vmem:[#allocation5 + $0x8] sm:$0xff]  ;;  %v4576_v50 = vld [vmem:[#allocation5 + $0x18] sm:$0xff] }
 0x187   :  { %v482_v52 = vpop.f32.mrf.mxu1 }
 0x18f   :  { %v484_v56 = vpop.f32.mrf.mxu1 }
 0x190   :  { %v498_v23 = vpack.c.bf16 %v484_v56, %v482_v52  ;;  %v4614_v52 = vld [vmem:[#allocation8 + $0xec] sm:$0xf]  ;;  %v4313_v56 = vld [vmem:[#allocation8 + $0xf8] sm:$0xf0] }
 0x191   :  { %v5461_v6 = vor.u32 %v4614_v52, %v4313_v56  ;;  %v4433_v56 = vld [vmem:[#allocation8 + $0x1f0] sm:$0xf0] }
 0x197   :  { %v487_v4 = vpop.f32.mrf.mxu1 }
 0x19f   :  { %v489_v59 = vpop.f32.mrf.mxu1 }
 0x1a0   :  { %v499_v10 = vpack.c.bf16 %v489_v59, %v487_v4  ;;  %v4575_v4 = vld [vmem:[#allocation5 + $0x10] sm:$0xff]  ;;  %v5446_v59 = vor.u32 %v4585_v54, %v4193_v55  ;;  %v4586_v55 = vld [vmem:[#allocation8 + $0xc] sm:$0xf] }
 0x1a2   :  { %8314 = vst [vmem:[#allocation47_spill] sm:$0xff] %v5446_v59  ;;  %1899 = vmatpush.bf16.msrb.mxu3 %v5446_v59 }
 0x1a8   :  { %v492_v8 = vpop.f32.mrf.mxu1 }
 0x1b0   :  { %v494_v13 = vpop.f32.mrf.mxu1 }
 0x1b1   :  { %v500_v24 = vpack.c.bf16 %v494_v13, %v492_v8  ;;  %v4281_v8 = vld [vmem:[#allocation8 + $0xb8] sm:$0xf0] }
 0x1b2   :  { %v5468_v11 = vor.u32 %v4606_v5, %v4281_v8  ;;  %v4265_v13 = vld [vmem:[#allocation8 + $0x98] sm:$0xf0]  ;;  %v4641_v8 = vld [vmem:[#allocation8 + $0x1c4] sm:$0xf] }
 0x1b3   :  { %539 = vmatpush.bf16.msrb.mxu0 %v500_v24  ;;  %4665 = vmatpush.bf16.msra.mxu2 %v500_v24  ;;  %v5471_v15 = vor.u32 %v4602_v12, %v4265_v13  ;;  %v4249_v24 = vld [vmem:[#allocation8 + $0x78] sm:$0xf0]  ;;  %v4417_v12 = vld [vmem:[#allocation8 + $0x1d0] sm:$0xf0]  ;;  %v5495_v13 = vor.u32 %v4643_v37, %v4415_v18  ;;  %v4367_v37 = vld [vmem:[#allocation8 + $0x160] sm:$0xf] }
 0x1b4   :  { %v5474_v49 = vor.u32 %v4598_v16, %v4249_v24  ;;  %v5498_v16 = vor.u32 %v4641_v8, %v4417_v12  ;;  %v4399_v24 = vld [vmem:[#allocation8 + $0x1a0] sm:$0xf]  ;;  %v4631_v8 = vld [vmem:[#allocation8 + $0x16c] sm:$0xf0]  ;;  %v4629_v12 = vld [vmem:[#allocation8 + $0x164] sm:$0xf] }
 0x1b5   :  { %8315 = vst [vmem:[#allocation48_spill] sm:$0xff] %v5471_v15 }
 0x1b6   :  { %8316 = vst [vmem:[#allocation49_spill] sm:$0xff] %v5474_v49 }
 0x1b7   :  { %540 = vmatpush.bf16.msrb.mxu0 %v499_v10  ;;  %4666 = vmatpush.bf16.msra.mxu2 %v499_v10  ;;  %v4233_v10 = vld [vmem:[#allocation8 + $0x58] sm:$0xf0]  ;;  %8322 = vst [vmem:[#allocation55_spill] sm:$0xff] %v5495_v13 }
 0x1b8   :  { %v5478_v45 = vor.u32 %v4594_v61, %v4233_v10  ;;  %8323 = vst [vmem:[#allocation56_spill] sm:$0xff] %v5498_v16  ;;  %v4639_v61 = vld [vmem:[#allocation8 + $0x1ac] sm:$0xf0]  ;;  %v4637_v10 = vld [vmem:[#allocation8 + $0x1a4] sm:$0xf] }
 0x1ba   :  { %8317 = vst [vmem:[#allocation50_spill] sm:$0xff] %v5478_v45 }
 0x1bb   :  { %541 = vmatpush.bf16.msrb.mxu0 %v498_v23  ;;  %4667 = vmatpush.bf16.msra.mxu2 %v498_v23  ;;  %v4217_v23 = vld [vmem:[#allocation8 + $0x38] sm:$0xf0] }
 0x1bc   :  { %v5481_v54 = vor.u32 %v4590_v47, %v4217_v23  ;;  %v5506_v47 = vor.u32 %v4639_v61, %v4399_v24  ;;  %v4401_v23 = vld [vmem:[#allocation8 + $0x1b0] sm:$0xf0]  ;;  %v5519_v61 = vor.u32 %v4631_v8, %v4367_v37  ;;  %v4335_v37 = vld [vmem:[#allocation8 + $0x120] sm:$0xf]  ;;  %v4623_v8 = vld [vmem:[#allocation8 + $0x12c] sm:$0xf0] }
 0x1bd   :  { %v4369_v24 = vld [vmem:[#allocation8 + $0x170] sm:$0xf0] }
 0x1be   :  { %8318 = vst [vmem:[#allocation51_spill] sm:$0xff] %v5481_v54 }
 0x1bf   :  { %542 = vmatpush.bf16.msrb.mxu0 %v497_v57  ;;  %4668 = vmatpush.bf16.msra.mxu2 %v497_v57  ;;  %v4201_v57 = vld [vmem:[#allocation8 + $0x18] sm:$0xf0]  ;;  %8324 = vst [vmem:[#allocation57_spill] sm:$0xff] %v5506_v47 }
 0x1c0   :  { %8328 = vst [vmem:[#allocation61_spill] sm:$0xff] %v5519_v61 }
 0x1c2   :  { %4185 = vmatmul.msk.bf16.vlgmr.msrb.gmra.mxu0 %vm522_vm12, %v4573_v35  ;;  %4187 = vmatmul.msk.bf16.vlgmr.msra.gmra.mxu2 %vm522_vm12, %v4575_v4  ;;  %v5484_v35 = vor.u32 %v4586_v55, %v4201_v57  ;;  %v4431_v4 = vld [vmem:[#allocation8 + $0x1e0] sm:$0xf]  ;;  %v4635_v57 = vld [vmem:[#allocation8 + $0x18c] sm:$0xf0] }
 0x1c3   :  { %1010 = vmatpush.bf16.msra.mxu0 %v5425_v53  ;;  %v4383_v55 = vld [vmem:[#allocation8 + $0x180] sm:$0xf] }
 0x1c4   :  { %8319 = vst [vmem:[#allocation52_spill] sm:$0xff] %v5484_v35 }
 0x1c7   :  { %1011 = vmatpush.bf16.msra.mxu0 %v5428_v9 }
 0x1cb   :  { %1012 = vmatpush.bf16.msra.mxu0 %v5431_v58 }
 0x1cf   :  { %1013 = vmatpush.bf16.msra.mxu0 %v5434_v0 }
 0x1d2   :  { %4186 = vmatmul.msk.bf16.gmra.mxu0 %vm522_vm12, %v4574_v41  ;;  %4188 = vmatmul.msk.bf16.gmra.mxu2 %vm522_vm12, %v4576_v50  ;;  %v4647_v41 = vld [vmem:[#allocation8 + $0x1ec] sm:$0xf0]  ;;  %v4645_v50 = vld [vmem:[#allocation8 + $0x1e4] sm:$0xf] }
 0x1d3   :  { %1014 = vmatpush.bf16.msra.mxu0 %v5437_v32  ;;  %v5489_v52 = vor.u32 %v4647_v41, %v4431_v4  ;;  %v5491_v5 = vor.u32 %v4645_v50, %v4433_v56  ;;  %v5508_v4 = vor.u32 %v4637_v10, %v4401_v23  ;;  %v4633_v41 = vld [vmem:[#allocation8 + $0x184] sm:$0xf]  ;;  %v4385_v50 = vld [vmem:[#allocation8 + $0x190] sm:$0xf0]  ;;  %v5512_v56 = vor.u32 %v4635_v57, %v4383_v55  ;;  %v4351_v23 = vld [vmem:[#allocation8 + $0x140] sm:$0xf] }
 0x1d4   :  { %v5515_v18 = vor.u32 %v4633_v41, %v4385_v50  ;;  %v5522_v10 = vor.u32 %v4629_v12, %v4369_v24  ;;  %v4627_v55 = vld [vmem:[#allocation8 + $0x14c] sm:$0xf0]  ;;  %v4625_v57 = vld [vmem:[#allocation8 + $0x144] sm:$0xf]  ;;  %v4353_v50 = vld [vmem:[#allocation8 + $0x150] sm:$0xf0]  ;;  %v5534_v24 = vor.u32 %v4623_v8, %v4335_v37 }
 0x1d5   :  { %8320 = vst [vmem:[#allocation53_spill] sm:$0xff] %v5489_v52  ;;  %981 = vmatpush.bf16.msrb.mxu2 %v5489_v52  ;;  %1039 = vmatpush.bf16.msrb.mxu1 %v5491_v5  ;;  %v5527_v41 = vor.u32 %v4627_v55, %v4351_v23  ;;  %v5529_v26 = vor.u32 %v4625_v57, %v4353_v50  ;;  %v4621_v12 = vld [vmem:[#allocation8 + $0x124] sm:$0xf]  ;;  %v4319_v23 = vld [vmem:[#allocation8 + $0x100] sm:$0xf]  ;;  %v5557_v37 = vperm.slane %v5212_v20, 3 }
 0x1d6   :  { %8321 = vst [vmem:[#allocation54_spill] sm:$0xff] %v5491_v5  ;;  %v5537_v31 = vor.u32 %v4621_v12, %v4337_v62  ;;  %v4619_v55 = vld [vmem:[#allocation8 + $0x10c] sm:$0xf0]  ;;  %v4617_v57 = vld [vmem:[#allocation8 + $0x104] sm:$0xf] }
 0x1d7   :  { %1015 = vmatpush.bf16.msra.mxu0 %v5440_v44  ;;  %8325 = vst [vmem:[#allocation58_spill] sm:$0xff] %v5508_v4  ;;  %v4321_v50 = vld [vmem:[#allocation8 + $0x110] sm:$0xf0]  ;;  %v4361_v5 = vld [vmem:[#allocation8 + $0x158] sm:$0xf0] }
 0x1d8   :  { %8326 = vst [vmem:[#allocation59_spill] sm:$0xff] %v5512_v56  ;;  %v5544_v25 = vor.u32 %v4617_v57, %v4321_v50  ;;  %v4648_v57 = vld [vmem:[#allocation8 + $0x1f4] sm:$0xf0]  ;;  %v4646_v50 = vld [vmem:[#allocation8 + $0x1ec] sm:$0xf] }
 0x1d9   :  { %982 = vmatpush.bf16.msrb.mxu2 %v5495_v13  ;;  %1040 = vmatpush.bf16.msrb.mxu1 %v5498_v16  ;;  %8327 = vst [vmem:[#allocation60_spill] sm:$0xff] %v5515_v18 }
 0x1da   :  { %8329 = vst [vmem:[#allocation62_spill] sm:$0xff] %v5522_v10 }
 0x1db   :  { %1016 = vmatpush.bf16.msra.mxu0 %v5443_v46  ;;  %8330 = vst [vmem:[#allocation63_spill] sm:$0xff] %v5527_v41 }
 0x1dc   :  { %8331 = vst [vmem:[#allocation64_spill] sm:$0xff] %v5529_v26 }
 0x1dd   :  { %983 = vmatpush.bf16.msrb.mxu2 %v5506_v47  ;;  %1041 = vmatpush.bf16.msrb.mxu1 %v5508_v4  ;;  %8332 = vst [vmem:[#allocation65_spill] sm:$0xff] %v5534_v24  ;;  %v4393_v4 = vld [vmem:[#allocation8 + $0x198] sm:$0xf0] }
 0x1de   :  { %8333 = vst [vmem:[#allocation66_spill] sm:$0xff] %v5537_v31 }
 0x1df   :  { %1017 = vmatpush.bf16.msra.mxu0 %v5446_v59  ;;  %8335 = vst [vmem:[#allocation68_spill] sm:$0xff] %v5544_v25 }
 0x1e0   :  { %8336 = vst [vmem:[#allocation69_spill] sm:$0xff] %v5557_v37 }
 0x1e1   :  { %984 = vmatpush.bf16.msrb.mxu2 %v5512_v56  ;;  %1042 = vmatpush.bf16.msrb.mxu1 %v5515_v18 }
 0x1e2   :  { %1018 = vmatmul.bf16.vlgmr.msra.gmra.mxu0 %v5336_v30 }
 0x1e3   :  { %1126 = vmatpush.bf16.msrb.mxu0 %v5461_v6 }
 0x1e5   :  { %985 = vmatpush.bf16.msrb.mxu2 %v5519_v61  ;;  %1043 = vmatpush.bf16.msrb.mxu1 %v5522_v10  ;;  %v4409_v10 = vld [vmem:[#allocation8 + $0x1b8] sm:$0xf0] }
 0x1e7   :  { %1127 = vmatpush.bf16.msrb.mxu0 %v5465_v22 }
 0x1e9   :  { %986 = vmatpush.bf16.msrb.mxu2 %v5527_v41  ;;  %1044 = vmatpush.bf16.msrb.mxu1 %v5529_v26  ;;  %v4638_v26 = vld [vmem:[#allocation8 + $0x1ac] sm:$0xf] }
 0x1eb   :  { %1128 = vmatpush.bf16.msrb.mxu0 %v5468_v11 }
 0x1ed   :  { %987 = vmatpush.bf16.msrb.mxu2 %v5534_v24  ;;  %1045 = vmatpush.bf16.msrb.mxu1 %v5537_v31 }
 0x1ef   :  { %1129 = vmatpush.bf16.msrb.mxu0 %v5471_v15 }
 0x1f1   :  { %1046 = vmatpush.bf16.msrb.mxu1 %v5544_v25  ;;  %v4425_v25 = vld [vmem:[#allocation8 + $0x1d8] sm:$0xf0] }
 0x1f2   :  { %1023 = vmatmul.bf16.gmra.mxu0 %v5366_v43  ;;  %v5579_v31 = vor.u32 %v4642_v28, %v4425_v25  ;;  %v4636_v28 = vld [vmem:[#allocation8 + $0x194] sm:$0xf0]  ;;  %v4634_v25 = vld [vmem:[#allocation8 + $0x18c] sm:$0xf] }
 0x1f3   :  { %1130 = vmatpush.bf16.msrb.mxu0 %v5474_v49 }
 0x1f4   :  { %8340 = vst [vmem:[#allocation73_spill] sm:$0xff] %v5579_v31 }
 0x1f7   :  { %1131 = vmatpush.bf16.msrb.mxu0 %v5478_v45 }
 0x1fb   :  { %1132 = vmatpush.bf16.msrb.mxu0 %v5481_v54 }
 0x1ff   :  { %1133 = vmatpush.bf16.msrb.mxu0 %v5484_v35 }
 0x202   :  { %1028 = vmatmul.bf16.gmra.mxu0 %v5393_v63 }
 0x203   :  { %1834 = vmatpush.bf16.msra.mxu0 %v5220_v27 }
 0x207   :  { %1835 = vmatpush.bf16.msra.mxu0 %v5229_v34 }
 0x20b   :  { %1836 = vmatpush.bf16.msra.mxu0 %v5243_v42 }
 0x20f   :  { %1837 = vmatpush.bf16.msra.mxu0 %v5249_v51 }
 0x212   :  { %1033 = vmatmul.bf16.gmra.mxu0 %v5413_v33 }
 0x213   :  { %1838 = vmatpush.bf16.msra.mxu0 %v5256_v60 }
 0x217   :  { %1839 = vmatpush.bf16.msra.mxu0 %v5265_v7 }
 0x21b   :  { %1840 = vmatpush.bf16.msra.mxu0 %v5283_v19 }
 0x21f   :  { %1841 = vmatpush.bf16.msra.mxu0 %v5289_v38 }
 0x222   :  { %1134 = vmatmul.bf16.vlgmr.msrb.gmra.mxu0 %v5336_v30  ;;  %v5541_v30 = vor.u32 %v4619_v55, %v4319_v23  ;;  %v4439_v55 = vld [vmem:[#allocation8 + $0x1e8] sm:$0xf] }
 0x223   :  { %1950 = vmatpush.bf16.msrb.mxu0 %v5341_v48  ;;  %v5569_v29 = vor.u32 %v4648_v57, %v4439_v55  ;;  %v4407_v55 = vld [vmem:[#allocation8 + $0x1a8] sm:$0xf]  ;;  %v4640_v57 = vld [vmem:[#allocation8 + $0x1b4] sm:$0xf0] }
 0x224   :  { %8334 = vst [vmem:[#allocation67_spill] sm:$0xff] %v5541_v30  ;;  %988 = vmatpush.bf16.msrb.mxu2 %v5541_v30 }
 0x225   :  { %8337 = vst [vmem:[#allocation70_spill] sm:$0xff] %v5569_v29 }
 0x227   :  { %1951 = vmatpush.bf16.msrb.mxu0 %v5345_v2 }
 0x228   :  { %1097 = vmatpush.bf16.msra.mxu2 %v5569_v29 }
 0x22b   :  { %1952 = vmatpush.bf16.msrb.mxu0 %v5354_v14 }
 0x22f   :  { %1953 = vmatpush.bf16.msrb.mxu0 %v5362_v40 }
 0x232   :  { %1139 = vmatmul.bf16.gmra.mxu0 %v5366_v43 }
 0x233   :  { %1954 = vmatpush.bf16.msrb.mxu0 %v5371_v39 }
 0x237   :  { %1955 = vmatpush.bf16.msrb.mxu0 %v5376_v1  ;;  %v4345_v1 = vld [vmem:[#allocation8 + $0x138] sm:$0xf0] }
 0x23b   :  { %1956 = vmatpush.bf16.msrb.mxu0 %v5380_v3  ;;  %v4622_v3 = vld [vmem:[#allocation8 + $0x12c] sm:$0xf] }
 0x23f   :  { %v544_v62 = vpop.f32.mrf.mxu0  ;;  %1957 = vmatpush.bf16.msrb.mxu0 %v5389_v36 }
 0x240   :  { %v5560_v12 = vadd.f32 %v544_v62, %v5557_v37  ;;  %v4423_v62 = vld [vmem:[#allocation8 + $0x1c8] sm:$0xf] }
 0x242   :  { %1144 = vmatmul.bf16.gmra.mxu0 %v5393_v63  ;;  %v4441_v63 = vld [vmem:[#allocation8 + $0x1f8] sm:$0xf0] }
 0x243   :  { %v5573_v20 = vor.u32 %v4646_v50, %v4441_v63  ;;  %v5582_v50 = vor.u32 %v4640_v57, %v4407_v55  ;;  %v5586_v63 = vor.u32 %v4638_v26, %v4409_v10  ;;  %v5598_v26 = vor.u32 %v4634_v25, %v4393_v4  ;;  %v4375_v57 = vld [vmem:[#allocation8 + $0x168] sm:$0xf] }
 0x244   :  { %v4359_v25 = vld [vmem:[#allocation8 + $0x148] sm:$0xf] }
 0x245   :  { %8338 = vst [vmem:[#allocation71_spill] sm:$0xff] %v5573_v20  ;;  %1155 = vmatpush.bf16.msra.mxu1 %v5573_v20  ;;  %v554_v20 = vpop.f32.mrf.mxu2 }
 0x246   :  { %8341 = vst [vmem:[#allocation74_spill] sm:$0xff] %v5582_v50 }
 0x247   :  { %v546_v8 = vpop.f32.mrf.mxu0  ;;  %8342 = vst [vmem:[#allocation75_spill] sm:$0xff] %v5586_v63 }
 0x248   :  { %v5563_v43 = vadd.f32 %v546_v8, %v5557_v37  ;;  %v4644_v8 = vld [vmem:[#allocation8 + $0x1d4] sm:$0xf0]  ;;  %8344 = vst [vmem:[#allocation77_spill] sm:$0xff] %v5598_v26 }
 0x249   :  { %v5577_v17 = vor.u32 %v4644_v8, %v4423_v62  ;;  %1156 = vmatpush.bf16.msra.mxu1 %v5579_v31  ;;  %v4391_v62 = vld [vmem:[#allocation8 + $0x188] sm:$0xf]  ;;  %v4626_v31 = vld [vmem:[#allocation8 + $0x14c] sm:$0xf] }
 0x24a   :  { %v5567_v23 = vpack.c.bf16 %v5563_v43, %v5560_v12  ;;  %v5590_v18 = vor.u32 %v4636_v28, %v4391_v62  ;;  %v4632_v62 = vld [vmem:[#allocation8 + $0x174] sm:$0xf0]  ;;  %v4630_v28 = vld [vmem:[#allocation8 + $0x16c] sm:$0xf]  ;;  %v5616_v36 = vor.u32 %v4626_v31, %v4361_v5  ;;  %v4327_v31 = vld [vmem:[#allocation8 + $0x108] sm:$0xf] }
 0x24b   :  { %8339 = vst [vmem:[#allocation72_spill] sm:$0xff] %v5577_v17  ;;  %1098 = vmatpush.bf16.msra.mxu2 %v5577_v17  ;;  %v4620_v5 = vld [vmem:[#allocation8 + $0x114] sm:$0xf0] }
 0x24c   :  { %989 = vmatmul.bf16.vlgmr.msrb.gmra.mxu2 %v5567_v23  ;;  %1047 = vmatmul.bf16.vlgmr.msrb.gmra.mxu1 %v5567_v23  ;;  %8343 = vst [vmem:[#allocation76_spill] sm:$0xff] %v5590_v18  ;;  %v5632_v39 = vor.u32 %v4620_v5, %v4327_v31  ;;  %v961_v5 = vpop.f32.mrf.mxu3 }
 0x24d   :  { %1157 = vmatpush.bf16.msra.mxu1 %v5586_v63  ;;  %v5606_v63 = vor.u32 %v4632_v62, %v4375_v57  ;;  %v4343_v57 = vld [vmem:[#allocation8 + $0x128] sm:$0xf]  ;;  %v4624_v62 = vld [vmem:[#allocation8 + $0x134] sm:$0xf0]  ;;  %8348 = vst [vmem:[#allocation81_spill] sm:$0xff] %v5616_v36 }
 0x24e   :  { %8351 = vst [vmem:[#allocation84_spill] sm:$0xff] %v5632_v39 }
 0x24f   :  { %v549_v21 = vpop.f32.mrf.mxu0  ;;  %1099 = vmatpush.bf16.msra.mxu2 %v5582_v50  ;;  %8345 = vst [vmem:[#allocation78_spill] sm:$0xff] %v5606_v63 }
 0x250   :  { %v5593_v55 = vadd.f32 %v549_v21, %v5557_v37  ;;  %v4377_v21 = vld [vmem:[#allocation8 + $0x178] sm:$0xf0] }
 0x251   :  { %1158 = vmatpush.bf16.msra.mxu1 %v5598_v26  ;;  %v5610_v4 = vor.u32 %v4630_v28, %v4377_v21  ;;  %v556_v26 = vpop.f32.mrf.mxu2  ;;  %v5619_v28 = vor.u32 %v4624_v62, %v4343_v57  ;;  %v5622_v21 = vor.u32 %v4622_v3, %v4345_v1  ;;  %v4329_v57 = vld [vmem:[#allocation8 + $0x118] sm:$0xf0] }
 0x252   :  { %1149 = vmatmul.bf16.gmra.mxu0 %v5413_v33 }
 0x253   :  { %1100 = vmatpush.bf16.msra.mxu2 %v5590_v18  ;;  %8346 = vst [vmem:[#allocation79_spill] sm:$0xff] %v5610_v4 }
 0x254   :  { %8349 = vst [vmem:[#allocation82_spill] sm:$0xff] %v5619_v28 }
 0x255   :  { %1159 = vmatpush.bf16.msra.mxu1 %v5610_v4  ;;  %8350 = vst [vmem:[#allocation83_spill] sm:$0xff] %v5622_v21  ;;  %v4618_v4 = vld [vmem:[#allocation8 + $0x10c] sm:$0xf] }
 0x256   :  { %v5634_v62 = vor.u32 %v4618_v4, %v4329_v57 }
 0x257   :  { %v551_v8 = vpop.f32.mrf.mxu0  ;;  %1101 = vmatpush.bf16.msra.mxu2 %v5606_v63 }
 0x258   :  { %v5596_v33 = vadd.f32 %v551_v8, %v5557_v37  ;;  %v4628_v8 = vld [vmem:[#allocation8 + $0x154] sm:$0xf0]  ;;  %8352 = vst [vmem:[#allocation85_spill] sm:$0xff] %v5634_v62 }
 0x259   :  { %v5614_v16 = vor.u32 %v4628_v8, %v4359_v25  ;;  %1160 = vmatpush.bf16.msra.mxu1 %v5616_v36  ;;  %v5626_v25 = vadd.f32 %v554_v20, %v5557_v37  ;;  %v5629_v8 = vadd.f32 %v556_v26, %v5557_v37  ;;  %v559_v1 = vpop.f32.mrf.mxu2 }
 0x25a   :  { %v5603_v10 = vpack.c.bf16 %v5596_v33, %v5593_v55  ;;  %v5644_v26 = vadd.f32 %v559_v1, %v5557_v37  ;;  %v963_v1 = vpop.f32.mrf.mxu3 }
 0x25b   :  { %8347 = vst [vmem:[#allocation80_spill] sm:$0xff] %v5614_v16  ;;  %1102 = vmatpush.bf16.msra.mxu2 %v5614_v16  ;;  %v566_v3 = vpack.c.bf16 %v5629_v8, %v5626_v25 }
 0x25c   :  { %994 = vmatmul.bf16.gmra.mxu2 %v5603_v10  ;;  %1052 = vmatmul.bf16.gmra.mxu1 %v5603_v10 }
 0x25d   :  { %1161 = vmatpush.bf16.msra.mxu1 %v5622_v21 }
 0x25f   :  { %1103 = vmatpush.bf16.msra.mxu2 %v5619_v28 }
 0x261   :  { %1162 = vmatpush.bf16.msra.mxu1 %v5634_v62  ;;  %v561_v20 = vpop.f32.mrf.mxu2 }
 0x262   :  { %v5647_v4 = vadd.f32 %v561_v20, %v5557_v37 }
 0x263   :  { %1104 = vmatpush.bf16.msra.mxu2 %v5632_v39 }
 0x264   :  { %v567_v31 = vpack.c.bf16 %v5647_v4, %v5644_v26 }
 0x265   :  { %1863 = vmatpush.bf16.msrb.mxu1 %v5489_v52 }
 0x269   :  { %1864 = vmatpush.bf16.msrb.mxu1 %v5495_v13 }
 0x26c   :  { %999 = vmatmul.bf16.gmra.mxu2 %v566_v3  ;;  %1057 = vmatmul.bf16.gmra.mxu1 %v566_v3 }
 0x26d   :  { %1865 = vmatpush.bf16.msrb.mxu1 %v5506_v47 }
 0x271   :  { %1866 = vmatpush.bf16.msrb.mxu1 %v5512_v56 }
 0x275   :  { %1867 = vmatpush.bf16.msrb.mxu1 %v5519_v61 }
 0x279   :  { %1868 = vmatpush.bf16.msrb.mxu1 %v5527_v41 }
 0x27c   :  { %1004 = vmatmul.bf16.gmra.mxu2 %v567_v31  ;;  %1062 = vmatmul.bf16.gmra.mxu1 %v567_v31 }
 0x27d   :  { %1869 = vmatpush.bf16.msrb.mxu1 %v5534_v24 }
 0x281   :  { %1870 = vmatpush.bf16.msrb.mxu1 %v5541_v30 }
 0x28c   :  { %1105 = vmatmul.bf16.vlgmr.msra.gmra.mxu2 %v5567_v23  ;;  %1163 = vmatmul.bf16.vlgmr.msra.gmra.mxu1 %v5567_v23  ;;  %v1019_v23 = vpop.f32.mrf.mxu0 }
 0x28d   :  { %1979 = vmatpush.bf16.msra.mxu1 %v5569_v29 }
 0x291   :  { %1980 = vmatpush.bf16.msra.mxu1 %v5577_v17 }
 0x294   :  { %v1021_v57 = vpop.f32.mrf.mxu0 }
 0x295   :  { %1981 = vmatpush.bf16.msra.mxu1 %v5582_v50  ;;  %v5668_v50 = vld [vmem:[#allocation10] sm:$0xff] }
 0x296   :  { %v5675_v17 = vperm.slane %v5668_v50, 4  ;;  %v5721_v48 = vperm.slane %v5668_v50, 6 }
 0x299   :  { %1982 = vmatpush.bf16.msra.mxu1 %v5590_v18  ;;  %v966_v18 = vpop.f32.mrf.mxu3 }
 0x29c   :  { %1110 = vmatmul.bf16.gmra.mxu2 %v5603_v10  ;;  %1168 = vmatmul.bf16.gmra.mxu1 %v5603_v10  ;;  %v1024_v20 = vpop.f32.mrf.mxu0  ;;  %v5671_v10 = vperm.slane %v5668_v50, 5 }
 0x29d   :  { %1983 = vmatpush.bf16.msra.mxu1 %v5606_v63 }
 0x29e   :  { %8353 = vst [vmem:[#allocation86_spill] sm:$0xff] %v5671_v10 }
 0x2a1   :  { %1984 = vmatpush.bf16.msra.mxu1 %v5614_v16 }
 0x2a4   :  { %v1026_v16 = vpop.f32.mrf.mxu0 }
 0x2a5   :  { %1985 = vmatpush.bf16.msra.mxu1 %v5619_v28 }
 0x2a9   :  { %1986 = vmatpush.bf16.msra.mxu1 %v5632_v39 }
 0x2ac   :  { %1115 = vmatmul.bf16.gmra.mxu2 %v566_v3  ;;  %1173 = vmatmul.bf16.gmra.mxu1 %v566_v3  ;;  %v968_v3 = vpop.f32.mrf.mxu3  ;;  %v1029_v61 = vpop.f32.mrf.mxu0 }
 0x2bc   :  { %1120 = vmatmul.bf16.gmra.mxu2 %v567_v31  ;;  %1178 = vmatmul.bf16.gmra.mxu1 %v567_v31 }
 0x2c9   :  { %v1048_v63 = vpop.f32.mrf.mxu1 }
 0x2ca   :  { %v1049_v28 = vadd.f32 %v1048_v63, %v1019_v23 }
 0x2cc   :  { %v1346_v39 = vadd.f32 %v5671_v10, %v1049_v28  ;;  %v971_v28 = vpop.f32.mrf.mxu3 }
 0x2ce   :  { %v4453_v29 = vmul.f32 -1.442695, %v1346_v39 }
 0x2cf   :  { %v990_v30 = vpop.f32.mrf.mxu2 }
 0x2d0   :  { %v991_v24 = vadd.f32 %v990_v30, %v961_v5  ;;  %4697 = vpow2.f32 %v4453_v29  ;;  %v1031_v30 = vpop.f32.mrf.mxu0 }
 0x2d1   :  { %v1050_v31 = vpop.f32.mrf.mxu1 }
 0x2d2   :  { %v1051_v41 = vadd.f32 %v1050_v31, %v1021_v57  ;;  %v1185_v56 = vadd.f32 %v5675_v17, %v991_v24 }
 0x2d4   :  { %v1347_v47 = vadd.f32 %v5671_v10, %v1051_v41  ;;  %v4445_v13 = vmul.f32 -1.442695, %v1185_v56 }
 0x2d6   :  { %v4698_v23 = vpop.eup %4697  ;;  %v4454_v37 = vmul.f32 -1.442695, %v1347_v47  ;;  %4699 = vpow2.f32 %v4445_v13  ;;  %v5684_v47 = vpop.f32.mrf.mxu3 }
 0x2d7   :  { %v992_v52 = vpop.f32.mrf.mxu2  ;;  %v5679_v21 = vadd.f32 1.0, %v4698_v23 }
 0x2d8   :  { %v993_v63 = vadd.f32 %v992_v52, %v963_v1  ;;  %4701 = vpow2.f32 %v4454_v37  ;;  %v5693_v23 = vpop.f32.mrf.mxu0 }
 0x2d9   :  { %v1053_v62 = vpop.f32.mrf.mxu1  ;;  %4703 = vrcp.f32 %v5679_v21  ;;  %vm1391_vm14 = vweird.f32 %v5679_v21 }
 0x2da   :  { %v1186_v39 = vadd.f32 %v5675_v17, %v993_v63  ;;  %v1054_v5 = vadd.f32 %v1053_v62, %v1024_v20 }
 0x2dc   :  { %v4446_v24 = vmul.f32 -1.442695, %v1186_v39  ;;  %v4700_v41 = vpop.eup %4699  ;;  %v1348_v56 = vadd.f32 %v5671_v10, %v1054_v5 }
 0x2dd   :  { %v5686_v13 = vadd.f32 1.0, %v4700_v41 }
 0x2de   :  { %v4702_v1 = vpop.eup %4701  ;;  %4705 = vpow2.f32 %v4446_v24  ;;  %v4455_v63 = vmul.f32 -1.442695, %v1348_v56 }
 0x2df   :  { %v995_v29 = vpop.f32.mrf.mxu2  ;;  %v5689_v62 = vpop.eup %4703  ;;  %v5691_v20 = vadd.f32 1.0, %v4702_v1  ;;  %4707 = vrcp.f32 %v5686_v13  ;;  %vm1230_vm1 = vweird.f32 %v5686_v13 }
 0x2e0   :  { %v996_v52 = vadd.f32 %v995_v29, %v966_v18  ;;  %v1387_v5 = vmul.f32 %v5689_v62, %v5679_v21  ;;  %4709 = vpow2.f32 %v4455_v63  ;;  %vm1392_vm13 = vweird.f32 %v5689_v62 }
 0x2e1   :  { %v1055_v57 = vpop.f32.mrf.mxu1  ;;  %4711 = vrcp.f32 %v5691_v20  ;;  %vm5742_vm15 = vmor %vm1391_vm14, %vm1392_vm13  ;;  %vm1406_vm2 = vweird.f32 %v5691_v20 }
 0x2e2   :  { %v1056_v31 = vadd.f32 %v1055_v57, %v1026_v16  ;;  %v1187_v37 = vadd.f32 %v5675_v17, %v996_v52  ;;  %v5700_v57 = vpop.f32.mrf.mxu3  ;;  %v1388_v1 = vsub.f32 1.0, %v1387_v5 }
 0x2e4   :  { %v1349_v18 = vadd.f32 %v5671_v10, %v1056_v31  ;;  %v4447_v29 = vmul.f32 -1.442695, %v1187_v37  ;;  %v4706_v41 = vpop.eup %4705 }
 0x2e5   :  { %v5702_v36 = vadd.f32 1.0, %v4706_v41  ;;  %v5705_v40 = vpop.eup %4707 }
 0x2e6   :  { %v4456_v52 = vmul.f32 -1.442695, %v1349_v18  ;;  %4713 = vpow2.f32 %v4447_v29  ;;  %v4710_v14 = vpop.eup %4709  ;;  %vm1231_vm3 = vweird.f32 %v5705_v40 }
 0x2e7   :  { %v997_v39 = vpop.f32.mrf.mxu2  ;;  %v5708_v37 = vpop.eup %4711  ;;  %v5714_v29 = vadd.f32 1.0, %v4710_v14  ;;  %v5726_v14 = vperm.slane %v5668_v50, 7  ;;  %vm5808_vm7 = vmor %vm1230_vm1, %vm1231_vm3  ;;  %vm1245_vm8 = vweird.f32 %v5702_v36 }
 0x2e8   :  { %v998_v16 = vadd.f32 %v997_v39, %v968_v3  ;;  %4715 = vpow2.f32 %v4456_v52  ;;  %v5710_v39 = vpop.f32.mrf.mxu0  ;;  %v1402_v41 = vmul.f32 %v5708_v37, %v5691_v20  ;;  %v1226_v52 = vmul.f32 %v5705_v40, %v5686_v13 }
 0x2e9   :  { %v1058_v24 = vpop.f32.mrf.mxu1  ;;  %4717 = vrcp.f32 %v5702_v36  ;;  %vm1407_vm5 = vweird.f32 %v5708_v37  ;;  %vm1421_vm14 = vweird.f32 %v5714_v29 }
 0x2ea   :  { %v1059_v56 = vadd.f32 %v1058_v24, %v1029_v61  ;;  %v1188_v31 = vadd.f32 %v5675_v17, %v998_v16  ;;  %v1389_v61 = vmul.f32 %v5689_v62, %v1388_v1  ;;  %v1397_v1 = vand.u32 2147483648, %v5679_v21  ;;  %v5737_v59 = vpop.f32.mrf.mxu3  ;;  %vm5818_vm9 = vmor %vm1406_vm2, %vm1407_vm5 }
 0x2eb   :  { %v1403_v50 = vsub.f32 1.0, %v1402_v41  ;;  %v1227_v46 = vsub.f32 1.0, %v1226_v52 }
 0x2ec   :  { %v1350_v63 = vadd.f32 %v5671_v10, %v1059_v56  ;;  %v4448_v18 = vmul.f32 -1.442695, %v1188_v31  ;;  %v4714_v24 = vpop.eup %4713  ;;  %v1395_v31 = vand.u32 2147483647, %v5679_v21 }
 0x2ed   :  { %v1404_v32 = vmul.f32 %v5708_v37, %v1403_v50  ;;  %v1228_v0 = vmul.f32 %v5705_v40, %v1227_v46 }
 0x2ee   :  { %v4457_v56 = vmul.f32 -1.442695, %v1350_v63  ;;  %4719 = vpow2.f32 %v4448_v18  ;;  %v4716_v63 = vpop.eup %4715  ;;  %vm5748_vm0 = vcmp.eq.f32.partialorder %v1395_v31, 8.507059e+37 }
 0x2ef   :  { %v1000_v3 = vpop.f32.mrf.mxu2  ;;  %4721 = vrcp.f32 %v5714_v29  ;;  %v5752_v41 = vadd.f32 1.0, %v4716_v63 }
 0x2f0   :  { %v1001_v16 = vadd.f32 %v1000_v3, %v971_v28  ;;  %v1390_v28 = vadd.f32 %v5689_v62, %v1389_v61  ;;  %4723 = vpow2.f32 %v4457_v56  ;;  %v1398_v61 = vor.u32 1.1754944e-38, %v1397_v1  ;;  %v5763_v63 = vpop.f32.mrf.mxu0 }
 0x2f1   :  { %v1060_v5 = vpop.f32.mrf.mxu1  ;;  %v1234_v56 = vand.u32 2147483647, %v5686_v13  ;;  %vm1436_vm5 = vweird.f32 %v5752_v41 }
 0x2f2   :  { %v1061_v2 = vadd.f32 %v1060_v5, %v1031_v30  ;;  %v5732_v30 = vadd.f32 1.0, %v4714_v24  ;;  %v1189_v3 = vadd.f32 %v5675_v17, %v1001_v16  ;;  %v5735_v5 = vpop.eup %4717  ;;  %v1412_v24 = vand.u32 2147483648, %v5691_v20 }
 0x2f3   :  { %v1236_v16 = vand.u32 2147483648, %v5686_v13  ;;  %v1394_v52 = vsel %vm5742_vm15, %v5689_v62, %v1390_v28  ;;  %v1241_v31 = vmul.f32 %v5735_v5, %v5702_v36  ;;  %vm5775_vm4 = vcmp.eq.f32.partialorder %v1234_v56, 8.507059e+37 }
 0x2f4   :  { %v1351_v38 = vadd.f32 %v5671_v10, %v1061_v2  ;;  %4725 = vrcp.f32 %v5732_v30  ;;  %v4449_v1 = vmul.f32 -1.442695, %v1189_v3  ;;  %v4720_v7 = vpop.eup %4719  ;;  %v1413_v62 = vor.u32 1.1754944e-38, %v1412_v24 }
 0x2f5   :  { %v5768_v21 = vpop.eup %4721  ;;  %v1237_v28 = vor.u32 1.1754944e-38, %v1236_v16  ;;  %4727 = vrcp.f32 %v5752_v41  ;;  %v5783_v46 = vadd.f32 1.0, %v4720_v7  ;;  %v1242_v16 = vsub.f32 1.0, %v1241_v31 }
 0x2f6   :  { %v4458_v60 = vmul.f32 -1.442695, %v1351_v38  ;;  %v4724_v3 = vpop.eup %4723  ;;  %v5781_v38 = vsel %vm5748_vm0, %v1398_v61, %v1394_v52  ;;  %4729 = vpow2.f32 %v4449_v1  ;;  %v1405_v56 = vadd.f32 %v5708_v37, %v1404_v32 }
 0x2f7   :  { %v1002_v18 = vpop.f32.mrf.mxu2  ;;  %v1417_v19 = vmul.f32 %v5768_v21, %v5714_v29  ;;  %v5793_v61 = vadd.f32 1.0, %v4724_v3  ;;  %v1249_v7 = vand.u32 2147483647, %v5702_v36  ;;  %v1243_v3 = vmul.f32 %v5735_v5, %v1242_v16 }
 0x2f8   :  { %v1003_v24 = vadd.f32 %v1002_v18, %v5684_v47  ;;  %4731 = vpow2.f32 %v4458_v60  ;;  %v5800_v18 = vpop.f32.mrf.mxu3  ;;  %v1409_v1 = vsel %vm5818_vm9, %v5708_v37, %v1405_v56  ;;  %v1251_v32 = vand.u32 2147483648, %v5702_v36 }
 0x2f9   :  { %v1063_v2 = vpop.f32.mrf.mxu1  ;;  %4733 = vrcp.f32 %v5783_v46  ;;  %vm5842_vm10 = vcmp.eq.f32.partialorder %v1249_v7, 8.507059e+37  ;;  %vm1422_vm11 = vweird.f32 %v5768_v21  ;;  %vm1246_vm13 = vweird.f32 %v5735_v5 }
 0x2fa   :  { %v1064_v44 = vadd.f32 %v1063_v2, %v5693_v23  ;;  %v1410_v23 = vand.u32 2147483647, %v5691_v20  ;;  %v1427_v2 = vand.u32 2147483648, %v5714_v29  ;;  %v5789_v42 = vpop.eup %4725  ;;  %v1190_v13 = vadd.f32 %v5675_v17, %v1003_v24  ;;  %vm5879_vm15 = vmor %vm1245_vm8, %vm1246_vm13 }
 0x2fb   :  { %v1256_v24 = vmul.f32 %v5789_v42, %v5732_v30  ;;  %4735 = vrcp.f32 %v5793_v61  ;;  %v1252_v47 = vor.u32 1.1754944e-38, %v1251_v32  ;;  %vm1260_vm0 = vweird.f32 %v5732_v30  ;;  %vm5925_vm2 = vmor %vm1421_vm14, %vm1422_vm11 }
 0x2fc   :  { %v1352_v50 = vadd.f32 %v5671_v10, %v1064_v44  ;;  %v1229_v44 = vadd.f32 %v5705_v40, %v1228_v0  ;;  %vm5796_vm6 = vcmp.eq.f32.partialorder %v1410_v23, 8.507059e+37  ;;  %v5802_v60 = vor.u32 1.1754944e-38, %v1427_v2  ;;  %v5829_v2 = vpop.eup %4727 }
 0x2fd   :  { %v5826_v23 = vmul.f32 %v5781_v38, %v5560_v12  ;;  %v4730_v9 = vpop.eup %4729  ;;  %v1418_v12 = vsub.f32 1.0, %v1417_v19  ;;  %v4450_v56 = vmul.f32 -1.442695, %v1190_v13  ;;  %v5860_v19 = vsel %vm5796_vm6, %v1413_v62, %v1409_v1 }
 0x2fe   :  { %v4459_v0 = vmul.f32 -1.442695, %v1352_v50  ;;  %v1442_v50 = vand.u32 2147483648, %v5752_v41  ;;  %v1233_v20 = vsel %vm5808_vm7, %v5705_v40, %v1229_v44  ;;  %v4732_v40 = vpop.eup %4731  ;;  %v5847_v44 = vpop.f32.mrf.mxu0  ;;  %v1432_v7 = vmul.f32 %v5829_v2, %v5752_v41 }
 0x2ff   :  { %v1005_v58 = vpop.f32.mrf.mxu2  ;;  %v1257_v31 = vsub.f32 1.0, %v1256_v24  ;;  %v5868_v13 = vpop.eup %4733  ;;  %v1419_v51 = vmul.f32 %v5768_v21, %v1418_v12  ;;  %v1266_v24 = vand.u32 2147483648, %v5732_v30  ;;  %vm1261_vm1 = vweird.f32 %v5789_v42 }
 0x300   :  { %v1006_v16 = vadd.f32 %v1005_v58, %v5700_v57  ;;  %4737 = vpow2.f32 %v4459_v0  ;;  %v5855_v58 = vsel %vm5775_vm4, %v1237_v28, %v1233_v20  ;;  %v1244_v57 = vadd.f32 %v5735_v5, %v1243_v3  ;;  %vm5956_vm6 = vmor %vm1260_vm0, %vm1261_vm1 }
 0x301   :  { %v1065_v52 = vpop.f32.mrf.mxu1  ;;  %v5864_v0 = vor.u32 1.1754944e-38, %v1442_v50  ;;  %v5871_v28 = vadd.f32 1.0, %v4732_v40  ;;  %v1264_v20 = vand.u32 2147483647, %v5732_v30  ;;  %v5887_v12 = vpop.eup %4735  ;;  %4739 = vpow2.f32 %v4450_v56 }
 0x302   :  { %v1066_v37 = vadd.f32 %v1065_v52, %v5710_v39  ;;  %v5866_v39 = vadd.f32 1.0, %v4730_v9  ;;  %v1191_v3 = vadd.f32 %v5675_v17, %v1006_v16  ;;  %v1457_v16 = vand.u32 2147483648, %v5793_v61 }
 0x303   :  { %v1248_v36 = vsel %vm5879_vm15, %v5735_v5, %v1244_v57  ;;  %v1433_v50 = vsub.f32 1.0, %v1432_v7  ;;  %v1271_v53 = vmul.f32 %v5868_v13, %v5783_v46  ;;  %v1420_v5 = vadd.f32 %v5768_v21, %v1419_v51 }
 0x304   :  { %v1353_v62 = vadd.f32 %v5671_v10, %v1066_v37  ;;  %v5894_v37 = vpop.f32.mrf.mxu3  ;;  %4741 = vrcp.f32 %v5866_v39  ;;  %v1258_v10 = vmul.f32 %v5789_v42, %v1257_v31  ;;  %v4451_v56 = vmul.f32 -1.442695, %v1191_v3 }
 0x305   :  { %4743 = vrcp.f32 %v5871_v28  ;;  %v1447_v57 = vmul.f32 %v5887_v12, %v5793_v61  ;;  %v5911_v31 = vsel %vm5842_vm10, %v1252_v47, %v1248_v36  ;;  %v5913_v9 = vor.u32 1.1754944e-38, %v1457_v16 }
 0x306   :  { %v4738_v40 = vpop.eup %4737  ;;  %v4460_v7 = vmul.f32 -1.442695, %v1353_v62  ;;  %v1434_v34 = vmul.f32 %v5829_v2, %v1433_v50  ;;  %vm1437_vm3 = vweird.f32 %v5829_v2  ;;  %v1259_v51 = vadd.f32 %v5789_v42, %v1258_v10 }
 0x307   :  { %v1007_v52 = vpop.f32.mrf.mxu2  ;;  %v5915_v27 = vadd.f32 1.0, %v4738_v40  ;;  %vm5932_vm4 = vcmp.eq.f32.partialorder %v1264_v20, 8.507059e+37  ;;  %v1272_v62 = vsub.f32 1.0, %v1271_v53  ;;  %v4740_v16 = vpop.eup %4739  ;;  %4745 = vpow2.f32 %v4451_v56  ;;  %vm5999_vm11 = vmor %vm1436_vm5, %vm1437_vm3 }
 0x308   :  { %v1424_v36 = vsel %vm5925_vm2, %v5768_v21, %v1420_v5  ;;  %v1425_v50 = vand.u32 2147483647, %v5714_v29  ;;  %v1448_v10 = vsub.f32 1.0, %v1447_v57  ;;  %v1472_v20 = vand.u32 2147483648, %v5871_v28 }
 0x309   :  { %v1164_v1 = vpop.f32.mrf.mxu1  ;;  %4747 = vpow2.f32 %v4460_v7  ;;  %v5960_v57 = vadd.f32 1.0, %v4740_v16  ;;  %v1263_v7 = vsel %vm5956_vm6, %v5789_v42, %v1259_v51  ;;  %vm1275_vm8 = vweird.f32 %v5783_v46 }
 0x30a   :  { %v1165_v32 = vadd.f32 %v1164_v1, %v5763_v63  ;;  %v5903_v63 = vmul.f32 %v5860_v19, %v5563_v43  ;;  %v1008_v1 = vadd.f32 %v1007_v52, %v5737_v59  ;;  %v5919_v43 = vpop.f32.mrf.mxu0  ;;  %v5941_v40 = vpop.eup %4741  ;;  %4749 = vrcp.f32 %v5915_v27 }
 0x30b   :  { %v5946_v56 = vpop.eup %4743  ;;  %vm1426_vm7 = vcmp.eq.f32.partialorder %v1425_v50, 8.507059e+37  ;;  %v5971_v59 = vor.u32 1.1754944e-38, %v1472_v20  ;;  %vm1276_vm9 = vweird.f32 %v5868_v13  ;;  %4751 = vrcp.f32 %v5960_v57 }
 0x30c   :  { %v1516_v3 = vadd.f32 %v5726_v14, %v1165_v32  ;;  %v1192_v53 = vadd.f32 %v5675_v17, %v1008_v1  ;;  %v1267_v1 = vor.u32 1.1754944e-38, %v1266_v24  ;;  %v1082_v30 = vpop.f32.mrf.mxu3  ;;  %v5974_v16 = vsel %vm1426_vm7, %v5802_v60, %v1424_v36  ;;  %vm6021_vm14 = vmor %vm1275_vm8, %vm1276_vm9 }
 0x30d   :  { %v4746_v42 = vpop.eup %4745  ;;  %v1449_v24 = vmul.f32 %v5887_v12, %v1448_v10  ;;  %v1279_v60 = vand.u32 2147483647, %v5783_v46  ;;  %v1281_v36 = vand.u32 2147483648, %v5783_v46  ;;  %v1435_v47 = vadd.f32 %v5829_v2, %v1434_v34 }
 0x30e   :  { %vm1452_vm10 = vweird.f32 %v5887_v12  ;;  %v1487_v5 = vand.u32 2147483648, %v5915_v27  ;;  %vm1451_vm13 = vweird.f32 %v5793_v61  ;;  %vm1290_vm1 = vweird.f32 %v5866_v39 }
 0x30f   :  { %v1106_v52 = vpop.f32.mrf.mxu2  ;;  %vm6038_vm15 = vcmp.eq.f32.partialorder %v1279_v60, 8.507059e+37  ;;  %vm1291_vm2 = vweird.f32 %v5941_v40  ;;  %vm1467_vm5 = vweird.f32 %v5946_v56  ;;  %vm1466_vm6 = vweird.f32 %v5871_v28 }
 0x310   :  { %v1107_v32 = vadd.f32 %v1106_v52, %v5800_v18  ;;  %v1524_v18 = vmul.f32 %v1516_v3, %v5855_v58  ;;  %v1273_v58 = vmul.f32 %v5868_v13, %v1272_v62  ;;  %v4452_v52 = vmul.f32 -1.442695, %v1192_v53  ;;  %vm6076_vm3 = vmor %vm1290_vm1, %vm1291_vm2 }
 0x311   :  { %v1166_v35 = vpop.f32.mrf.mxu1  ;;  %v1268_v62 = vsel %vm5932_vm4, %v1267_v1, %v1263_v7  ;;  %v5993_v7 = vadd.f32 1.0, %v4746_v42  ;;  %vm6085_vm4 = vmor %vm1451_vm13, %vm1452_vm10  ;;  %vm1305_vm9 = vweird.f32 %v5960_v57  ;;  %vm1481_vm2 = vweird.f32 %v5915_v27 }
 0x312   :  { %v1507_v21 = vadd.f32 %v5721_v48, %v1107_v32  ;;  %v1167_v29 = vadd.f32 %v1166_v35, %v5847_v44  ;;  %v1286_v35 = vmul.f32 %v5941_v40, %v5866_v39  ;;  %v1462_v44 = vmul.f32 %v5946_v56, %v5871_v28  ;;  %v4748_v32 = vpop.eup %4747 }
 0x313   :  { %v5983_v20 = vadd.f32 %v5868_v13, %v1273_v58  ;;  %v5987_v53 = vpop.eup %4749  ;;  %vm1320_vm1 = vweird.f32 %v5993_v7 }
 0x314   :  { %v1532_v3 = vadd.f32 %v1524_v18, %v1507_v21  ;;  %v1517_v51 = vadd.f32 %v5726_v14, %v1167_v29  ;;  %v1287_v18 = vsub.f32 1.0, %v1286_v35  ;;  %v1142_v21 = vpop.f32.mrf.mxu0  ;;  %v1463_v29 = vsub.f32 1.0, %v1462_v44 }
 0x315   :  { %v1440_v35 = vand.u32 2147483647, %v5752_v41  ;;  %v1477_v44 = vmul.f32 %v5987_v53, %v5915_v27 }
 0x316   :  { %4753 = vtanh.f32 %v1532_v3 }
 0x317   :  { %v1108_v50 = vpop.f32.mrf.mxu2  ;;  %4755 = vpow2.f32 %v4452_v52  ;;  %v6010_v52 = vadd.f32 1.0, %v4748_v32  ;;  %v6033_v32 = vpop.eup %4751  ;;  %vm1441_vm0 = vcmp.eq.f32.partialorder %v1440_v35, 8.507059e+37 }
 0x318   :  { %v1109_v10 = vadd.f32 %v1108_v50, %v5894_v37  ;;  %v1525_v37 = vmul.f32 %v1517_v51, %v5911_v31  ;;  %v6015_v50 = vmul.f32 %v5974_v16, %v5593_v55  ;;  %v1439_v51 = vsel %vm5999_vm11, %v5829_v2, %v1435_v47  ;;  %v1084_v47 = vpop.f32.mrf.mxu3  ;;  %vm6148_vm11 = vmor %vm1466_vm6, %vm1467_vm5 }
 0x319   :  { %v1169_v1 = vpop.f32.mrf.mxu1  ;;  %v1288_v55 = vmul.f32 %v5941_v40, %v1287_v18  ;;  %4757 = vrcp.f32 %v5993_v7  ;;  %v1478_v18 = vsub.f32 1.0, %v1477_v44  ;;  %v6048_v60 = vsel %vm1441_vm0, %v5864_v0, %v1439_v51 }
 0x31a   :  { %v1508_v34 = vadd.f32 %v5721_v48, %v1109_v10  ;;  %v1170_v3 = vadd.f32 %v1169_v1, %v5919_v43  ;;  %v1278_v43 = vsel %vm6021_vm14, %v5868_v13, %v5983_v20  ;;  %v6035_v10 = vor.u32 1.1754944e-38, %v1487_v5 }
 0x31b   :  { %v1282_v1 = vor.u32 1.1754944e-38, %v1281_v36  ;;  %v6043_v13 = vmul.f32 %v5946_v56, %v1463_v29  ;;  %v1289_v58 = vadd.f32 %v5941_v40, %v1288_v55  ;;  %v1296_v29 = vand.u32 2147483648, %v5866_v39 }
 0x31c   :  { %v1533_v41 = vadd.f32 %v1525_v37, %v1508_v34  ;;  %v4754_v37 = vpop.eup %4753  ;;  %v1518_v2 = vadd.f32 %v5726_v14, %v1170_v3  ;;  %v8382_v34 = vsub.f32 1.0, %v5781_v38  ;;  %v1294_v44 = vand.u32 2147483647, %v5866_v39  ;;  %v1145_v42 = vpop.f32.mrf.mxu0 }
 0x31d   :  { %v4756_v20 = vpop.eup %4755  ;;  %v1450_v31 = vadd.f32 %v5887_v12, %v1449_v24  ;;  %v1301_v0 = vmul.f32 %v6033_v32, %v5960_v57  ;;  %v1283_v38 = vsel %vm6038_vm15, %v1282_v1, %v1278_v43  ;;  %v6070_v24 = vmul.f32 %v6048_v60, %v5596_v33 }
 0x31e   :  { %4759 = vtanh.f32 %v1533_v41  ;;  %v1556_v3 = vmul.f32 %v4754_v37, %v8382_v34  ;;  %v6060_v41 = vadd.f32 1.0, %v4756_v20  ;;  %v1502_v33 = vand.u32 2147483648, %v6010_v52 }
 0x31f   :  { %4761 = vrcp.f32 %v6010_v52  ;;  %v1111_v5 = vpop.f32.mrf.mxu2  ;;  %v1293_v46 = vsel %vm6076_vm3, %v5941_v40, %v1289_v58  ;;  %v1297_v1 = vor.u32 1.1754944e-38, %v1296_v29  ;;  %v1302_v37 = vsub.f32 1.0, %v1301_v0 }
 0x320   :  { %v1112_v36 = vadd.f32 %v1111_v5, %v1082_v30  ;;  %v1526_v30 = vmul.f32 %v1518_v2, %v1268_v62  ;;  %v6063_v5 = vpop.eup %4757  ;;  %4763 = vrcp.f32 %v6060_v41  ;;  %vm1295_vm7 = vcmp.eq.f32.partialorder %v1294_v44, 8.507059e+37 }
 0x321   :  { %v1171_v35 = vpop.f32.mrf.mxu1  ;;  %v1298_v58 = vsel %vm1295_vm7, %v1297_v1, %v1293_v46  ;;  %vm1306_vm10 = vweird.f32 %v6033_v32  ;;  %v1316_v43 = vmul.f32 %v6063_v5, %v5993_v7  ;;  %vm1482_vm15 = vweird.f32 %v5987_v53 }
 0x322   :  { %v1509_v51 = vadd.f32 %v5721_v48, %v1112_v36  ;;  %v1172_v55 = vadd.f32 %v1171_v35, %v1142_v21  ;;  %v1455_v21 = vand.u32 2147483647, %v5793_v61  ;;  %v6097_v36 = vadd.f32 %v5826_v23, %v1556_v3  ;;  %vm6165_vm14 = vmor %vm1305_vm9, %vm1306_vm10 }
 0x323   :  { %v8387_v61 = vsub.f32 1.0, %v5860_v19  ;;  %v1454_v35 = vsel %vm6085_vm4, %v5887_v12, %v1450_v31  ;;  %vm1321_vm3 = vweird.f32 %v6063_v5  ;;  %vm6230_vm5 = vmor %vm1481_vm2, %vm1482_vm15  ;;  %vm1496_vm9 = vweird.f32 %v6010_v52 }
 0x324   :  { %v4760_v2 = vpop.eup %4759  ;;  %v1534_v39 = vadd.f32 %v1526_v30, %v1509_v51  ;;  %v6106_v30 = vmul.f32 %v5987_v53, %v1478_v18  ;;  %v1519_v40 = vadd.f32 %v5726_v14, %v1172_v55  ;;  %vm1456_vm8 = vcmp.eq.f32.partialorder %v1455_v21, 8.507059e+37  ;;  %v1087_v18 = vpop.f32.mrf.mxu3  ;;  %vm6218_vm4 = vmor %vm1320_vm1, %vm1321_vm3 }
 0x325   :  { %v6094_v20 = vpop.eup %4761  ;;  %v1557_v34 = vmul.f32 %v4760_v2, %v8387_v61  ;;  %v6116_v3 = vsel %vm1456_vm8, %v5913_v9, %v1454_v35  ;;  %v1608_v44 = vmul.f32 %v6097_v36, %v6097_v36  ;;  %v1303_v51 = vmul.f32 %v6033_v32, %v1302_v37 }
 0x326   :  { %4765 = vtanh.f32 %v1534_v39  ;;  %v1492_v12 = vmul.f32 %v6094_v20, %v6010_v52  ;;  %v1527_v55 = vmul.f32 %v1519_v40, %v1283_v38  ;;  %v1309_v2 = vand.u32 2147483647, %v5960_v57  ;;  %v6131_v39 = vpop.eup %4763 }
 0x327   :  { %v6111_v23 = vadd.f32 %v5903_v63, %v1557_v34  ;;  %v1113_v19 = vpop.f32.mrf.mxu2  ;;  %v1552_v61 = vsub.f32 1.0, %v6116_v3  ;;  %v1311_v38 = vand.u32 2147483648, %v5960_v57  ;;  %v1147_v34 = vpop.f32.mrf.mxu0  ;;  %v1304_v40 = vadd.f32 %v6033_v32, %v1303_v51 }
 0x328   :  { %v1114_v29 = vadd.f32 %v1113_v19, %v1084_v47  ;;  %v1493_v46 = vsub.f32 1.0, %v1492_v12  ;;  %v1465_v19 = vadd.f32 %v5946_v56, %v6043_v13  ;;  %v6141_v12 = vmul.f32 %v6116_v3, %v5626_v25 }
 0x329   :  { %v1580_v63 = vadd.f32 %v6111_v23, %v6097_v36  ;;  %v1609_v31 = vmul.f32 %v6111_v23, %v6111_v23  ;;  %v1174_v0 = vpop.f32.mrf.mxu1  ;;  %vm6152_vm13 = vcmp.eq.f32.partialorder %v1309_v2, 8.507059e+37  ;;  %vm1497_vm7 = vweird.f32 %v6094_v20 }
 0x32a   :  { %v1510_v47 = vadd.f32 %v5721_v48, %v1114_v29  ;;  %v1175_v9 = vadd.f32 %v1174_v0, %v1145_v42  ;;  %v6157_v25 = vmul.f32 %v6094_v20, %v1493_v46  ;;  %vm1336_vm8 = vweird.f32 %v6131_v39  ;;  %vm6289_vm15 = vmor %vm1496_vm9, %vm1497_vm7 }
 0x32b   :  { %v1581_v62 = vrot.slane %v1580_v63, 4  ;;  %v1616_v21 = vadd.f32 %v1609_v31, %v1608_v44  ;;  %v1470_v44 = vand.u32 2147483647, %v5871_v28 }
 0x32c   :  { %v1535_v1 = vadd.f32 %v1527_v55, %v1510_v47  ;;  %v4766_v37 = vpop.eup %4765  ;;  %v1520_v29 = vadd.f32 %v5726_v14, %v1175_v9  ;;  %v1317_v55 = vsub.f32 1.0, %v1316_v43  ;;  %v8392_v47 = vsub.f32 1.0, %v5974_v16 }
 0x32d   :  { %v1582_v42 = vadd.f32 %v1581_v62, %v1580_v63  ;;  %v1617_v35 = vrot.slane %v1616_v21, 4  ;;  %v1308_v43 = vsel %vm6165_vm14, %v6033_v32, %v1304_v40  ;;  %v1469_v16 = vsel %vm6148_vm11, %v5946_v56, %v1465_v19 }
 0x32e   :  { %4767 = vtanh.f32 %v1535_v1  ;;  %v1558_v9 = vmul.f32 %v4766_v37, %v8392_v47  ;;  %v1528_v46 = vmul.f32 %v1520_v29, %v1298_v58  ;;  %vm1471_vm0 = vcmp.eq.f32.partialorder %v1470_v44, 8.507059e+37 }
 0x32f   :  { %v1583_v31 = vrot.slane %v1582_v42, 2  ;;  %v1618_v0 = vadd.f32 %v1617_v35, %v1616_v21  ;;  %v1116_v13 = vpop.f32.mrf.mxu2  ;;  %v1312_v21 = vor.u32 1.1754944e-38, %v1311_v38  ;;  %v1089_v35 = vpop.f32.mrf.mxu3  ;;  %v8395_v19 = vsub.f32 1.0, %v6048_v60 }
 0x330   :  { %v1117_v62 = vadd.f32 %v1116_v13, %v1087_v18  ;;  %v1318_v13 = vmul.f32 %v6063_v5, %v1317_v55  ;;  %v6181_v56 = vadd.f32 %v6015_v50, %v1558_v9  ;;  %v6190_v44 = vsel %vm1471_vm0, %v5971_v59, %v1469_v16  ;;  %v1150_v51 = vpop.f32.mrf.mxu0 }
 0x331   :  { %v1619_v2 = vrot.slane %v1618_v0, 2  ;;  %v1176_v1 = vpop.f32.mrf.mxu1  ;;  %v1584_v18 = vadd.f32 %v1583_v31, %v1582_v42  ;;  %v1313_v58 = vsel %vm6152_vm13, %v1312_v21, %v1308_v43  ;;  %v1324_v50 = vand.u32 2147483647, %v5993_v7 }
 0x332   :  { %v1511_v57 = vadd.f32 %v5721_v48, %v1117_v62  ;;  %v1177_v37 = vadd.f32 %v1176_v1, %v1147_v34  ;;  %v1331_v34 = vmul.f32 %v6131_v39, %v6060_v41  ;;  %v1319_v60 = vadd.f32 %v6063_v5, %v1318_v13 }
 0x333   :  { %v1620_v38 = vadd.f32 %v1619_v2, %v1618_v0  ;;  %v1585_v47 = vrot.slane %v1584_v18, 1  ;;  %v1326_v0 = vand.u32 2147483648, %v5993_v7  ;;  %v1610_v59 = vmul.f32 %v6181_v56, %v6181_v56 }
 0x334   :  { %v4768_v32 = vpop.eup %4767  ;;  %v1536_v42 = vadd.f32 %v1528_v46, %v1511_v57  ;;  %v1521_v31 = vadd.f32 %v5726_v14, %v1177_v37  ;;  %v1332_v2 = vsub.f32 1.0, %v1331_v34  ;;  %v1323_v34 = vsel %vm6218_vm4, %v6063_v5, %v1319_v60 }
 0x335   :  { %v1621_v40 = vrot.slane %v1620_v38, 1  ;;  %v1559_v29 = vmul.f32 %v4768_v32, %v8395_v19  ;;  %v1586_v63 = vadd.f32 %v1585_v47, %v1584_v18  ;;  %v1553_v47 = vsub.f32 1.0, %v6190_v44 }
 0x336   :  { %4769 = vtanh.f32 %v1536_v42  ;;  %v1529_v46 = vmul.f32 %v1521_v31, %v1313_v58  ;;  %v1333_v31 = vmul.f32 %v6131_v39, %v1332_v2  ;;  %vm1325_vm6 = vcmp.eq.f32.partialorder %v1324_v50, 8.507059e+37 }
 0x337   :  { %v6197_v55 = vadd.f32 %v6070_v24, %v1559_v29  ;;  %v1118_v9 = vpop.f32.mrf.mxu2  ;;  %v1622_v62 = vadd.f32 %v1621_v40, %v1620_v38  ;;  %v6200_v28 = vmul.f32 0.0625, %v1586_v63  ;;  %v1480_v38 = vadd.f32 %v5987_v53, %v6106_v30  ;;  %v1092_v19 = vpop.f32.mrf.mxu3 }
 0x338   :  { %v1119_v21 = vadd.f32 %v1118_v9, %v1089_v35  ;;  %v1327_v40 = vor.u32 1.1754944e-38, %v1326_v0  ;;  %v1485_v30 = vand.u32 2147483647, %v5915_v27  ;;  %v1339_v2 = vand.u32 2147483647, %v6060_v41 }
 0x339   :  { %v1587_v1 = vadd.f32 %v6197_v55, %v6181_v56  ;;  %v1611_v43 = vmul.f32 %v6197_v55, %v6197_v55  ;;  %v1179_v24 = vpop.f32.mrf.mxu1  ;;  %v1648_v16 = vmul.f32 0.0625, %v1622_v62  ;;  %v1652_v18 = vmul.f32 %v6200_v28, %v6200_v28 }
 0x33a   :  { %v1512_v57 = vadd.f32 %v5721_v48, %v1119_v21  ;;  %v1180_v37 = vadd.f32 %v1179_v24, %v1150_v51  ;;  %v1484_v0 = vsel %vm6230_vm5, %v5987_v53, %v1480_v38  ;;  %v1328_v62 = vsel %vm1325_vm6, %v1327_v40, %v1323_v34 }
 0x33b   :  { %v1588_v35 = vrot.slane %v1587_v1, 4  ;;  %v1623_v13 = vadd.f32 %v1611_v43, %v1610_v59  ;;  %v1656_v42 = vsub.f32 %v1648_v16, %v1652_v18  ;;  %v1341_v50 = vand.u32 2147483648, %v6060_v41  ;;  %v1152_v43 = vpop.f32.mrf.mxu0 }
 0x33c   :  { %v1537_v58 = vadd.f32 %v1529_v46, %v1512_v57  ;;  %v4770_v9 = vpop.eup %4769  ;;  %v1522_v5 = vadd.f32 %v5726_v14, %v1180_v37  ;;  %v1334_v18 = vadd.f32 %v6131_v39, %v1333_v31  ;;  %vm1486_vm10 = vcmp.eq.f32.partialorder %v1485_v30, 8.507059e+37 }
 0x33d   :  { %v1589_v29 = vadd.f32 %v1588_v35, %v1587_v1  ;;  %v1624_v63 = vrot.slane %v1623_v13, 4  ;;  %v1660_v51 = vmax.f32 %v1656_v42, 0.0  ;;  %v1560_v53 = vmul.f32 %v4770_v9, %v1552_v61 }
 0x33e   :  { %4771 = vtanh.f32 %v1537_v58  ;;  %v1530_v46 = vmul.f32 %v1522_v5, %v1328_v62  ;;  %vm1335_vm11 = vweird.f32 %v6060_v41  ;;  %v1489_v61 = vsel %vm1486_vm10, %v6035_v10, %v1484_v0 }
 0x33f   :  { %v1590_v60 = vrot.slane %v1589_v29, 2  ;;  %v1625_v27 = vadd.f32 %v1624_v63, %v1623_v13  ;;  %v1121_v59 = vpop.f32.mrf.mxu2  ;;  %v6239_v21 = vadd.f32 1e-05, %v1660_v51  ;;  %v1569_v13 = vmul.f32 %v6190_v44, %v5629_v8  ;;  %vm6257_vm13 = vmor %vm1335_vm11, %vm1336_vm8 }
 0x340   :  { %v1122_v1 = vadd.f32 %v1121_v59, %v1092_v19  ;;  %v1495_v58 = vadd.f32 %v6094_v20, %v6157_v25  ;;  %v6264_v8 = vadd.f32 %v6141_v12, %v1560_v53  ;;  %v1338_v10 = vsel %vm6257_vm13, %v6131_v39, %v1334_v18 }
 0x341   :  { %v1626_v24 = vrot.slane %v1625_v27, 2  ;;  %v1181_v16 = vpop.f32.mrf.mxu1  ;;  %4773 = vrsqrt.f32 %v6239_v21  ;;  %v1591_v38 = vadd.f32 %v1590_v60, %v1589_v29  ;;  %vm1340_vm14 = vcmp.eq.f32.partialorder %v1339_v2, 8.507059e+37  ;;  %v1094_v29 = vpop.f32.mrf.mxu3 }
 0x342   :  { %v1513_v57 = vadd.f32 %v5721_v48, %v1122_v1  ;;  %v1182_v37 = vadd.f32 %v1181_v16, %v1152_v43  ;;  %v1342_v41 = vor.u32 1.1754944e-38, %v1341_v50  ;;  %v1500_v31 = vand.u32 2147483647, %v6010_v52 }
 0x343   :  { %v1627_v35 = vadd.f32 %v1626_v24, %v1625_v27  ;;  %v1592_v34 = vrot.slane %v1591_v38, 1  ;;  %v1612_v39 = vmul.f32 %v6264_v8, %v6264_v8  ;;  %v1503_v43 = vor.u32 1.1754944e-38, %v1502_v33 }
 0x344   :  { %v4772_v3 = vpop.eup %4771  ;;  %v1538_v32 = vadd.f32 %v1530_v46, %v1513_v57  ;;  %v1523_v30 = vadd.f32 %v5726_v14, %v1182_v37  ;;  %v1343_v51 = vsel %vm1340_vm14, %v1342_v41, %v1338_v10  ;;  %v1499_v16 = vsel %vm6289_vm15, %v6094_v20, %v1495_v58 }
 0x345   :  { %v1628_v40 = vrot.slane %v1627_v35, 1  ;;  %v1561_v44 = vmul.f32 %v4772_v3, %v1553_v47  ;;  %v1593_v19 = vadd.f32 %v1592_v34, %v1591_v38  ;;  %vm1501_vm0 = vcmp.eq.f32.partialorder %v1500_v31, 8.507059e+37 }
 0x346   :  { %4775 = vtanh.f32 %v1538_v32  ;;  %v1531_v62 = vmul.f32 %v1523_v30, %v1343_v51  ;;  %v1504_v42 = vsel %vm1501_vm0, %v1503_v43, %v1499_v16  ;;  %vm1674_vm2 = vweird.f32 %v6239_v21 }
 0x347   :  { %v4774_v7 = vpop.eup %4773  ;;  %v6270_v63 = vadd.f32 %v1569_v13, %v1561_v44  ;;  %v1123_v25 = vpop.f32.mrf.mxu2  ;;  %v1629_v12 = vadd.f32 %v1628_v40, %v1627_v35  ;;  %v6274_v5 = vmul.f32 0.0625, %v1593_v19  ;;  %v1554_v13 = vsub.f32 1.0, %v1489_v61  ;;  %v6298_v40 = vld [vmem:[#allocation10 + $0x8] sm:$0xff] }
 0x348   :  { %v1124_v47 = vadd.f32 %v1123_v25, %v1094_v29  ;;  %v1669_v9 = vmul.f32 %v4774_v7, %v6239_v21  ;;  %vm1675_vm1 = vweird.f32 %v4774_v7  ;;  %v1570_v41 = vmul.f32 %v1489_v61, %v5644_v26 }
 0x349   :  { %v1594_v0 = vadd.f32 %v6270_v63, %v6264_v8  ;;  %v1613_v60 = vmul.f32 %v6270_v63, %v6270_v63  ;;  %v1649_v27 = vmul.f32 0.0625, %v1629_v12  ;;  %v1653_v2 = vmul.f32 %v6274_v5, %v6274_v5  ;;  %vm1676_vm3 = vmor %vm1674_vm2, %vm1675_vm1 }
 0x34a   :  { %v1514_v59 = vadd.f32 %v5721_v48, %v1124_v47  ;;  %v1670_v1 = vmul.f32 %v4774_v7, %v1669_v9  ;;  %v1555_v29 = vsub.f32 1.0, %v1504_v42  ;;  %v1571_v21 = vmul.f32 %v1504_v42, %v5647_v4 }
 0x34b   :  { %v1595_v24 = vrot.slane %v1594_v0, 4  ;;  %v1630_v53 = vadd.f32 %v1613_v60, %v1612_v39  ;;  %v1657_v57 = vsub.f32 %v1649_v27, %v1653_v2 }
 0x34c   :  { %v1539_v18 = vadd.f32 %v1531_v62, %v1514_v59  ;;  %v1671_v46 = vmul.f32 0.5, %v1670_v1  ;;  %v4776_v37 = vpop.eup %4775 }
 0x34d   :  { %v1596_v38 = vadd.f32 %v1595_v24, %v1594_v0  ;;  %v1631_v35 = vrot.slane %v1630_v53, 4  ;;  %v1661_v32 = vmax.f32 %v1657_v57, 0.0  ;;  %v1562_v34 = vmul.f32 %v4776_v37, %v1554_v13 }
 0x34e   :  { %4777 = vtanh.f32 %v1539_v18  ;;  %v1672_v3 = vsub.f32 1.5, %v1671_v46 }
 0x34f   :  { %v1597_v52 = vrot.slane %v1596_v38, 2  ;;  %v1632_v33 = vadd.f32 %v1631_v35, %v1630_v53  ;;  %v1665_v20 = vadd.f32 1e-05, %v1661_v32  ;;  %v6303_v51 = vadd.f32 %v1570_v41, %v1562_v34 }
 0x350   :  { %v1673_v44 = vmul.f32 %v4774_v7, %v1672_v3 }
 0x351   :  { %v1633_v58 = vrot.slane %v1632_v33, 2  ;;  %v1598_v10 = vadd.f32 %v1597_v52, %v1596_v38  ;;  %4779 = vrsqrt.f32 %v1665_v20  ;;  %vm1684_vm5 = vweird.f32 %v1665_v20 }
 0x352   :  { %v1677_v30 = vsel %vm1676_vm3, %v4774_v7, %v1673_v44  ;;  %v1614_v7 = vmul.f32 %v6303_v51, %v6303_v51 }
 0x353   :  { %v1634_v19 = vadd.f32 %v1633_v58, %v1632_v33  ;;  %v1708_v25 = vmul.f32 %v1677_v30, %v6298_v40  ;;  %v1599_v31 = vrot.slane %v1598_v10, 1 }
 0x354   :  { %v4778_v12 = vpop.eup %4777 }
 0x355   :  { %v1635_v47 = vrot.slane %v1634_v19, 1  ;;  %v1563_v9 = vmul.f32 %v4778_v12, %v1555_v29  ;;  %v1712_v39 = vmul.f32 %v1708_v25, %v6200_v28  ;;  %v1732_v0 = vperm.slane %v1708_v25, 0 }
 0x356   :  { %v1600_v60 = vadd.f32 %v1599_v31, %v1598_v10 }
 0x357   :  { %v6307_v27 = vadd.f32 %v1571_v21, %v1563_v9  ;;  %v1720_v26 = vrot.slane %v1712_v39, 7  ;;  %v4780_v61 = vpop.eup %4779  ;;  %v1636_v62 = vadd.f32 %v1635_v47, %v1634_v19  ;;  %v1736_v50 = vmul.f32 %v1732_v0, %v6097_v36  ;;  %v6333_v19 = vld [vmem:[#allocation7 + $0x78] sm:$0xff] }
 0x358   :  { %v6311_v59 = vmul.f32 0.0625, %v1600_v60  ;;  %v1679_v2 = vmul.f32 %v4780_v61, %v1665_v20  ;;  %v1737_v43 = vmul.f32 %v1732_v0, %v6111_v23  ;;  %vm1685_vm4 = vweird.f32 %v4780_v61  ;;  %v6341_v20 = vld [vmem:[#allocation7 + $0x70] sm:$0xff] }
 0x359   :  { %v1601_v1 = vadd.f32 %v6307_v27, %v6303_v51  ;;  %v1615_v4 = vmul.f32 %v6307_v27, %v6307_v27  ;;  %v1728_v28 = vsub.f32 %v6298_v40, %v1720_v26  ;;  %v1650_v24 = vmul.f32 0.0625, %v1636_v62  ;;  %vm1686_vm6 = vmor %vm1684_vm5, %vm1685_vm4 }
 0x35a   :  { %v1654_v53 = vmul.f32 %v6311_v59, %v6311_v59  ;;  %v1680_v57 = vmul.f32 %v4780_v61, %v1679_v2 }
 0x35b   :  { %v1602_v16 = vrot.slane %v1601_v1, 4  ;;  %v1637_v18 = vadd.f32 %v1615_v4, %v1614_v7  ;;  %v1744_v46 = vperm.slane %v1728_v28, 1 }
 0x35c   :  { %v1658_v37 = vsub.f32 %v1650_v24, %v1654_v53  ;;  %v1681_v32 = vmul.f32 0.5, %v1680_v57 }
 0x35d   :  { %v1603_v38 = vadd.f32 %v1602_v16, %v1601_v1  ;;  %v1638_v35 = vrot.slane %v1637_v18, 4  ;;  %v6322_v13 = vadd.f32 %v1744_v46, %v1736_v50  ;;  %v6324_v3 = vadd.f32 %v1744_v46, %v1737_v43  ;;  %v6348_v1 = vld [vmem:[#allocation7 + $0x68] sm:$0xff]  ;;  %v6358_v46 = vld [vmem:[#allocation7 + $0x60] sm:$0xff] }
 0x35e   :  { %v1662_v52 = vmax.f32 %v1658_v37, 0.0  ;;  %v1682_v42 = vsub.f32 1.5, %v1681_v32 }
 0x35f   :  { %v1604_v36 = vrot.slane %v1603_v38, 2  ;;  %v1639_v33 = vadd.f32 %v1638_v35, %v1637_v18  ;;  %v6328_v23 = vpack.c.bf16 %v6324_v3, %v6322_v13  ;;  %v6369_v35 = vld [vmem:[#allocation7 + $0x58] sm:$0xff] }
 0x360   :  { %v1666_v34 = vadd.f32 1e-05, %v1662_v52  ;;  %v1683_v10 = vmul.f32 %v4780_v61, %v1682_v42  ;;  %v6374_v42 = vld [vmem:[#allocation7 + $0x50] sm:$0xff] }
 0x361   :  { %v1640_v44 = vrot.slane %v1639_v33, 2  ;;  %v1605_v58 = vadd.f32 %v1604_v36, %v1603_v38  ;;  %1776 = vmatmul.bf16.vlgmr.msra.gmra.mxu3 %v6328_v23  ;;  %1842 = vmatmul.bf16.vlgmr.msra.gmra.mxu0 %v6328_v23 }
 0x362   :  { %4781 = vrsqrt.f32 %v1666_v34  ;;  %2008 = vmatpush.bf16.msra.mxu3 %v5461_v6  ;;  %2646 = vmatpush.bf16.msra.mxu0 %v6333_v19  ;;  %v1687_v29 = vsel %vm1686_vm6, %v4780_v61, %v1683_v10  ;;  %vm1694_vm8 = vweird.f32 %v1666_v34 }
 0x363   :  { %v1641_v41 = vadd.f32 %v1640_v44, %v1639_v33  ;;  %v1606_v30 = vrot.slane %v1605_v58, 1  ;;  %v1709_v31 = vmul.f32 %v1687_v29, %v6298_v40 }
 0x365   :  { %v1642_v25 = vrot.slane %v1641_v41, 1  ;;  %v1607_v12 = vadd.f32 %v1606_v30, %v1605_v58  ;;  %v1713_v47 = vmul.f32 %v1709_v31, %v6274_v5  ;;  %v1733_v60 = vperm.slane %v1709_v31, 0 }
 0x366   :  { %2009 = vmatpush.bf16.msra.mxu3 %v5465_v22  ;;  %2647 = vmatpush.bf16.msra.mxu0 %v6341_v20 }
 0x367   :  { %v1643_v9 = vadd.f32 %v1642_v25, %v1641_v41  ;;  %v6338_v21 = vmul.f32 0.0625, %v1607_v12  ;;  %v1721_v0 = vrot.slane %v1713_v47, 7  ;;  %v1738_v28 = vmul.f32 %v1733_v60, %v6181_v56 }
 0x368   :  { %v4782_v39 = vpop.eup %4781  ;;  %v1739_v2 = vmul.f32 %v1733_v60, %v6197_v55 }
 0x369   :  { %v1689_v26 = vmul.f32 %v4782_v39, %v1666_v34  ;;  %v1651_v61 = vmul.f32 0.0625, %v1643_v9  ;;  %v1655_v7 = vmul.f32 %v6338_v21, %v6338_v21  ;;  %v1729_v62 = vsub.f32 %v6298_v40, %v1721_v0 }
 0x36a   :  { %2010 = vmatpush.bf16.msra.mxu3 %v5468_v11  ;;  %2648 = vmatpush.bf16.msra.mxu0 %v6348_v1  ;;  %vm1695_vm7 = vweird.f32 %v4782_v39 }
 0x36b   :  { %v1690_v5 = vmul.f32 %v4782_v39, %v1689_v26  ;;  %v1659_v4 = vsub.f32 %v1651_v61, %v1655_v7  ;;  %v1745_v50 = vperm.slane %v1729_v62, 1  ;;  %vm1696_vm9 = vmor %vm1694_vm8, %vm1695_vm7 }
 0x36d   :  { %v1691_v43 = vmul.f32 0.5, %v1690_v5  ;;  %v1663_v24 = vmax.f32 %v1659_v4, 0.0  ;;  %v6353_v53 = vadd.f32 %v1745_v50, %v1738_v28  ;;  %v6355_v16 = vadd.f32 %v1745_v50, %v1739_v2 }
 0x36e   :  { %2011 = vmatpush.bf16.msra.mxu3 %v5471_v15  ;;  %2649 = vmatpush.bf16.msra.mxu0 %v6358_v46 }
 0x36f   :  { %8404 = vst [vmem:[#allocation87_spill] sm:$0xff] %v6355_v16  ;;  %v1692_v18 = vsub.f32 1.5, %v1691_v43  ;;  %v1667_v57 = vadd.f32 1e-05, %v1663_v24  ;;  %v6363_v56 = vpack.c.bf16 %v6355_v16, %v6353_v53  ;;  %v8414_v43 = vld [vmem:[#allocation18_spill] sm:$0xff] }
 0x370   :  { %v8415_v24 = vld [vmem:[#allocation42_spill] sm:$0xff] }
 0x371   :  { %v1693_v55 = vmul.f32 %v4782_v39, %v1692_v18  ;;  %4783 = vrsqrt.f32 %v1667_v57  ;;  %1781 = vmatmul.bf16.gmra.mxu3 %v6363_v56  ;;  %1847 = vmatmul.bf16.gmra.mxu0 %v6363_v56  ;;  %vm1704_vm11 = vweird.f32 %v1667_v57  ;;  %v8416_v18 = vld [vmem:[#allocation19_spill] sm:$0xff] }
 0x372   :  { %2012 = vmatpush.bf16.msra.mxu3 %v5474_v49  ;;  %2650 = vmatpush.bf16.msra.mxu0 %v6369_v35 }
 0x373   :  { %v1697_v37 = vsel %vm1696_vm9, %v4782_v39, %v1693_v55  ;;  %v8418_v55 = vld [vmem:[#allocation20_spill] sm:$0xff] }
 0x374   :  { %v1710_v38 = vmul.f32 %v1697_v37, %v6298_v40  ;;  %v8419_v37 = vld [vmem:[#allocation44_spill] sm:$0xff] }
 0x376   :  { %v1714_v32 = vmul.f32 %v1710_v38, %v6311_v59  ;;  %v1734_v33 = vperm.slane %v1710_v38, 0  ;;  %2013 = vmatpush.bf16.msra.mxu3 %v5478_v45  ;;  %2651 = vmatpush.bf16.msra.mxu0 %v6374_v42  ;;  %v6381_v59 = vld [vmem:[#allocation7 + $0x48] sm:$0xff]  ;;  %v8420_v38 = vld [vmem:[#allocation21_spill] sm:$0xff] }
 0x377   :  { %v4784_v52 = vpop.eup %4783 }
 0x378   :  { %v1722_v36 = vrot.slane %v1714_v32, 7  ;;  %v1699_v34 = vmul.f32 %v4784_v52, %v1667_v57  ;;  %v1740_v10 = vmul.f32 %v1734_v33, %v6264_v8  ;;  %v1741_v41 = vmul.f32 %v1734_v33, %v6270_v63  ;;  %v8407_v8 = vld [vmem:[#allocation52_spill] sm:$0xff]  ;;  %v6391_v63 = vld [vmem:[#allocation7 + $0x40] sm:$0xff]  ;;  %v8417_v57 = vld [vmem:[#allocation43_spill] sm:$0xff] }
 0x379   :  { %vm1705_vm10 = vweird.f32 %v4784_v52  ;;  %v8421_v32 = vld [vmem:[#allocation45_spill] sm:$0xff]  ;;  %v8424_v33 = vld [vmem:[#allocation23_spill] sm:$0xff] }
 0x37a   :  { %v1730_v44 = vsub.f32 %v6298_v40, %v1722_v36  ;;  %v1700_v58 = vmul.f32 %v4784_v52, %v1699_v34  ;;  %2014 = vmatpush.bf16.msra.mxu3 %v5481_v54  ;;  %2652 = vmatpush.bf16.msra.mxu0 %v6381_v59  ;;  %vm1706_vm13 = vmor %vm1704_vm11, %vm1705_vm10  ;;  %v8423_v36 = vld [vmem:[#allocation46_spill] sm:$0xff]  ;;  %v8425_v34 = vld [vmem:[#allocation47_spill] sm:$0xff] }
 0x37c   :  { %v1746_v30 = vperm.slane %v1730_v44, 1  ;;  %v1701_v29 = vmul.f32 0.5, %v1700_v58  ;;  %v8426_v44 = vld [vmem:[#allocation26_spill] sm:$0xff] }
 0x37e   :  { %v6384_v25 = vadd.f32 %v1746_v30, %v1740_v10  ;;  %v6386_v31 = vadd.f32 %v1746_v30, %v1741_v41  ;;  %v1702_v12 = vsub.f32 1.5, %v1701_v29  ;;  %2015 = vmatpush.bf16.msra.mxu3 %v8407_v8  ;;  %2653 = vmatpush.bf16.msra.mxu0 %v6391_v63  ;;  %v8427_v10 = vld [vmem:[#allocation27_spill] sm:$0xff]  ;;  %v8428_v41 = vld [vmem:[#allocation28_spill] sm:$0xff] }
 0x37f   :  { %v8429_v29 = vld [vmem:[#allocation31_spill] sm:$0xff] }
 0x380   :  { %8405 = vst [vmem:[#allocation88_spill] sm:$0xff] %v6384_v25  ;;  %v1766_v47 = vpack.c.bf16 %v6386_v31, %v6384_v25  ;;  %v1703_v9 = vmul.f32 %v4784_v52, %v1702_v12  ;;  %v8430_v12 = vld [vmem:[#allocation32_spill] sm:$0xff] }
 0x381   :  { %8406 = vst [vmem:[#allocation89_spill] sm:$0xff] %v6386_v31 }
 0x382   :  { %1786 = vmatmul.bf16.gmra.mxu3 %v1766_v47  ;;  %1852 = vmatmul.bf16.gmra.mxu0 %v1766_v47  ;;  %v1707_v39 = vsel %vm1706_vm13, %v4784_v52, %v1703_v9  ;;  %v8422_v52 = vld [vmem:[#allocation22_spill] sm:$0xff] }
 0x383   :  { %v1711_v0 = vmul.f32 %v1707_v39, %v6298_v40  ;;  %v8431_v39 = vld [vmem:[#allocation33_spill] sm:$0xff] }
 0x385   :  { %v1715_v60 = vmul.f32 %v1711_v0, %v6338_v21  ;;  %v1735_v61 = vperm.slane %v1711_v0, 0  ;;  %v8410_v21 = vld [vmem:[#allocation16_spill] sm:$0xff]  ;;  %v8432_v0 = vld [vmem:[#allocation34_spill] sm:$0xff] }
 0x387   :  { %v1723_v26 = vrot.slane %v1715_v60, 7  ;;  %v1742_v62 = vmul.f32 %v1735_v61, %v6303_v51  ;;  %v1743_v5 = vmul.f32 %v1735_v61, %v6307_v27  ;;  %v8412_v51 = vld [vmem:[#allocation17_spill] sm:$0xff] }
 0x388   :  { %v8413_v27 = vld [vmem:[#allocation41_spill] sm:$0xff] }
 0x389   :  { %v1731_v7 = vsub.f32 %v6298_v40, %v1723_v26  ;;  %v8411_v40 = vld [vmem:[#allocation40_spill] sm:$0xff]  ;;  %v8433_v60 = vld [vmem:[#allocation37_spill] sm:$0xff] }
 0x38b   :  { %v1747_v4 = vperm.slane %v1731_v7, 1 }
 0x38d   :  { %v6399_v28 = vadd.f32 %v1747_v4, %v1742_v62  ;;  %v6401_v2 = vadd.f32 %v1747_v4, %v1743_v5 }
 0x38f   :  { %8408 = vst [vmem:[#allocation90_spill] sm:$0xff] %v6399_v28  ;;  %v1767_v50 = vpack.c.bf16 %v6401_v2, %v6399_v28 }
 0x390   :  { %8409 = vst [vmem:[#allocation91_spill] sm:$0xff] %v6401_v2 }
 0x392   :  { %1791 = vmatmul.bf16.gmra.mxu3 %v1767_v50  ;;  %1857 = vmatmul.bf16.gmra.mxu0 %v1767_v50 }
 0x3a2   :  { %1900 = vmatmul.bf16.vlgmr.msrb.gmra.mxu3 %v6328_v23  ;;  %1958 = vmatmul.bf16.vlgmr.msrb.gmra.mxu0 %v6328_v23 }
 0x3a3   :  { %2712 = vmatpush.bf16.msrb.mxu3 %v8410_v21  ;;  %2770 = vmatpush.bf16.msrb.mxu0 %v8411_v40  ;;  %v8434_v40 = vld [vmem:[#allocation54_spill] sm:$0xff] }
 0x3a7   :  { %2713 = vmatpush.bf16.msrb.mxu3 %v8412_v51  ;;  %2771 = vmatpush.bf16.msrb.mxu0 %v8413_v27  ;;  %v4986_v51 = vld [vmem:[#allocation5] sm:$0xff]  ;;  %v8435_v27 = vld [vmem:[#allocation56_spill] sm:$0xff] }
 0x3ab   :  { %2714 = vmatpush.bf16.msrb.mxu3 %v8414_v43  ;;  %2772 = vmatpush.bf16.msrb.mxu0 %v8415_v24  ;;  %v8438_v43 = vld [vmem:[#allocation62_spill] sm:$0xff]  ;;  %v4987_v24 = vld [vmem:[#allocation5 + $0x8] sm:$0xff] }
 0x3af   :  { %2715 = vmatpush.bf16.msrb.mxu3 %v8416_v18  ;;  %2773 = vmatpush.bf16.msrb.mxu0 %v8417_v57  ;;  %v8439_v18 = vld [vmem:[#allocation64_spill] sm:$0xff]  ;;  %v8440_v57 = vld [vmem:[#allocation66_spill] sm:$0xff] }
 0x3b2   :  { %1905 = vmatmul.bf16.gmra.mxu3 %v6363_v56  ;;  %1963 = vmatmul.bf16.gmra.mxu0 %v6363_v56 }
 0x3b3   :  { %2716 = vmatpush.bf16.msrb.mxu3 %v8418_v55  ;;  %2774 = vmatpush.bf16.msrb.mxu0 %v8419_v37  ;;  %v8441_v55 = vld [vmem:[#allocation68_spill] sm:$0xff]  ;;  %v8442_v37 = vld [vmem:[#allocation71_spill] sm:$0xff] }
 0x3b7   :  { %2717 = vmatpush.bf16.msrb.mxu3 %v8420_v38  ;;  %2775 = vmatpush.bf16.msrb.mxu0 %v8421_v32  ;;  %v8443_v38 = vld [vmem:[#allocation73_spill] sm:$0xff]  ;;  %v4988_v32 = vld [vmem:[#allocation5 + $0x10] sm:$0xff] }
 0x3bb   :  { %2718 = vmatpush.bf16.msrb.mxu3 %v8422_v52  ;;  %2776 = vmatpush.bf16.msrb.mxu0 %v8423_v36  ;;  %v8444_v52 = vld [vmem:[#allocation75_spill] sm:$0xff]  ;;  %v8445_v36 = vld [vmem:[#allocation77_spill] sm:$0xff] }
 0x3bf   :  { %2719 = vmatpush.bf16.msrb.mxu3 %v8424_v33  ;;  %2777 = vmatpush.bf16.msrb.mxu0 %v8425_v34  ;;  %v8446_v33 = vld [vmem:[#allocation79_spill] sm:$0xff]  ;;  %v8447_v34 = vld [vmem:[#allocation81_spill] sm:$0xff] }
 0x3c2   :  { %1910 = vmatmul.bf16.gmra.mxu3 %v1766_v47  ;;  %1968 = vmatmul.bf16.gmra.mxu0 %v1766_v47 }
 0x3d2   :  { %1915 = vmatmul.bf16.gmra.mxu3 %v1767_v50  ;;  %1973 = vmatmul.bf16.gmra.mxu0 %v1767_v50 }
 0x3e2   :  { %2016 = vmatmul.bf16.vlgmr.msra.gmra.mxu3 %v6328_v23 }
 0x3e3   :  { %2828 = vmatpush.bf16.msra.mxu3 %v8426_v44  ;;  %v4989_v44 = vld [vmem:[#allocation5 + $0x18] sm:$0xff] }
 0x3e4   :  { %v1777_v58 = vpop.f32.mrf.mxu3 }
 0x3e7   :  { %2829 = vmatpush.bf16.msra.mxu3 %v8427_v10  ;;  %v8449_v10 = vld [vmem:[#allocation85_spill] sm:$0xff] }
 0x3eb   :  { %2830 = vmatpush.bf16.msra.mxu3 %v8428_v41 }
 0x3ec   :  { %v1779_v30 = vpop.f32.mrf.mxu3 }
 0x3ed   :  { %v1797_v21 = vpack.c.bf16 %v1779_v30, %v1777_v58  ;;  %v8448_v58 = vld [vmem:[#allocation83_spill] sm:$0xff] }
 0x3ef   :  { %2831 = vmatpush.bf16.msra.mxu3 %v8429_v29  ;;  %v8450_v29 = vld [vmem:[#allocation69_spill] sm:$0xff] }
 0x3f2   :  { %2021 = vmatmul.bf16.gmra.mxu3 %v6363_v56 }
 0x3f3   :  { %2832 = vmatpush.bf16.msra.mxu3 %v8430_v12 }
 0x3f4   :  { %v1782_v9 = vpop.f32.mrf.mxu3 }
 0x3f7   :  { %2833 = vmatpush.bf16.msra.mxu3 %v8431_v39 }
 0x3fb   :  { %2834 = vmatpush.bf16.msra.mxu3 %v8432_v0  ;;  %v8451_v0 = vld [vmem:[#allocation53_spill] sm:$0xff] }
 0x3fc   :  { %v1784_v23 = vpop.f32.mrf.mxu3 }
 0x3fd   :  { %v1798_v56 = vpack.c.bf16 %v1784_v23, %v1782_v9 }
 0x3ff   :  { %2835 = vmatpush.bf16.msra.mxu3 %v8433_v60  ;;  %v8452_v60 = vld [vmem:[#allocation55_spill] sm:$0xff] }
 0x402   :  { %2026 = vmatmul.bf16.gmra.mxu3 %v1766_v47  ;;  %v8436_v47 = vld [vmem:[#allocation58_spill] sm:$0xff] }
 0x405   :  { %v1787_v26 = vpop.f32.mrf.mxu3 }
 0x40d   :  { %v1789_v61 = vpop.f32.mrf.mxu3 }
 0x40e   :  { %v1799_v4 = vpack.c.bf16 %v1789_v61, %v1787_v26  ;;  %v8453_v26 = vld [vmem:[#allocation57_spill] sm:$0xff] }
 0x412   :  { %2031 = vmatmul.bf16.gmra.mxu3 %v1767_v50  ;;  %v8437_v50 = vld [vmem:[#allocation60_spill] sm:$0xff] }
 0x415   :  { %v1792_v7 = vpop.f32.mrf.mxu3 }
 0x41d   :  { %v1794_v62 = vpop.f32.mrf.mxu3 }
 0x41e   :  { %v1800_v5 = vpack.c.bf16 %v1794_v62, %v1792_v7 }
 0x420   :  { %1805 = vmatpush.bf16.msrb.mxu2 %v1800_v5 }
 0x424   :  { %1806 = vmatpush.bf16.msrb.mxu2 %v1799_v4  ;;  %v8456_v4 = vld [vmem:[#allocation63_spill] sm:$0xff] }
 0x428   :  { %1807 = vmatpush.bf16.msrb.mxu2 %v1798_v56  ;;  %v8457_v56 = vld [vmem:[#allocation65_spill] sm:$0xff] }
 0x42c   :  { %1808 = vmatpush.bf16.msrb.mxu2 %v1797_v21 }
 0x42f   :  { %4461 = vmatmul.msk.bf16.vlgmr.msrb.gmra.mxu2 %vm522_vm12, %v4986_v51 }
 0x430   :  { %1921 = vmatpush.bf16.msra.mxu2 %v8434_v40 }
 0x434   :  { %1922 = vmatpush.bf16.msra.mxu2 %v8435_v27 }
 0x438   :  { %1923 = vmatpush.bf16.msra.mxu2 %v8436_v47 }
 0x43c   :  { %1924 = vmatpush.bf16.msra.mxu2 %v8437_v50 }
 0x43f   :  { %4462 = vmatmul.msk.bf16.gmra.mxu2 %vm522_vm12, %v4987_v24 }
 0x440   :  { %1925 = vmatpush.bf16.msra.mxu2 %v8438_v43 }
 0x444   :  { %1926 = vmatpush.bf16.msra.mxu2 %v8439_v18 }
 0x448   :  { %1927 = vmatpush.bf16.msra.mxu2 %v8440_v57 }
 0x44c   :  { %1928 = vmatpush.bf16.msra.mxu2 %v8441_v55 }
 0x44f   :  { %4463 = vmatmul.msk.bf16.gmra.mxu2 %vm522_vm12, %v4988_v32 }
 0x450   :  { %2037 = vmatpush.bf16.msrb.mxu2 %v8442_v37 }
 0x454   :  { %2038 = vmatpush.bf16.msrb.mxu2 %v8443_v38 }
 0x458   :  { %2039 = vmatpush.bf16.msrb.mxu2 %v8444_v52 }
 0x45c   :  { %2040 = vmatpush.bf16.msrb.mxu2 %v8445_v36 }
 0x45f   :  { %4464 = vmatmul.msk.bf16.gmra.mxu2 %vm522_vm12, %v4989_v44 }
 0x460   :  { %2041 = vmatpush.bf16.msrb.mxu2 %v8446_v33 }
 0x464   :  { %2042 = vmatpush.bf16.msrb.mxu2 %v8447_v34 }
 0x468   :  { %2043 = vmatpush.bf16.msrb.mxu2 %v8448_v58 }
 0x46c   :  { %2044 = vmatpush.bf16.msrb.mxu2 %v8449_v10 }
 0x4b2   :  { %v1810_v41 = vpop.f32.mrf.mxu2 }
 0x4b3   :  { %v6456_v12 = vadd.f32 %v1810_v41, %v8450_v29 }
 0x4ba   :  { %v1812_v30 = vpop.f32.mrf.mxu2 }
 0x4bb   :  { %v6459_v9 = vadd.f32 %v1812_v30, %v8450_v29  ;;  %v8460_v30 = vld [vmem:[#allocation72_spill] sm:$0xff] }
 0x4bd   :  { %v1830_v39 = vpack.c.bf16 %v6459_v9, %v6456_v12 }
 0x4bf   :  { %1871 = vmatmul.bf16.vlgmr.msrb.gmra.mxu1 %v1830_v39  ;;  %1929 = vmatmul.bf16.vlgmr.msra.gmra.mxu2 %v1830_v39 }
 0x4c0   :  { %4669 = vmatpush.bf16.msrb.mxu1 %v6333_v19  ;;  %2741 = vmatpush.bf16.msra.mxu2 %v8451_v0  ;;  %v8454_v19 = vld [vmem:[#allocation59_spill] sm:$0xff]  ;;  %v8461_v0 = vld [vmem:[#allocation74_spill] sm:$0xff] }
 0x4c2   :  { %v1815_v23 = vpop.f32.mrf.mxu2 }
 0x4c3   :  { %v6470_v7 = vadd.f32 %v1815_v23, %v8450_v29  ;;  %v8462_v23 = vld [vmem:[#allocation76_spill] sm:$0xff] }
 0x4c4   :  { %4670 = vmatpush.bf16.msrb.mxu1 %v6341_v20  ;;  %2742 = vmatpush.bf16.msra.mxu2 %v8452_v60  ;;  %v8463_v60 = vld [vmem:[#allocation78_spill] sm:$0xff] }
 0x4c8   :  { %4671 = vmatpush.bf16.msrb.mxu1 %v6348_v1  ;;  %2743 = vmatpush.bf16.msra.mxu2 %v8453_v26  ;;  %v8455_v1 = vld [vmem:[#allocation61_spill] sm:$0xff]  ;;  %v8464_v26 = vld [vmem:[#allocation80_spill] sm:$0xff] }
 0x4ca   :  { %v1817_v61 = vpop.f32.mrf.mxu2 }
 0x4cb   :  { %v6473_v62 = vadd.f32 %v1817_v61, %v8450_v29  ;;  %v8465_v61 = vld [vmem:[#allocation82_spill] sm:$0xff] }
 0x4cc   :  { %4672 = vmatpush.bf16.msrb.mxu1 %v6358_v46  ;;  %2744 = vmatpush.bf16.msra.mxu2 %v8454_v19  ;;  %v8466_v19 = vld [vmem:[#allocation84_spill] sm:$0xff] }
 0x4cd   :  { %v1831_v20 = vpack.c.bf16 %v6473_v62, %v6470_v7 }
 0x4cf   :  { %1876 = vmatmul.bf16.gmra.mxu1 %v1831_v20  ;;  %1934 = vmatmul.bf16.gmra.mxu2 %v1831_v20 }
 0x4d0   :  { %4673 = vmatpush.bf16.msrb.mxu1 %v6369_v35  ;;  %2745 = vmatpush.bf16.msra.mxu2 %v8455_v1  ;;  %v8458_v35 = vld [vmem:[#allocation67_spill] sm:$0xff]  ;;  %v1901_v1 = vpop.f32.mrf.mxu3 }
 0x4d2   :  { %v1820_v5 = vpop.f32.mrf.mxu2 }
 0x4d3   :  { %v6486_v21 = vadd.f32 %v1820_v5, %v8450_v29 }
 0x4d4   :  { %4674 = vmatpush.bf16.msrb.mxu1 %v6374_v42  ;;  %2746 = vmatpush.bf16.msra.mxu2 %v8456_v4 }
 0x4d8   :  { %4675 = vmatpush.bf16.msrb.mxu1 %v6381_v59  ;;  %2747 = vmatpush.bf16.msra.mxu2 %v8457_v56  ;;  %v1903_v4 = vpop.f32.mrf.mxu3 }
 0x4da   :  { %v1822_v46 = vpop.f32.mrf.mxu2 }
 0x4db   :  { %v6489_v51 = vadd.f32 %v1822_v46, %v8450_v29 }
 0x4dc   :  { %4676 = vmatpush.bf16.msrb.mxu1 %v6391_v63  ;;  %2748 = vmatpush.bf16.msra.mxu2 %v8458_v35  ;;  %v8459_v63 = vld [vmem:[#allocation70_spill] sm:$0xff] }
 0x4dd   :  { %v1832_v42 = vpack.c.bf16 %v6489_v51, %v6486_v21 }
 0x4df   :  { %1881 = vmatmul.bf16.gmra.mxu1 %v1832_v42  ;;  %1939 = vmatmul.bf16.gmra.mxu2 %v1832_v42 }
 0x4e0   :  { %v1906_v46 = vpop.f32.mrf.mxu3 }
 0x4e2   :  { %v1825_v24 = vpop.f32.mrf.mxu2 }
 0x4e3   :  { %v6496_v32 = vadd.f32 %v1825_v24, %v8450_v29 }
 0x4ea   :  { %v1827_v59 = vpop.f32.mrf.mxu2 }
 0x4eb   :  { %v6499_v44 = vadd.f32 %v1827_v59, %v8450_v29  ;;  %v1908_v59 = vpop.f32.mrf.mxu3 }
 0x4ed   :  { %v1833_v41 = vpack.c.bf16 %v6499_v44, %v6496_v32 }
 0x4ef   :  { %1886 = vmatmul.bf16.gmra.mxu1 %v1833_v41  ;;  %1944 = vmatmul.bf16.gmra.mxu2 %v1833_v41 }
 0x4f3   :  { %v1911_v10 = vpop.f32.mrf.mxu3 }
 0x4ff   :  { %1987 = vmatmul.bf16.vlgmr.msra.gmra.mxu1 %v1830_v39  ;;  %2045 = vmatmul.bf16.vlgmr.msrb.gmra.mxu2 %v1830_v39  ;;  %v1843_v39 = vpop.f32.mrf.mxu0 }
 0x500   :  { %2857 = vmatpush.bf16.msrb.mxu2 %v8459_v63 }
 0x504   :  { %2858 = vmatpush.bf16.msrb.mxu2 %v8460_v30 }
 0x507   :  { %v1845_v5 = vpop.f32.mrf.mxu0 }
 0x508   :  { %2859 = vmatpush.bf16.msrb.mxu2 %v8461_v0 }
 0x50c   :  { %2860 = vmatpush.bf16.msrb.mxu2 %v8462_v23 }
 0x50f   :  { %1992 = vmatmul.bf16.gmra.mxu1 %v1831_v20  ;;  %2050 = vmatmul.bf16.gmra.mxu2 %v1831_v20  ;;  %v1848_v56 = vpop.f32.mrf.mxu0 }
 0x510   :  { %2861 = vmatpush.bf16.msrb.mxu2 %v8463_v60 }
 0x514   :  { %2862 = vmatpush.bf16.msrb.mxu2 %v8464_v26  ;;  %v8467_v26 = vld [vmem:[#allocation86_spill] sm:$0xff] }
 0x517   :  { %v1850_v24 = vpop.f32.mrf.mxu0 }
 0x518   :  { %2863 = vmatpush.bf16.msrb.mxu2 %v8465_v61 }
 0x51c   :  { %2864 = vmatpush.bf16.msrb.mxu2 %v8466_v19 }
 0x51f   :  { %1997 = vmatmul.bf16.gmra.mxu1 %v1832_v42  ;;  %2055 = vmatmul.bf16.gmra.mxu2 %v1832_v42  ;;  %v1853_v29 = vpop.f32.mrf.mxu0 }
 0x52f   :  { %2002 = vmatmul.bf16.gmra.mxu1 %v1833_v41  ;;  %2060 = vmatmul.bf16.gmra.mxu2 %v1833_v41 }
 0x53c   :  { %v1872_v35 = vpop.f32.mrf.mxu1 }
 0x53d   :  { %v1873_v20 = vadd.f32 %v1872_v35, %v1843_v39 }
 0x53f   :  { %v2066_v30 = vadd.f32 %v1873_v20, %v5675_v17 }
 0x541   :  { %v4465_v60 = vmul.f32 -1.442695, %v2066_v30 }
 0x542   :  { %v1930_v63 = vpop.f32.mrf.mxu2 }
 0x543   :  { %v1931_v23 = vadd.f32 %v1930_v63, %v1901_v1  ;;  %4785 = vpow2.f32 %v4465_v60  ;;  %v1913_v60 = vpop.f32.mrf.mxu3 }
 0x544   :  { %v1874_v0 = vpop.f32.mrf.mxu1 }
 0x545   :  { %v2226_v42 = vadd.f32 %v1931_v23, %v8467_v26  ;;  %v1875_v61 = vadd.f32 %v1874_v0, %v1845_v5  ;;  %v6515_v5 = vpop.f32.mrf.mxu0 }
 0x547   :  { %v4473_v34 = vmul.f32 -1.442695, %v2226_v42  ;;  %v2067_v39 = vadd.f32 %v1875_v61, %v5675_v17 }
 0x549   :  { %4787 = vpow2.f32 %v4473_v34  ;;  %v4466_v33 = vmul.f32 -1.442695, %v2067_v39  ;;  %v4786_v20 = vpop.eup %4785 }
 0x54a   :  { %v1932_v19 = vpop.f32.mrf.mxu2  ;;  %v6517_v0 = vadd.f32 1.0, %v4786_v20 }
 0x54b   :  { %v1933_v41 = vadd.f32 %v1932_v19, %v1903_v4  ;;  %4789 = vpow2.f32 %v4466_v33 }
 0x54c   :  { %v1877_v58 = vpop.f32.mrf.mxu1  ;;  %vm2111_vm14 = vweird.f32 %v6517_v0 }
 0x54d   :  { %v2227_v35 = vadd.f32 %v1933_v41, %v8467_v26  ;;  %v1878_v1 = vadd.f32 %v1877_v58, %v1848_v56  ;;  %v6529_v20 = vpop.f32.mrf.mxu0 }
 0x54f   :  { %v4474_v30 = vmul.f32 -1.442695, %v2227_v35  ;;  %v4788_v42 = vpop.eup %4787  ;;  %v2068_v61 = vadd.f32 %v1878_v1, %v5675_v17 }
 0x550   :  { %v6522_v19 = vadd.f32 1.0, %v4788_v42 }
 0x551   :  { %4791 = vpow2.f32 %v4474_v30  ;;  %v4790_v58 = vpop.eup %4789  ;;  %v4467_v56 = vmul.f32 -1.442695, %v2068_v61 }
 0x552   :  { %v1935_v36 = vpop.f32.mrf.mxu2  ;;  %4793 = vrcp.f32 %v6517_v0  ;;  %v6525_v33 = vadd.f32 1.0, %v4790_v58  ;;  %v2277_v18 = vand.u32 2147483648, %v6522_v19  ;;  %vm2271_vm0 = vweird.f32 %v6522_v19 }
 0x553   :  { %v1936_v63 = vadd.f32 %v1935_v36, %v1906_v46 }
 0x554   :  { %v1879_v23 = vpop.f32.mrf.mxu1  ;;  %vm2126_vm3 = vweird.f32 %v6525_v33 }
 0x555   :  { %v2228_v4 = vadd.f32 %v1936_v63, %v8467_v26  ;;  %v1880_v1 = vadd.f32 %v1879_v23, %v1850_v24  ;;  %v6531_v63 = vpop.f32.mrf.mxu3 }
 0x557   :  { %v4475_v34 = vmul.f32 -1.442695, %v2228_v4  ;;  %v4792_v39 = vpop.eup %4791 }
 0x558   :  { %v6527_v35 = vpop.eup %4793  ;;  %v6534_v4 = vadd.f32 1.0, %v4792_v39 }
 0x559   :  { %4795 = vpow2.f32 %v4475_v34  ;;  %v2107_v61 = vmul.f32 %v6527_v35, %v6517_v0  ;;  %v2069_v34 = vadd.f32 %v1880_v1, %v5675_v17  ;;  %v6551_v1 = vpop.f32.mrf.mxu0  ;;  %vm2112_vm1 = vweird.f32 %v6527_v35 }
 0x55a   :  { %v1937_v36 = vpop.f32.mrf.mxu2  ;;  %4797 = vrcp.f32 %v6522_v19  ;;  %v2292_v28 = vand.u32 2147483648, %v6534_v4  ;;  %vm6606_vm5 = vmor %vm2111_vm14, %vm2112_vm1  ;;  %vm2286_vm6 = vweird.f32 %v6534_v4 }
 0x55b   :  { %v1938_v46 = vadd.f32 %v1937_v36, %v1908_v59  ;;  %4799 = vpow2.f32 %v4467_v56  ;;  %v2108_v39 = vsub.f32 1.0, %v2107_v61  ;;  %v4468_v38 = vmul.f32 -1.442695, %v2069_v34 }
 0x55c   :  { %v1882_v41 = vpop.f32.mrf.mxu1  ;;  %4801 = vrcp.f32 %v6525_v33 }
 0x55d   :  { %v2229_v30 = vadd.f32 %v1938_v46, %v8467_v26  ;;  %4803 = vrcp.f32 %v6534_v4  ;;  %v1883_v37 = vadd.f32 %v1882_v41, %v1853_v29  ;;  %v2109_v29 = vmul.f32 %v6527_v35, %v2108_v39 }
 0x55f   :  { %v4796_v42 = vpop.eup %4795  ;;  %v4476_v58 = vmul.f32 -1.442695, %v2229_v30  ;;  %v2115_v30 = vand.u32 2147483647, %v6517_v0  ;;  %v2110_v40 = vadd.f32 %v6527_v35, %v2109_v29 }
 0x560   :  { %v6540_v36 = vpop.eup %4797  ;;  %v6543_v23 = vadd.f32 1.0, %v4796_v42  ;;  %v2117_v42 = vand.u32 2147483648, %v6517_v0  ;;  %v2290_v0 = vand.u32 2147483647, %v6534_v4 }
 0x561   :  { %v4800_v24 = vpop.eup %4799  ;;  %v2267_v52 = vmul.f32 %v6540_v36, %v6522_v19  ;;  %4805 = vpow2.f32 %v4476_v58  ;;  %v2070_v58 = vadd.f32 %v1883_v37, %v5675_v17  ;;  %vm6571_vm15 = vcmp.eq.f32.partialorder %v2115_v30, 8.507059e+37 }
 0x562   :  { %v1940_v59 = vpop.f32.mrf.mxu2  ;;  %v6547_v55 = vpop.eup %4801  ;;  %v6549_v57 = vadd.f32 1.0, %v4800_v24  ;;  %4807 = vrcp.f32 %v6543_v23  ;;  %v2132_v37 = vand.u32 2147483648, %v6525_v33  ;;  %vm2272_vm4 = vweird.f32 %v6540_v36 }
 0x563   :  { %v1941_v46 = vadd.f32 %v1940_v59, %v1911_v10  ;;  %v6556_v10 = vpop.f32.mrf.mxu3  ;;  %v6560_v41 = vpop.eup %4803  ;;  %v2268_v34 = vsub.f32 1.0, %v2267_v52  ;;  %4809 = vpow2.f32 %v4468_v38  ;;  %v2122_v24 = vmul.f32 %v6547_v55, %v6525_v33  ;;  %vm6636_vm8 = vmor %vm2271_vm0, %vm2272_vm4 }
 0x564   :  { %v1884_v56 = vpop.f32.mrf.mxu1  ;;  %4811 = vrcp.f32 %v6549_v57  ;;  %v2118_v38 = vor.u32 1.1754944e-38, %v2117_v42  ;;  %v2282_v47 = vmul.f32 %v6560_v41, %v6534_v4  ;;  %v4469_v30 = vmul.f32 -1.442695, %v2070_v58 }
 0x565   :  { %v2230_v59 = vadd.f32 %v1941_v46, %v8467_v26  ;;  %v2275_v46 = vand.u32 2147483647, %v6522_v19  ;;  %v2269_v27 = vmul.f32 %v6540_v36, %v2268_v34  ;;  %v2123_v2 = vsub.f32 1.0, %v2122_v24  ;;  %v6610_v24 = vpop.f32.mrf.mxu0 }
 0x566   :  { %v2278_v42 = vor.u32 1.1754944e-38, %v2277_v18  ;;  %v1885_v8 = vadd.f32 %v1884_v56, %v6515_v5  ;;  %v2130_v34 = vand.u32 2147483647, %v6525_v33  ;;  %v6595_v29 = vor.u32 1.1754944e-38, %v2132_v37 }
 0x567   :  { %v4806_v52 = vpop.eup %4805  ;;  %vm6587_vm2 = vcmp.eq.f32.partialorder %v2275_v46, 8.507059e+37  ;;  %v2283_v5 = vsub.f32 1.0, %v2282_v47  ;;  %v2270_v46 = vadd.f32 %v6540_v36, %v2269_v27  ;;  %v2114_v47 = vsel %vm6606_vm5, %v6527_v35, %v2110_v40 }
 0x568   :  { %v6591_v54 = vadd.f32 1.0, %v4806_v52  ;;  %v2124_v37 = vmul.f32 %v6547_v55, %v2123_v2  ;;  %v2071_v45 = vadd.f32 %v1885_v8, %v5675_v17  ;;  %vm2127_vm7 = vweird.f32 %v6547_v55 }
 0x569   :  { %vm6645_vm9 = vcmp.eq.f32.partialorder %v2130_v34, 8.507059e+37  ;;  %v2145_v35 = vand.u32 2147483647, %v6549_v57  ;;  %v2274_v58 = vsel %vm6636_vm8, %v6540_v36, %v2270_v46  ;;  %vm6656_vm10 = vcmp.eq.f32.partialorder %v2290_v0, 8.507059e+37  ;;  %vm6677_vm14 = vmor %vm2126_vm3, %vm2127_vm7 }
 0x56a   :  { %v1942_v61 = vpop.f32.mrf.mxu2  ;;  %vm2287_vm11 = vweird.f32 %v6560_v41  ;;  %vm2301_vm13 = vweird.f32 %v6543_v23 }
 0x56b   :  { %v1943_v43 = vadd.f32 %v1942_v61, %v1913_v60  ;;  %v4477_v60 = vmul.f32 -1.442695, %v2230_v59  ;;  %v6580_v61 = vpop.eup %4807  ;;  %v6617_v52 = vpop.f32.mrf.mxu3  ;;  %v2322_v59 = vand.u32 2147483648, %v6591_v54  ;;  %vm6702_vm0 = vmor %vm2286_vm6, %vm2287_vm11  ;;  %vm6754_vm5 = vcmp.eq.f32.partialorder %v2145_v35, 8.507059e+37 }
 0x56c   :  { %v6567_v50 = vpop.f32.mrf.mxu1  ;;  %v4810_v25 = vpop.eup %4809  ;;  %vm2302_vm3 = vweird.f32 %v6580_v61  ;;  %vm2316_vm6 = vweird.f32 %v6591_v54 }
 0x56d   :  { %v2231_v31 = vadd.f32 %v1943_v43, %v8467_v26  ;;  %v6597_v18 = vpop.eup %4811  ;;  %v2297_v43 = vmul.f32 %v6580_v61, %v6543_v23  ;;  %4813 = vpow2.f32 %v4477_v60  ;;  %v6621_v60 = vor.u32 1.1754944e-38, %v2292_v28  ;;  %vm6742_vm4 = vmor %vm2301_vm13, %vm2302_vm3 }
 0x56e   :  { %4815 = vpow2.f32 %v4469_v30  ;;  %v6626_v27 = vadd.f32 1.0, %v4810_v25  ;;  %v2137_v2 = vmul.f32 %v6597_v18, %v6549_v57  ;;  %v6643_v25 = vsel %vm6571_vm15, %v2118_v38, %v2114_v47 }
 0x56f   :  { %v4478_v49 = vmul.f32 -1.442695, %v2231_v31  ;;  %4817 = vrcp.f32 %v6591_v54  ;;  %v2284_v31 = vmul.f32 %v6560_v41, %v2283_v5  ;;  %v2298_v8 = vsub.f32 1.0, %v2297_v43 }
 0x570   :  { %v2307_v30 = vand.u32 2147483648, %v6543_v23  ;;  %v2125_v5 = vadd.f32 %v6547_v55, %v2124_v37  ;;  %v4470_v38 = vmul.f32 -1.442695, %v2071_v45  ;;  %v1888_v34 = vadd.f32 %v6567_v50, %v6529_v20 }
 0x571   :  { %4819 = vpow2.f32 %v4478_v49  ;;  %v2147_v47 = vand.u32 2147483648, %v6549_v57  ;;  %v2138_v36 = vsub.f32 1.0, %v2137_v2  ;;  %v2299_v46 = vmul.f32 %v6580_v61, %v2298_v8  ;;  %v6696_v8 = vpop.f32.mrf.mxu0 }
 0x572   :  { %v1945_v56 = vpop.f32.mrf.mxu2  ;;  %4821 = vrcp.f32 %v6626_v27  ;;  %v6671_v45 = vsel %vm6587_vm2, %v2278_v42, %v2274_v58  ;;  %v6683_v37 = vor.u32 1.1754944e-38, %v2307_v30  ;;  %v2129_v42 = vsel %vm6677_vm14, %v6547_v55, %v2125_v5 }
 0x573   :  { %v1946_v19 = vadd.f32 %v1945_v56, %v6531_v63  ;;  %v4814_v43 = vpop.eup %4813  ;;  %v2305_v63 = vand.u32 2147483647, %v6543_v23  ;;  %v2285_v56 = vadd.f32 %v6560_v41, %v2284_v31  ;;  %4823 = vpow2.f32 %v4470_v38  ;;  %v6717_v4 = vpop.f32.mrf.mxu3 }
 0x574   :  { %v6624_v15 = vpop.f32.mrf.mxu1  ;;  %v4816_v16 = vpop.eup %4815  ;;  %v6685_v0 = vadd.f32 1.0, %v4814_v43  ;;  %v2072_v33 = vadd.f32 %v1888_v34, %v5675_v17  ;;  %vm2141_vm15 = vweird.f32 %v6549_v57  ;;  %v2139_v58 = vmul.f32 %v6597_v18, %v2138_v36 }
 0x575   :  { %v6681_v20 = vpop.eup %4817  ;;  %v2232_v2 = vadd.f32 %v1946_v19, %v8467_v26  ;;  %v6692_v28 = vadd.f32 1.0, %v4816_v16  ;;  %vm6706_vm1 = vcmp.eq.f32.partialorder %v2305_v63, 8.507059e+37  ;;  %v6713_v19 = vmul.f32 %v6671_v45, %v6456_v12 }
 0x576   :  { %vm2142_vm2 = vweird.f32 %v6597_v18  ;;  %v2300_v43 = vadd.f32 %v6580_v61, %v2299_v46  ;;  %v2312_v38 = vmul.f32 %v6681_v20, %v6591_v54  ;;  %v2289_v34 = vsel %vm6702_vm0, %v6560_v41, %v2285_v56 }
 0x577   :  { %v4820_v5 = vpop.eup %4819  ;;  %v2320_v63 = vand.u32 2147483647, %v6591_v54  ;;  %4825 = vrcp.f32 %v6685_v0  ;;  %v4479_v36 = vmul.f32 -1.442695, %v2232_v2  ;;  %v6733_v46 = vsel %vm6645_vm9, %v6595_v29, %v2129_v42  ;;  %vm6784_vm7 = vmor %vm2141_vm15, %vm2142_vm2 }
 0x578   :  { %v6726_v12 = vpop.eup %4821  ;;  %v6735_v50 = vor.u32 1.1754944e-38, %v2322_v59  ;;  %4827 = vrcp.f32 %v6692_v28  ;;  %v4471_v16 = vmul.f32 -1.442695, %v2072_v33  ;;  %v1890_v41 = vadd.f32 %v6624_v15, %v6551_v1 }
 0x579   :  { %v6746_v2 = vadd.f32 1.0, %v4820_v5  ;;  %v6751_v29 = vsel %vm6656_vm10, %v6621_v60, %v2289_v34  ;;  %v2140_v40 = vadd.f32 %v6597_v18, %v2139_v58  ;;  %v4824_v15 = vpop.eup %4823  ;;  %v2313_v1 = vsub.f32 1.0, %v2312_v38  ;;  %v6800_v57 = vpop.f32.mrf.mxu0 }
 0x57a   :  { %v1947_v49 = vpop.f32.mrf.mxu2  ;;  %v2148_v59 = vor.u32 1.1754944e-38, %v2147_v47  ;;  %v2304_v33 = vsel %vm6742_vm4, %v6580_v61, %v2300_v43  ;;  %v2152_v30 = vmul.f32 %v6726_v12, %v6626_v27  ;;  %4829 = vpow2.f32 %v4479_v36 }
 0x57b   :  { %v1948_v60 = vadd.f32 %v1947_v49, %v6556_v10  ;;  %v2337_v58 = vand.u32 2147483648, %v6685_v0  ;;  %4831 = vpow2.f32 %v4471_v16  ;;  %v2073_v47 = vadd.f32 %v1890_v41, %v5675_v17 }
 0x57c   :  { %v1988_v31 = vpop.f32.mrf.mxu1  ;;  %v2427_v61 = vsub.f32 1.0, %v6751_v29  ;;  %v6772_v38 = vadd.f32 1.0, %v4824_v15  ;;  %4833 = vrcp.f32 %v6746_v2  ;;  %vm2317_vm8 = vweird.f32 %v6681_v20  ;;  %v2022_v15 = vpop.f32.mrf.mxu3 }
 0x57d   :  { %v1989_v39 = vadd.f32 %v1988_v31, %v6610_v24  ;;  %v6770_v43 = vpop.eup %4825  ;;  %v6778_v24 = vmul.f32 %v6751_v29, %v6459_v9  ;;  %v2314_v31 = vmul.f32 %v6681_v20, %v2313_v1  ;;  %v2144_v16 = vsel %vm6784_vm7, %v6597_v18, %v2140_v40  ;;  %vm6840_vm13 = vmor %vm2316_vm6, %vm2317_vm8 }
 0x57e   :  { %v6788_v49 = vpop.eup %4827  ;;  %v6798_v9 = vsel %vm6706_vm1, %v6683_v37, %v2304_v33  ;;  %v2233_v34 = vadd.f32 %v1948_v60, %v8467_v26  ;;  %v2153_v56 = vsub.f32 1.0, %v2152_v30  ;;  %vm6805_vm9 = vcmp.eq.f32.partialorder %v2320_v63, 8.507059e+37 }
 0x57f   :  { %v2386_v36 = vadd.f32 %v1989_v39, %v5721_v48  ;;  %v2327_v18 = vmul.f32 %v6770_v43, %v6685_v0  ;;  %v2335_v37 = vand.u32 2147483647, %v6685_v0  ;;  %v6812_v55 = vor.u32 1.1754944e-38, %v2337_v58 }
 0x580   :  { %v4472_v40 = vmul.f32 -1.442695, %v2073_v47  ;;  %4835 = vrcp.f32 %v6772_v38  ;;  %vm2156_vm10 = vweird.f32 %v6626_v27  ;;  %v2315_v30 = vadd.f32 %v6681_v20, %v2314_v31 }
 0x581   :  { %vm2157_vm11 = vweird.f32 %v6726_v12  ;;  %v4480_v47 = vmul.f32 -1.442695, %v2233_v34  ;;  %vm2331_vm14 = vweird.f32 %v6685_v0  ;;  %vm2332_vm15 = vweird.f32 %v6770_v43 }
 0x582   :  { %v2046_v23 = vpop.f32.mrf.mxu2  ;;  %4837 = vpow2.f32 %v4472_v40  ;;  %v2319_v54 = vsel %vm6840_vm13, %v6681_v20, %v2315_v30  ;;  %v2162_v20 = vand.u32 2147483648, %v6626_v27  ;;  %v2350_v30 = vand.u32 2147483647, %v6746_v2  ;;  %vm6877_vm0 = vmor %vm2156_vm10, %vm2157_vm11 }
 0x583   :  { %v2047_v35 = vadd.f32 %v2046_v23, %v6617_v52  ;;  %v4830_v23 = vpop.eup %4829  ;;  %v2328_v52 = vsub.f32 1.0, %v2327_v18  ;;  %vm6891_vm2 = vcmp.eq.f32.partialorder %v2335_v37, 8.507059e+37  ;;  %vm2172_vm3 = vweird.f32 %v6788_v49 }
 0x584   :  { %v1990_v5 = vpop.f32.mrf.mxu1  ;;  %v4832_v63 = vpop.eup %4831  ;;  %v2163_v39 = vor.u32 1.1754944e-38, %v2162_v20  ;;  %vm2171_vm4 = vweird.f32 %v6692_v28  ;;  %vm6989_vm10 = vcmp.eq.f32.partialorder %v2350_v30, 8.507059e+37  ;;  %v2190_v29 = vand.u32 2147483647, %v6772_v38 }
 0x585   :  { %v2394_v10 = vadd.f32 %v2047_v35, %v5726_v14  ;;  %v2167_v35 = vmul.f32 %v6788_v49, %v6692_v28  ;;  %v6825_v58 = vpop.eup %4833  ;;  %v1991_v42 = vadd.f32 %v1990_v5, %v6696_v8  ;;  %v2352_v8 = vand.u32 2147483648, %v6746_v2  ;;  %vm6949_vm7 = vmor %vm2171_vm4, %vm2172_vm3 }
 0x586   :  { %v2160_v5 = vand.u32 2147483647, %v6626_v27  ;;  %v6854_v18 = vpop.eup %4835  ;;  %vm2347_vm6 = vweird.f32 %v6825_v58 }
 0x587   :  { %v2402_v41 = vmul.f32 %v2394_v10, %v6643_v25  ;;  %v6817_v25 = vsel %vm6754_vm5, %v2148_v59, %v2144_v16  ;;  %v2154_v10 = vmul.f32 %v6726_v12, %v2153_v56  ;;  %v6830_v16 = vadd.f32 1.0, %v4830_v23  ;;  %vm6929_vm5 = vmor %vm2331_vm14, %vm2332_vm15 }
 0x588   :  { %v2168_v56 = vsub.f32 1.0, %v2167_v35  ;;  %v2387_v40 = vadd.f32 %v1991_v42, %v5721_v48  ;;  %v6865_v35 = vor.u32 1.1754944e-38, %v2352_v8  ;;  %v4838_v42 = vpop.eup %4837  ;;  %vm6881_vm1 = vcmp.eq.f32.partialorder %v2160_v5, 8.507059e+37 }
 0x589   :  { %v2410_v33 = vadd.f32 %v2402_v41, %v2386_v36  ;;  %v6834_v36 = vmul.f32 %v6798_v9, %v6470_v7  ;;  %v2342_v41 = vmul.f32 %v6825_v58, %v6746_v2  ;;  %v6849_v7 = vadd.f32 1.0, %v4832_v63  ;;  %v1966_v63 = vpop.f32.mrf.mxu0 }
 0x58a   :  { %v2048_v60 = vpop.f32.mrf.mxu2  ;;  %v2367_v5 = vand.u32 2147483648, %v6830_v16  ;;  %vm2187_vm11 = vweird.f32 %v6854_v18  ;;  %vm2186_vm14 = vweird.f32 %v6772_v38 }
 0x58b   :  { %v2049_v59 = vadd.f32 %v2048_v60, %v6717_v4  ;;  %4839 = vtanh.f32 %v2410_v33  ;;  %v2155_v33 = vadd.f32 %v6726_v12, %v2154_v10  ;;  %v2329_v60 = vmul.f32 %v6770_v43, %v2328_v52  ;;  %vm7032_vm15 = vmor %vm2186_vm14, %vm2187_vm11 }
 0x58c   :  { %v1993_v31 = vpop.f32.mrf.mxu1  ;;  %4841 = vpow2.f32 %v4480_v47  ;;  %v2343_v10 = vsub.f32 1.0, %v2342_v41  ;;  %vm2201_vm4 = vweird.f32 %v6849_v7 }
 0x58d   :  { %v2395_v4 = vadd.f32 %v2049_v59, %v5726_v14  ;;  %4843 = vrcp.f32 %v6830_v16  ;;  %v2024_v59 = vpop.f32.mrf.mxu3  ;;  %v2330_v27 = vadd.f32 %v6770_v43, %v2329_v60  ;;  %v8502_v60 = vsub.f32 1.0, %v6671_v45 }
 0x58e   :  { %4845 = vrcp.f32 %v6849_v7  ;;  %v2177_v45 = vand.u32 2147483648, %v6692_v28 }
 0x58f   :  { %v2403_v23 = vmul.f32 %v2395_v4, %v6733_v46  ;;  %v6870_v46 = vsel %vm6805_vm9, %v6735_v50, %v2319_v54  ;;  %v2169_v50 = vmul.f32 %v6788_v49, %v2168_v56  ;;  %v1994_v4 = vadd.f32 %v1993_v31, %v6800_v57 }
 0x590   :  { %v2159_v54 = vsel %vm6877_vm0, %v6726_v12, %v2155_v33  ;;  %v6903_v12 = vmul.f32 %v6870_v46, %v6473_v62  ;;  %v2344_v33 = vmul.f32 %v6825_v58, %v2343_v10  ;;  %v2175_v62 = vand.u32 2147483647, %v6692_v28 }
 0x591   :  { %v2411_v47 = vadd.f32 %v2403_v23, %v2387_v40  ;;  %v4840_v1 = vpop.eup %4839  ;;  %v2170_v34 = vadd.f32 %v6788_v49, %v2169_v50  ;;  %v6919_v56 = vor.u32 1.1754944e-38, %v2367_v5  ;;  %vm2346_vm9 = vweird.f32 %v6746_v2 }
 0x592   :  { %v2051_v52 = vpop.f32.mrf.mxu2  ;;  %v2434_v20 = vmul.f32 %v4840_v1, %v8502_v60  ;;  %v6939_v1 = vadd.f32 %v6825_v58, %v2344_v33  ;;  %vm6959_vm8 = vcmp.eq.f32.partialorder %v2175_v62, 8.507059e+37  ;;  %vm7012_vm13 = vmor %vm2346_vm9, %vm2347_vm6  ;;  %vm7036_vm0 = vcmp.eq.f32.partialorder %v2190_v29, 8.507059e+37 }
 0x593   :  { %4847 = vtanh.f32 %v2411_v47  ;;  %v2052_v41 = vadd.f32 %v2051_v52, %v2022_v15  ;;  %v4842_v47 = vpop.eup %4841  ;;  %v6898_v15 = vadd.f32 1.0, %v4838_v42  ;;  %v2164_v52 = vsel %vm6881_vm1, %v2163_v39, %v2159_v54 }
 0x594   :  { %v1995_v23 = vpop.f32.mrf.mxu1  ;;  %v6905_v37 = vpop.eup %4843  ;;  %v2388_v42 = vadd.f32 %v1994_v4, %v5721_v48  ;;  %v2182_v39 = vmul.f32 %v6854_v18, %v6772_v38  ;;  %v6936_v50 = vadd.f32 1.0, %v4842_v47  ;;  %v6943_v4 = vadd.f32 %v6713_v19, %v2434_v20 }
 0x595   :  { %v2396_v31 = vadd.f32 %v2052_v41, %v5726_v14  ;;  %v6917_v57 = vpop.eup %4845  ;;  %v2357_v8 = vmul.f32 %v6905_v37, %v6830_v16  ;;  %4849 = vrcp.f32 %v6898_v15  ;;  %v2334_v47 = vsel %vm6929_vm5, %v6770_v43, %v2330_v27 }
 0x596   :  { %v1996_v33 = vadd.f32 %v1995_v23, %v1966_v63  ;;  %v2174_v19 = vsel %vm6949_vm7, %v6788_v49, %v2170_v34  ;;  %v2178_v43 = vor.u32 1.1754944e-38, %v2177_v45  ;;  %v2183_v27 = vsub.f32 1.0, %v2182_v39 }
 0x597   :  { %v2404_v41 = vmul.f32 %v2396_v31, %v6817_v25  ;;  %v1969_v31 = vpop.f32.mrf.mxu0  ;;  %v2358_v63 = vsub.f32 1.0, %v2357_v8  ;;  %v6972_v49 = vsel %vm6891_vm2, %v6812_v55, %v2334_v47  ;;  %v2380_v23 = vand.u32 2147483647, %v6936_v50 }
 0x598   :  { %v2382_v45 = vand.u32 2147483648, %v6936_v50  ;;  %v2389_v39 = vadd.f32 %v1996_v33, %v5721_v48  ;;  %v2197_v55 = vmul.f32 %v6917_v57, %v6849_v7  ;;  %v7000_v47 = vmul.f32 %v6972_v49, %v6486_v21 }
 0x599   :  { %v4848_v10 = vpop.eup %4847  ;;  %v2412_v28 = vadd.f32 %v2404_v41, %v2388_v42  ;;  %v2192_v21 = vand.u32 2147483648, %v6772_v38  ;;  %v2349_v2 = vsel %vm7012_vm13, %v6825_v58, %v6939_v1  ;;  %vm2362_vm1 = vweird.f32 %v6905_v37 }
 0x59a   :  { %v2435_v0 = vmul.f32 %v4848_v10, %v2427_v61  ;;  %v2053_v54 = vpop.f32.mrf.mxu2  ;;  %v2027_v61 = vpop.f32.mrf.mxu3  ;;  %v7051_v29 = vsel %vm6989_vm10, %v6865_v35, %v2349_v2  ;;  %vm2361_vm2 = vweird.f32 %v6830_v16  ;;  %vm2202_vm3 = vweird.f32 %v6917_v57 }
 0x59b   :  { %v2054_v60 = vadd.f32 %v2053_v54, %v2024_v59  ;;  %4851 = vtanh.f32 %v2412_v28  ;;  %v6981_v62 = vpop.eup %4849  ;;  %v2179_v28 = vsel %vm6959_vm8, %v2178_v43, %v2174_v19  ;;  %v2359_v54 = vmul.f32 %v6905_v37, %v2358_v63  ;;  %vm7087_vm6 = vmor %vm2201_vm4, %vm2202_vm3 }
 0x59c   :  { %v6965_v20 = vadd.f32 %v6778_v24, %v2435_v0  ;;  %v1998_v42 = vpop.f32.mrf.mxu1  ;;  %4853 = vrcp.f32 %v6936_v50  ;;  %v2486_v24 = vmul.f32 %v6943_v4, %v6943_v4  ;;  %v2184_v0 = vmul.f32 %v6854_v18, %v2183_v27  ;;  %vm7102_vm7 = vmor %vm2361_vm2, %vm2362_vm1 }
 0x59d   :  { %v2397_v59 = vadd.f32 %v2054_v60, %v5726_v14  ;;  %v1999_v43 = vadd.f32 %v1998_v42, %v1969_v31  ;;  %v2198_v63 = vsub.f32 1.0, %v2197_v55  ;;  %v7017_v31 = vadd.f32 %v6905_v37, %v2359_v54 }
 0x59e   :  { %v2458_v34 = vadd.f32 %v6965_v20, %v6943_v4  ;;  %v2487_v41 = vmul.f32 %v6965_v20, %v6965_v20  ;;  %v2193_v1 = vor.u32 1.1754944e-38, %v2192_v21  ;;  %vm2217_vm10 = vweird.f32 %v6981_v62 }
 0x59f   :  { %v2405_v40 = vmul.f32 %v2397_v59, %v2164_v52  ;;  %v2430_v52 = vsub.f32 1.0, %v6972_v49  ;;  %v2390_v54 = vadd.f32 %v1999_v43, %v5721_v48  ;;  %vm2376_vm11 = vweird.f32 %v6936_v50 }
 0x5a0   :  { %v2459_v25 = vrot.slane %v2458_v34, 4  ;;  %v2494_v8 = vadd.f32 %v2487_v41, %v2486_v24  ;;  %vm2216_vm13 = vweird.f32 %v6898_v15  ;;  %v2220_v49 = vand.u32 2147483647, %v6898_v15 }
 0x5a1   :  { %v2413_v5 = vadd.f32 %v2405_v40, %v2389_v39  ;;  %v4852_v30 = vpop.eup %4851  ;;  %v2185_v39 = vadd.f32 %v6854_v18, %v2184_v0  ;;  %vm7132_vm14 = vmor %vm2216_vm13, %vm2217_vm10  ;;  %vm7167_vm1 = vcmp.eq.f32.partialorder %v2380_v23, 8.507059e+37 }
 0x5a2   :  { %v2460_v33 = vadd.f32 %v2459_v25, %v2458_v34  ;;  %v2495_v60 = vrot.slane %v2494_v8, 4  ;;  %v2056_v59 = vpop.f32.mrf.mxu2  ;;  %v7004_v19 = vpop.eup %4853 }
 0x5a3   :  { %4855 = vtanh.f32 %v2413_v5  ;;  %v2057_v27 = vadd.f32 %v2056_v59, %v2027_v61  ;;  %v1971_v34 = vpop.f32.mrf.mxu0  ;;  %v8513_v61 = vsub.f32 1.0, %v6798_v9  ;;  %v2372_v0 = vmul.f32 %v7004_v19, %v6936_v50 }
 0x5a4   :  { %v2496_v24 = vadd.f32 %v2495_v60, %v2494_v8  ;;  %v2000_v41 = vpop.f32.mrf.mxu1  ;;  %v2461_v40 = vrot.slane %v2460_v33, 2  ;;  %v2029_v8 = vpop.f32.mrf.mxu3  ;;  %v2189_v58 = vsel %vm7032_vm15, %v6854_v18, %v2185_v39  ;;  %v8518_v18 = vsub.f32 1.0, %v6870_v46 }
 0x5a5   :  { %v2436_v42 = vmul.f32 %v4852_v30, %v8513_v61  ;;  %v2398_v55 = vadd.f32 %v2057_v27, %v5726_v14  ;;  %v2199_v30 = vmul.f32 %v6917_v57, %v2198_v63  ;;  %v2212_v63 = vmul.f32 %v6981_v62, %v6898_v15 }
 0x5a6   :  { %v2497_v5 = vrot.slane %v2496_v24, 2  ;;  %v2462_v60 = vadd.f32 %v2461_v40, %v2460_v33  ;;  %vm2377_vm9 = vweird.f32 %v7004_v19  ;;  %vm2221_vm15 = vcmp.eq.f32.partialorder %v2220_v49, 8.507059e+37 }
 0x5a7   :  { %v2406_v59 = vmul.f32 %v2398_v55, %v2179_v28  ;;  %v7046_v43 = vadd.f32 %v6834_v36, %v2436_v42  ;;  %v2001_v36 = vadd.f32 %v2000_v41, %v1971_v34  ;;  %v2194_v55 = vsel %vm7036_vm0, %v2193_v1, %v2189_v58  ;;  %vm7161_vm0 = vmor %vm2376_vm11, %vm2377_vm9 }
 0x5a8   :  { %v2498_v27 = vadd.f32 %v2497_v5, %v2496_v24  ;;  %v2463_v33 = vrot.slane %v2462_v60, 1  ;;  %v2373_v24 = vsub.f32 1.0, %v2372_v0  ;;  %v2200_v35 = vadd.f32 %v6917_v57, %v2199_v30 }
 0x5a9   :  { %v4856_v28 = vpop.eup %4855  ;;  %v2414_v40 = vadd.f32 %v2406_v59, %v2390_v54  ;;  %v2488_v5 = vmul.f32 %v7046_v43, %v7046_v43  ;;  %v2213_v34 = vsub.f32 1.0, %v2212_v63  ;;  %v2391_v9 = vadd.f32 %v2001_v36, %v5721_v48 }
 0x5aa   :  { %v2437_v39 = vmul.f32 %v4856_v28, %v8518_v18  ;;  %v2058_v21 = vpop.f32.mrf.mxu2  ;;  %v2464_v25 = vadd.f32 %v2463_v33, %v2462_v60  ;;  %v2499_v61 = vrot.slane %v2498_v27, 1  ;;  %v2207_v30 = vand.u32 2147483648, %v6849_v7 }
 0x5ab   :  { %v2059_v42 = vadd.f32 %v2058_v21, %v2029_v8  ;;  %4857 = vtanh.f32 %v2414_v40  ;;  %v1974_v59 = vpop.f32.mrf.mxu0  ;;  %v8519_v58 = vand.u32 2147483647, %v6830_v16  ;;  %v2205_v63 = vand.u32 2147483647, %v6849_v7 }
 0x5ac   :  { %v7062_v10 = vadd.f32 %v6903_v12, %v2437_v39  ;;  %v2500_v0 = vadd.f32 %v2499_v61, %v2498_v27  ;;  %v7065_v46 = vmul.f32 0.0625, %v2464_v25  ;;  %v2003_v12 = vpop.f32.mrf.mxu1  ;;  %v2032_v27 = vpop.f32.mrf.mxu3  ;;  %v2374_v39 = vmul.f32 %v7004_v19, %v2373_v24 }
 0x5ad   :  { %v2399_v41 = vadd.f32 %v2059_v42, %v5726_v14  ;;  %vm7081_vm5 = vcmp.eq.f32.partialorder %v8519_v58, 8.507059e+37  ;;  %v2431_v25 = vsub.f32 1.0, %v7051_v29  ;;  %v2204_v61 = vsel %vm7087_vm6, %v6917_v57, %v2200_v35 }
 0x5ae   :  { %v2465_v8 = vadd.f32 %v7062_v10, %v7046_v43  ;;  %v2489_v2 = vmul.f32 %v7062_v10, %v7062_v10  ;;  %v2526_v60 = vmul.f32 0.0625, %v2500_v0  ;;  %v2530_v54 = vmul.f32 %v7065_v46, %v7065_v46 }
 0x5af   :  { %v2407_v38 = vmul.f32 %v2399_v41, %v2194_v55  ;;  %v2214_v0 = vmul.f32 %v6981_v62, %v2213_v34  ;;  %vm2206_vm8 = vcmp.eq.f32.partialorder %v2205_v63, 8.507059e+37  ;;  %v2447_v58 = vmul.f32 %v7051_v29, %v6489_v51 }
 0x5b0   :  { %v2466_v33 = vrot.slane %v2465_v8, 4  ;;  %v2501_v28 = vadd.f32 %v2489_v2, %v2488_v5  ;;  %v2534_v18 = vsub.f32 %v2526_v60, %v2530_v54  ;;  %v2004_v2 = vadd.f32 %v2003_v12, %v1974_v59 }
 0x5b1   :  { %v2415_v21 = vadd.f32 %v2407_v38, %v2391_v9  ;;  %v4858_v41 = vpop.eup %4857  ;;  %v2208_v60 = vor.u32 1.1754944e-38, %v2207_v30  ;;  %v2364_v12 = vsel %vm7102_vm7, %v6905_v37, %v7017_v31  ;;  %v2215_v9 = vadd.f32 %v6981_v62, %v2214_v0 }
 0x5b2   :  { %v2467_v36 = vadd.f32 %v2466_v33, %v2465_v8  ;;  %v2502_v42 = vrot.slane %v2501_v28, 4  ;;  %v2061_v55 = vpop.f32.mrf.mxu2  ;;  %v2538_v5 = vmax.f32 %v2534_v18, 0.0  ;;  %v2438_v59 = vmul.f32 %v4858_v41, %v2430_v52 }
 0x5b3   :  { %4859 = vtanh.f32 %v2415_v21  ;;  %v2062_v7 = vadd.f32 %v2061_v55, %v2032_v27  ;;  %v2209_v34 = vsel %vm2206_vm8, %v2208_v60, %v2204_v61  ;;  %v2392_v38 = vadd.f32 %v2004_v2, %v5721_v48 }
 0x5b4   :  { %v2503_v57 = vadd.f32 %v2502_v42, %v2501_v28  ;;  %v7106_v35 = vadd.f32 1e-05, %v2538_v5  ;;  %v2468_v8 = vrot.slane %v2467_v36, 2  ;;  %v2222_v27 = vand.u32 2147483648, %v6898_v15  ;;  %v2005_v33 = vpop.f32.mrf.mxu1  ;;  %v1976_v28 = vpop.f32.mrf.mxu0 }
 0x5b5   :  { %v2400_v54 = vadd.f32 %v2062_v7, %v5726_v14  ;;  %v2375_v40 = vadd.f32 %v7004_v19, %v2374_v39  ;;  %v2369_v63 = vsel %vm7081_vm5, %v6919_v56, %v2364_v12  ;;  %v2034_v29 = vpop.f32.mrf.mxu3  ;;  %v7137_v61 = vadd.f32 %v7000_v47, %v2438_v59 }
 0x5b6   :  { %v2504_v16 = vrot.slane %v2503_v57, 2  ;;  %4861 = vrsqrt.f32 %v7106_v35  ;;  %v2469_v37 = vadd.f32 %v2468_v8, %v2467_v36  ;;  %v2219_v39 = vsel %vm7132_vm14, %v6981_v62, %v2215_v9 }
 0x5b7   :  { %v2408_v30 = vmul.f32 %v2400_v54, %v2209_v34  ;;  %v2006_v56 = vadd.f32 %v2005_v33, %v1976_v28  ;;  %v2223_v55 = vor.u32 1.1754944e-38, %v2222_v27  ;;  %v2490_v62 = vmul.f32 %v7137_v61, %v7137_v61 }
 0x5b8   :  { %v2505_v31 = vadd.f32 %v2504_v16, %v2503_v57  ;;  %v2470_v51 = vrot.slane %v2469_v37, 1  ;;  %v2379_v27 = vsel %vm7161_vm0, %v7004_v19, %v2375_v40  ;;  %v2383_v49 = vor.u32 1.1754944e-38, %v2382_v45 }
 0x5b9   :  { %v4860_v52 = vpop.eup %4859  ;;  %v2416_v18 = vadd.f32 %v2408_v30, %v2392_v38  ;;  %v2224_v7 = vsel %vm2221_vm15, %v2223_v55, %v2219_v39  ;;  %v2393_v34 = vadd.f32 %v2006_v56, %v5721_v48  ;;  %vm2552_vm3 = vweird.f32 %v7106_v35  ;;  %v7183_v55 = vld [vmem:[#allocation10 + $0x8] sm:$0xff] }
 0x5ba   :  { %v2439_v15 = vmul.f32 %v4860_v52, %v2431_v25  ;;  %v2063_v36 = vpop.f32.mrf.mxu2  ;;  %v2506_v1 = vrot.slane %v2505_v31, 1  ;;  %v2471_v0 = vadd.f32 %v2470_v51, %v2469_v37  ;;  %v2448_v39 = vmul.f32 %v2369_v63, %v6496_v32 }
 0x5bb   :  { %v2064_v42 = vadd.f32 %v2063_v36, %v2034_v29  ;;  %4863 = vtanh.f32 %v2416_v18  ;;  %v2432_v18 = vsub.f32 1.0, %v2369_v63  ;;  %v2384_v29 = vsel %vm7167_vm1, %v2383_v49, %v2379_v27  ;;  %v8532_v49 = vld [vmem:[#allocation24_spill] sm:$0xff] }
 0x5bc   :  { %v4862_v5 = vpop.eup %4861  ;;  %v7142_v41 = vadd.f32 %v2447_v58, %v2439_v15  ;;  %v2507_v2 = vadd.f32 %v2506_v1, %v2505_v31  ;;  %v7146_v60 = vmul.f32 0.0625, %v2471_v0 }
 0x5bd   :  { %v2401_v47 = vadd.f32 %v2064_v42, %v5726_v14  ;;  %v2547_v25 = vmul.f32 %v4862_v5, %v7106_v35  ;;  %vm2553_vm2 = vweird.f32 %v4862_v5  ;;  %v2433_v42 = vsub.f32 1.0, %v2384_v29 }
 0x5be   :  { %v2472_v24 = vadd.f32 %v7142_v41, %v7137_v61  ;;  %v2491_v57 = vmul.f32 %v7142_v41, %v7142_v41  ;;  %v2527_v8 = vmul.f32 0.0625, %v2507_v2  ;;  %v2531_v16 = vmul.f32 %v7146_v60, %v7146_v60  ;;  %vm2554_vm4 = vmor %vm2552_vm3, %vm2553_vm2 }
 0x5bf   :  { %v2409_v12 = vmul.f32 %v2401_v47, %v2224_v7  ;;  %v2548_v54 = vmul.f32 %v4862_v5, %v2547_v25  ;;  %v2449_v25 = vmul.f32 %v2384_v29, %v6499_v44 }
 0x5c0   :  { %v2473_v38 = vrot.slane %v2472_v24, 4  ;;  %v2508_v30 = vadd.f32 %v2491_v57, %v2490_v62  ;;  %v2535_v58 = vsub.f32 %v2527_v8, %v2531_v16 }
 0x5c1   :  { %v2417_v37 = vadd.f32 %v2409_v12, %v2393_v34  ;;  %v2549_v31 = vmul.f32 0.5, %v2548_v54  ;;  %v4864_v33 = vpop.eup %4863 }
 0x5c2   :  { %v2474_v52 = vadd.f32 %v2473_v38, %v2472_v24  ;;  %v2509_v28 = vrot.slane %v2508_v30, 4  ;;  %v2539_v21 = vmax.f32 %v2535_v58, 0.0  ;;  %v2440_v19 = vmul.f32 %v4864_v33, %v2432_v18 }
 0x5c3   :  { %4865 = vtanh.f32 %v2417_v37  ;;  %v2550_v23 = vsub.f32 1.5, %v2549_v31 }
 0x5c4   :  { %v2510_v51 = vadd.f32 %v2509_v28, %v2508_v30  ;;  %v2475_v15 = vrot.slane %v2474_v52, 2  ;;  %v7179_v36 = vadd.f32 1e-05, %v2539_v21  ;;  %v7186_v47 = vadd.f32 %v2448_v39, %v2440_v19  ;;  %v8533_v28 = vld [vmem:[#allocation25_spill] sm:$0xff] }
 0x5c5   :  { %v2551_v40 = vmul.f32 %v4862_v5, %v2550_v23  ;;  %v1757_v18 = vmax.f32 %v8533_v28, %v6324_v3 }
 0x5c6   :  { %v2511_v50 = vrot.slane %v2510_v51, 2  ;;  %v2476_v45 = vadd.f32 %v2475_v15, %v2474_v52  ;;  %4867 = vrsqrt.f32 %v7179_v36  ;;  %v2492_v34 = vmul.f32 %v7186_v47, %v7186_v47 }
 0x5c7   :  { %v2555_v1 = vsel %vm2554_vm4, %v4862_v5, %v2551_v40  ;;  %v1756_v52 = vmax.f32 %v8532_v49, %v6322_v13  ;;  %vm2562_vm6 = vweird.f32 %v7179_v36 }
 0x5c8   :  { %v2512_v56 = vadd.f32 %v2511_v50, %v2510_v51  ;;  %v2586_v0 = vmul.f32 %v7183_v55, %v2555_v1  ;;  %v2477_v2 = vrot.slane %v2476_v45, 1 }
 0x5c9   :  { %v4866_v7 = vpop.eup %4865 }
 0x5ca   :  { %v2441_v35 = vmul.f32 %v4866_v7, %v2433_v42  ;;  %v2590_v62 = vmul.f32 %v2586_v0, %v7065_v46  ;;  %v2478_v24 = vadd.f32 %v2477_v2, %v2476_v45  ;;  %v2610_v32 = vperm.slane %v2586_v0, 0 }
 0x5cb   :  { %v2513_v63 = vrot.slane %v2512_v56, 1 }
 0x5cc   :  { %v7190_v5 = vadd.f32 %v2449_v25, %v2441_v35  ;;  %v2598_v57 = vrot.slane %v2590_v62, 7  ;;  %v4868_v8 = vpop.eup %4867  ;;  %v7194_v54 = vmul.f32 0.0625, %v2478_v24  ;;  %v2614_v9 = vmul.f32 %v2610_v32, %v6943_v4 }
 0x5cd   :  { %v2514_v12 = vadd.f32 %v2513_v63, %v2512_v56  ;;  %v2557_v59 = vmul.f32 %v4868_v8, %v7179_v36  ;;  %v2615_v38 = vmul.f32 %v2610_v32, %v6965_v20  ;;  %vm2563_vm5 = vweird.f32 %v4868_v8 }
 0x5ce   :  { %v2479_v16 = vadd.f32 %v7190_v5, %v7186_v47  ;;  %v2493_v44 = vmul.f32 %v7190_v5, %v7190_v5  ;;  %v2606_v46 = vsub.f32 %v7183_v55, %v2598_v57  ;;  %v2532_v27 = vmul.f32 %v7194_v54, %v7194_v54  ;;  %vm2564_vm7 = vmor %vm2562_vm6, %vm2563_vm5 }
 0x5cf   :  { %v2528_v30 = vmul.f32 0.0625, %v2514_v12  ;;  %v2558_v33 = vmul.f32 %v4868_v8, %v2557_v59 }
 0x5d0   :  { %v2480_v37 = vrot.slane %v2479_v16, 4  ;;  %v2515_v31 = vadd.f32 %v2493_v44, %v2492_v34  ;;  %v2622_v58 = vperm.slane %v2606_v46, 1 }
 0x5d1   :  { %v2536_v23 = vsub.f32 %v2528_v30, %v2532_v27  ;;  %v2559_v20 = vmul.f32 0.5, %v2558_v33  ;;  %v8535_v27 = vld [vmem:[#allocation87_spill] sm:$0xff]  ;;  %v8537_v33 = vld [vmem:[#allocation48_spill] sm:$0xff] }
 0x5d2   :  { %v2481_v21 = vadd.f32 %v2480_v37, %v2479_v16  ;;  %v2516_v51 = vrot.slane %v2515_v31, 4  ;;  %v2626_v4 = vadd.f32 %v2622_v58, %v2614_v9  ;;  %v2627_v29 = vadd.f32 %v2622_v58, %v2615_v38  ;;  %v8534_v38 = vld [vmem:[#allocation29_spill] sm:$0xff]  ;;  %v8536_v37 = vld [vmem:[#allocation30_spill] sm:$0xff] }
 0x5d3   :  { %v2540_v15 = vmax.f32 %v2536_v23, 0.0  ;;  %v2560_v39 = vsub.f32 1.5, %v2559_v20  ;;  %v1758_v30 = vmax.f32 %v8534_v38, %v6353_v53  ;;  %v8538_v53 = vld [vmem:[#allocation49_spill] sm:$0xff] }
 0x5d4   :  { %v2517_v19 = vadd.f32 %v2516_v51, %v2515_v31  ;;  %v7210_v40 = vmax.f32 %v1756_v52, %v2626_v4  ;;  %v7212_v50 = vmax.f32 %v1757_v18, %v2627_v29  ;;  %v7214_v45 = vpack.c.bf16 %v2627_v29, %v2626_v4  ;;  %v8539_v29 = vld [vmem:[#allocation50_spill] sm:$0xff] }
 0x5d5   :  { %v2544_v13 = vadd.f32 1e-05, %v2540_v15  ;;  %v2482_v1 = vrot.slane %v2481_v21, 2  ;;  %v2561_v3 = vmul.f32 %v4868_v8, %v2560_v39  ;;  %v1759_v31 = vmax.f32 %v8536_v37, %v8535_v27  ;;  %v8547_v27 = vld [vmem:[#allocation38_spill] sm:$0xff] }
 0x5d6   :  { %v2518_v56 = vrot.slane %v2517_v19, 2  ;;  %2654 = vmatmul.bf16.vlgmr.msra.gmra.mxu0 %v7214_v45  ;;  %2720 = vmatmul.bf16.vlgmr.msrb.gmra.mxu3 %v7214_v45 }
 0x5d7   :  { %4869 = vrsqrt.f32 %v2544_v13  ;;  %v2483_v42 = vadd.f32 %v2482_v1, %v2481_v21  ;;  %2886 = vmatpush.bf16.msra.mxu0 %v5461_v6  ;;  %v2565_v2 = vsel %vm2564_vm7, %v4868_v8, %v2561_v3  ;;  %vm2572_vm9 = vweird.f32 %v2544_v13  ;;  %v8540_v1 = vld [vmem:[#allocation51_spill] sm:$0xff] }
 0x5d8   :  { %v2519_v0 = vadd.f32 %v2518_v56, %v2517_v19  ;;  %v2587_v35 = vmul.f32 %v7183_v55, %v2565_v2 }
 0x5d9   :  { %v2484_v7 = vrot.slane %v2483_v42, 1 }
 0x5da   :  { %v2520_v25 = vrot.slane %v2519_v0, 1  ;;  %v2591_v24 = vmul.f32 %v2587_v35, %v7146_v60  ;;  %v2611_v34 = vperm.slane %v2587_v35, 0  ;;  %v8542_v35 = vld [vmem:[#allocation35_spill] sm:$0xff] }
 0x5db   :  { %v2485_v62 = vadd.f32 %v2484_v7, %v2483_v42  ;;  %2887 = vmatpush.bf16.msra.mxu0 %v5465_v22  ;;  %v8541_v7 = vld [vmem:[#allocation88_spill] sm:$0xff] }
 0x5dc   :  { %v2521_v32 = vadd.f32 %v2520_v25, %v2519_v0  ;;  %v2599_v36 = vrot.slane %v2591_v24, 7  ;;  %v2616_v22 = vmul.f32 %v2611_v34, %v7046_v43  ;;  %v2617_v60 = vmul.f32 %v2611_v34, %v7062_v10  ;;  %v8543_v25 = vld [vmem:[#allocation89_spill] sm:$0xff] }
 0x5dd   :  { %v4870_v63 = vpop.eup %4869  ;;  %v7223_v57 = vmul.f32 0.0625, %v2485_v62  ;;  %v8544_v62 = vld [vmem:[#allocation36_spill] sm:$0xff] }
 0x5de   :  { %v2567_v12 = vmul.f32 %v4870_v63, %v2544_v13  ;;  %v2529_v6 = vmul.f32 0.0625, %v2521_v32  ;;  %v2607_v16 = vsub.f32 %v7183_v55, %v2599_v36  ;;  %vm2573_vm8 = vweird.f32 %v4870_v63  ;;  %v8545_v36 = vld [vmem:[#allocation52_spill] sm:$0xff] }
 0x5df   :  { %v2533_v8 = vmul.f32 %v7223_v57, %v7223_v57  ;;  %2888 = vmatpush.bf16.msra.mxu0 %v5468_v11  ;;  %vm2574_vm10 = vmor %vm2572_vm9, %vm2573_vm8  ;;  %v1761_v24 = vmax.f32 %v8544_v62, %v8543_v25  ;;  %v8562_v25 = vld [vmem:[#allocation75_spill] sm:$0xff]  ;;  %v8563_v62 = vld [vmem:[#allocation77_spill] sm:$0xff] }
 0x5e0   :  { %v2568_v44 = vmul.f32 %v4870_v63, %v2567_v12  ;;  %v2623_v59 = vperm.slane %v2607_v16, 1 }
 0x5e1   :  { %v2537_v46 = vsub.f32 %v2529_v6, %v2533_v8 }
 0x5e2   :  { %v2569_v9 = vmul.f32 0.5, %v2568_v44  ;;  %v2628_v11 = vadd.f32 %v2623_v59, %v2616_v22  ;;  %v2629_v49 = vadd.f32 %v2623_v59, %v2617_v60 }
 0x5e3   :  { %v2541_v58 = vmax.f32 %v2537_v46, 0.0  ;;  %2889 = vmatpush.bf16.msra.mxu0 %v8537_v33 }
 0x5e4   :  { %v2570_v52 = vsub.f32 1.5, %v2569_v9  ;;  %v7236_v43 = vpack.c.bf16 %v2629_v49, %v2628_v11  ;;  %v7238_v18 = vmax.f32 %v1758_v30, %v2628_v11  ;;  %v7240_v23 = vmax.f32 %v1759_v31, %v2629_v49  ;;  %v8546_v30 = vld [vmem:[#allocation90_spill] sm:$0xff]  ;;  %v8548_v31 = vld [vmem:[#allocation91_spill] sm:$0xff] }
 0x5e5   :  { %v2545_v28 = vadd.f32 1e-05, %v2541_v58  ;;  %v1762_v37 = vmax.f32 %v8547_v27, %v8546_v30  ;;  %v8549_v58 = vld [vmem:[#allocation39_spill] sm:$0xff] }
 0x5e6   :  { %v2571_v10 = vmul.f32 %v4870_v63, %v2570_v52  ;;  %2659 = vmatmul.bf16.gmra.mxu0 %v7236_v43  ;;  %2725 = vmatmul.bf16.gmra.mxu3 %v7236_v43  ;;  %v1763_v33 = vmax.f32 %v8549_v58, %v8548_v31 }
 0x5e7   :  { %4871 = vrsqrt.f32 %v2545_v28  ;;  %2890 = vmatpush.bf16.msra.mxu0 %v8538_v53  ;;  %vm2582_vm13 = vweird.f32 %v2545_v28 }
 0x5e8   :  { %v2575_v21 = vsel %vm2574_vm10, %v4870_v63, %v2571_v10 }
 0x5e9   :  { %v2588_v51 = vmul.f32 %v7183_v55, %v2575_v21 }
 0x5eb   :  { %v2592_v4 = vmul.f32 %v2588_v51, %v7194_v54  ;;  %2891 = vmatpush.bf16.msra.mxu0 %v8539_v29  ;;  %v2612_v19 = vperm.slane %v2588_v51, 0  ;;  %v1760_v54 = vmax.f32 %v8542_v35, %v8541_v7  ;;  %v8560_v7 = vld [vmem:[#allocation71_spill] sm:$0xff]  ;;  %v8561_v35 = vld [vmem:[#allocation73_spill] sm:$0xff] }
 0x5ed   :  { %v4872_v20 = vpop.eup %4871  ;;  %v2600_v15 = vrot.slane %v2592_v4, 7  ;;  %v2618_v3 = vmul.f32 %v2612_v19, %v7137_v61  ;;  %v2619_v42 = vmul.f32 %v2612_v19, %v7142_v41 }
 0x5ee   :  { %v2577_v39 = vmul.f32 %v4872_v20, %v2545_v28  ;;  %vm2583_vm11 = vweird.f32 %v4872_v20 }
 0x5ef   :  { %v2608_v13 = vsub.f32 %v7183_v55, %v2600_v15  ;;  %2892 = vmatpush.bf16.msra.mxu0 %v8540_v1  ;;  %vm2584_vm14 = vmor %vm2582_vm13, %vm2583_vm11  ;;  %v8555_v1 = vld [vmem:[#allocation60_spill] sm:$0xff] }
 0x5f0   :  { %v2578_v56 = vmul.f32 %v4872_v20, %v2577_v39  ;;  %v8553_v39 = vld [vmem:[#allocation56_spill] sm:$0xff] }
 0x5f1   :  { %v2624_v0 = vperm.slane %v2608_v13, 1  ;;  %v8554_v13 = vld [vmem:[#allocation58_spill] sm:$0xff] }
 0x5f2   :  { %v2579_v2 = vmul.f32 0.5, %v2578_v56  ;;  %v8556_v56 = vld [vmem:[#allocation62_spill] sm:$0xff] }
 0x5f3   :  { %v2630_v32 = vadd.f32 %v2624_v0, %v2618_v3  ;;  %v2631_v63 = vadd.f32 %v2624_v0, %v2619_v42  ;;  %2893 = vmatpush.bf16.msra.mxu0 %v8545_v36  ;;  %v4992_v3 = vld [vmem:[#allocation5 + $0x8] sm:$0xff]  ;;  %v8557_v42 = vld [vmem:[#allocation64_spill] sm:$0xff]  ;;  %v8558_v0 = vld [vmem:[#allocation66_spill] sm:$0xff] }
 0x5f4   :  { %v2580_v34 = vsub.f32 1.5, %v2579_v2  ;;  %v8559_v2 = vld [vmem:[#allocation68_spill] sm:$0xff]  ;;  %v8566_v36 = vld [vmem:[#allocation83_spill] sm:$0xff] }
 0x5f5   :  { %v2644_v12 = vpack.c.bf16 %v2631_v63, %v2630_v32  ;;  %v7257_v6 = vmax.f32 %v1760_v54, %v2630_v32  ;;  %v7259_v61 = vmax.f32 %v1761_v24, %v2631_v63  ;;  %v4993_v54 = vld [vmem:[#allocation5 + $0x10] sm:$0xff]  ;;  %v8564_v24 = vld [vmem:[#allocation79_spill] sm:$0xff]  ;;  %v8565_v32 = vld [vmem:[#allocation81_spill] sm:$0xff] }
 0x5f6   :  { %v2581_v41 = vmul.f32 %v4872_v20, %v2580_v34  ;;  %v4994_v63 = vld [vmem:[#allocation5 + $0x18] sm:$0xff] }
 0x5f7   :  { %2664 = vmatmul.bf16.gmra.mxu0 %v2644_v12  ;;  %2730 = vmatmul.bf16.gmra.mxu3 %v2644_v12  ;;  %v8567_v34 = vld [vmem:[#allocation85_spill] sm:$0xff] }
 0x5f8   :  { %v2585_v8 = vsel %vm2584_vm14, %v4872_v20, %v2581_v41 }
 0x5f9   :  { %v2589_v16 = vmul.f32 %v7183_v55, %v2585_v8  ;;  %v8568_v8 = vld [vmem:[#allocation69_spill] sm:$0xff] }
 0x5fb   :  { %v2593_v44 = vmul.f32 %v2589_v16, %v7223_v57  ;;  %v2613_v22 = vperm.slane %v2589_v16, 0 }
 0x5fd   :  { %v2601_v46 = vrot.slane %v2593_v44, 7  ;;  %v2620_v59 = vmul.f32 %v2613_v22, %v7186_v47  ;;  %v2621_v9 = vmul.f32 %v2613_v22, %v7190_v5 }
 0x5ff   :  { %v2609_v60 = vsub.f32 %v7183_v55, %v2601_v46 }
 0x601   :  { %v2625_v38 = vperm.slane %v2609_v60, 1 }
 0x603   :  { %v2632_v11 = vadd.f32 %v2625_v38, %v2620_v59  ;;  %v2633_v49 = vadd.f32 %v2625_v38, %v2621_v9 }
 0x605   :  { %v2645_v52 = vpack.c.bf16 %v2633_v49, %v2632_v11  ;;  %v7270_v28 = vmax.f32 %v1762_v37, %v2632_v11  ;;  %v7272_v57 = vmax.f32 %v1763_v33, %v2633_v49 }
 0x607   :  { %8550 = vst [vmem:[#allocation16_spill] sm:$0xff] %v7270_v28  ;;  %2669 = vmatmul.bf16.vlgmr.msrb.gmra.mxu1 %v2645_v52  ;;  %2735 = vmatmul.bf16.gmra.mxu3 %v2645_v52 }
 0x608   :  { %8551 = vst [vmem:[#allocation40_spill] sm:$0xff] %v7272_v57  ;;  %2778 = vmatmul.bf16.vlgmr.msrb.gmra.mxu0 %v7214_v45 }
 0x617   :  { %2836 = vmatmul.bf16.vlgmr.msra.gmra.mxu3 %v7214_v45 }
 0x618   :  { %2783 = vmatmul.bf16.gmra.mxu0 %v7236_v43 }
 0x627   :  { %2841 = vmatmul.bf16.gmra.mxu3 %v7236_v43 }
 0x628   :  { %2788 = vmatmul.bf16.gmra.mxu0 %v2644_v12 }
 0x637   :  { %2846 = vmatmul.bf16.gmra.mxu3 %v2644_v12 }
 0x638   :  { %2793 = vmatmul.bf16.gmra.mxu0 %v2645_v52 }
 0x647   :  { %2851 = vmatmul.bf16.gmra.mxu3 %v2645_v52 }
 0x648   :  { %2894 = vmatmul.bf16.vlgmr.msra.gmra.mxu0 %v7214_v45  ;;  %v8552_v45 = vld [vmem:[#allocation54_spill] sm:$0xff] }
 0x653   :  { %v2655_v55 = vpop.f32.mrf.mxu0 }
 0x658   :  { %2899 = vmatmul.bf16.gmra.mxu0 %v7236_v43  ;;  %v4991_v43 = vld [vmem:[#allocation5] sm:$0xff] }
 0x65b   :  { %v2657_v47 = vpop.f32.mrf.mxu0 }
 0x65c   :  { %v2675_v19 = vpack.c.bf16 %v2657_v47, %v2655_v55 }
 0x663   :  { %v2660_v5 = vpop.f32.mrf.mxu0 }
 0x668   :  { %2904 = vmatmul.bf16.gmra.mxu0 %v2644_v12 }
 0x66b   :  { %v2662_v10 = vpop.f32.mrf.mxu0 }
 0x66c   :  { %v2676_v15 = vpack.c.bf16 %v2662_v10, %v2660_v5  ;;  %v2721_v5 = vpop.f32.mrf.mxu3 }
 0x674   :  { %v2665_v53 = vpop.f32.mrf.mxu0 }
 0x678   :  { %2909 = vmatmul.bf16.gmra.mxu0 %v2645_v52 }
 0x67c   :  { %v2667_v29 = vpop.f32.mrf.mxu0 }
 0x67d   :  { %v2677_v20 = vpack.c.bf16 %v2667_v29, %v2665_v53  ;;  %v2723_v53 = vpop.f32.mrf.mxu3 }
 0x684   :  { %v2670_v21 = vpop.f32.mrf.mxu1 }
 0x685   :  { %v2779_v47 = vpop.f32.mrf.mxu0 }
 0x68c   :  { %v2672_v51 = vpop.f32.mrf.mxu1 }
 0x68d   :  { %v2678_v4 = vpack.c.bf16 %v2672_v51, %v2670_v21  ;;  %v2781_v10 = vpop.f32.mrf.mxu0  ;;  %v2726_v51 = vpop.f32.mrf.mxu3 }
 0x68f   :  { %2683 = vmatpush.bf16.msra.mxu1 %v2678_v4 }
 0x693   :  { %2684 = vmatpush.bf16.msra.mxu1 %v2677_v20 }
 0x695   :  { %v2784_v21 = vpop.f32.mrf.mxu0 }
 0x697   :  { %2685 = vmatpush.bf16.msra.mxu1 %v2676_v15 }
 0x69b   :  { %2686 = vmatpush.bf16.msra.mxu1 %v2675_v19  ;;  %v2728_v19 = vpop.f32.mrf.mxu3 }
 0x69d   :  { %v2786_v4 = vpop.f32.mrf.mxu0 }
 0x69e   :  { %4481 = vmatmul.msk.bf16.vlgmr.msra.gmra.mxu1 %vm522_vm12, %v4991_v43 }
 0x69f   :  { %2799 = vmatpush.bf16.msrb.mxu1 %v8552_v45 }
 0x6a3   :  { %2800 = vmatpush.bf16.msrb.mxu1 %v8553_v39 }
 0x6a7   :  { %2801 = vmatpush.bf16.msrb.mxu1 %v8554_v13 }
 0x6ab   :  { %2802 = vmatpush.bf16.msrb.mxu1 %v8555_v1  ;;  %v2789_v1 = vpop.f32.mrf.mxu0 }
 0x6ae   :  { %4482 = vmatmul.msk.bf16.gmra.mxu1 %vm522_vm12, %v4992_v3 }
 0x6af   :  { %2803 = vmatpush.bf16.msrb.mxu1 %v8556_v56 }
 0x6b3   :  { %2804 = vmatpush.bf16.msrb.mxu1 %v8557_v42 }
 0x6b7   :  { %2805 = vmatpush.bf16.msrb.mxu1 %v8558_v0 }
 0x6bb   :  { %2806 = vmatpush.bf16.msrb.mxu1 %v8559_v2 }
 0x6be   :  { %4483 = vmatmul.msk.bf16.gmra.mxu1 %vm522_vm12, %v4993_v54 }
 0x6bf   :  { %2915 = vmatpush.bf16.msra.mxu1 %v8560_v7  ;;  %v2731_v7 = vpop.f32.mrf.mxu3 }
 0x6c3   :  { %2916 = vmatpush.bf16.msra.mxu1 %v8561_v35 }
 0x6c7   :  { %2917 = vmatpush.bf16.msra.mxu1 %v8562_v25 }
 0x6cb   :  { %2918 = vmatpush.bf16.msra.mxu1 %v8563_v62 }
 0x6ce   :  { %4484 = vmatmul.msk.bf16.gmra.mxu1 %vm522_vm12, %v4994_v63 }
 0x6cf   :  { %2919 = vmatpush.bf16.msra.mxu1 %v8564_v24 }
 0x6d3   :  { %2920 = vmatpush.bf16.msra.mxu1 %v8565_v32  ;;  %v2791_v32 = vpop.f32.mrf.mxu0 }
 0x6d7   :  { %2921 = vmatpush.bf16.msra.mxu1 %v8566_v36 }
 0x6db   :  { %2922 = vmatpush.bf16.msra.mxu1 %v8567_v34 }
 0x71b   :  { %v2688_v12 = vpop.f32.mrf.mxu1 }
 0x71c   :  { %v7301_v16 = vadd.f32 %v2688_v12, %v8568_v8 }
 0x723   :  { %v2690_v41 = vpop.f32.mrf.mxu1 }
 0x724   :  { %v7304_v44 = vadd.f32 %v2690_v41, %v8568_v8 }
 0x726   :  { %v2708_v46 = vpack.c.bf16 %v7304_v44, %v7301_v16 }
 0x728   :  { %2749 = vmatmul.bf16.vlgmr.msra.gmra.mxu2 %v2708_v46  ;;  %2807 = vmatmul.bf16.vlgmr.msrb.gmra.mxu1 %v2708_v46 }
 0x72b   :  { %v2693_v22 = vpop.f32.mrf.mxu1 }
 0x72c   :  { %v7309_v59 = vadd.f32 %v2693_v22, %v8568_v8 }
 0x733   :  { %v2695_v60 = vpop.f32.mrf.mxu1 }
 0x734   :  { %v7312_v9 = vadd.f32 %v2695_v60, %v8568_v8  ;;  %v7340_v60 = vpop.f32.mrf.mxu3 }
 0x736   :  { %v2709_v38 = vpack.c.bf16 %v7312_v9, %v7309_v59 }
 0x738   :  { %2754 = vmatmul.bf16.gmra.mxu2 %v2709_v38  ;;  %2812 = vmatmul.bf16.gmra.mxu1 %v2709_v38 }
 0x73b   :  { %v2698_v30 = vpop.f32.mrf.mxu1 }
 0x73c   :  { %v7317_v37 = vadd.f32 %v2698_v30, %v8568_v8 }
 0x743   :  { %v2700_v27 = vpop.f32.mrf.mxu1 }
 0x744   :  { %v7320_v31 = vadd.f32 %v2700_v27, %v8568_v8 }
 0x746   :  { %v2710_v58 = vpack.c.bf16 %v7320_v31, %v7317_v37 }
 0x748   :  { %2759 = vmatmul.bf16.gmra.mxu2 %v2710_v58  ;;  %2817 = vmatmul.bf16.gmra.mxu1 %v2710_v58 }
 0x74b   :  { %v2703_v33 = vpop.f32.mrf.mxu1 }
 0x74c   :  { %v7325_v49 = vadd.f32 %v2703_v33, %v8568_v8 }
 0x753   :  { %v2705_v11 = vpop.f32.mrf.mxu1 }
 0x754   :  { %v7328_v52 = vadd.f32 %v2705_v11, %v8568_v8 }
 0x756   :  { %v2711_v55 = vpack.c.bf16 %v7328_v52, %v7325_v49 }
 0x758   :  { %2764 = vmatmul.bf16.gmra.mxu2 %v2711_v55  ;;  %2822 = vmatmul.bf16.gmra.mxu1 %v2711_v55 }
 0x768   :  { %2865 = vmatmul.bf16.vlgmr.msrb.gmra.mxu2 %v2708_v46  ;;  %2923 = vmatmul.bf16.vlgmr.msra.gmra.mxu1 %v2708_v46 }
 0x778   :  { %2870 = vmatmul.bf16.gmra.mxu2 %v2709_v38  ;;  %2928 = vmatmul.bf16.gmra.mxu1 %v2709_v38 }
 0x788   :  { %2875 = vmatmul.bf16.gmra.mxu2 %v2710_v58  ;;  %2933 = vmatmul.bf16.gmra.mxu1 %v2710_v58 }
 0x798   :  { %2880 = vmatmul.bf16.gmra.mxu2 %v2711_v55  ;;  %2938 = vmatmul.bf16.gmra.mxu1 %v2711_v55  ;;  %v7347_v55 = vpop.f32.mrf.mxu0 }
 0x7a5   :  { %v2808_v29 = vpop.f32.mrf.mxu1 }
 0x7a6   :  { %v2809_v20 = vadd.f32 %v2808_v29, %v2779_v47 }
 0x7a8   :  { %v3104_v15 = vadd.f32 %v2809_v20, %v8467_v26 }
 0x7aa   :  { %v4493_v43 = vmul.f32 -1.442695, %v3104_v15 }
 0x7ab   :  { %v2750_v45 = vpop.f32.mrf.mxu2 }
 0x7ac   :  { %v2751_v39 = vadd.f32 %v2750_v45, %v2721_v5  ;;  %4873 = vpow2.f32 %v4493_v43  ;;  %v7358_v45 = vpop.f32.mrf.mxu3 }
 0x7ad   :  { %v2810_v13 = vpop.f32.mrf.mxu1 }
 0x7ae   :  { %v2811_v56 = vadd.f32 %v2810_v13, %v2781_v10  ;;  %v2944_v3 = vadd.f32 %v2751_v39, %v5675_v17 }
 0x7b0   :  { %v3105_v42 = vadd.f32 %v2811_v56, %v8467_v26  ;;  %v4485_v35 = vmul.f32 -1.442695, %v2944_v3 }
 0x7b2   :  { %v4874_v25 = vpop.eup %4873  ;;  %v4494_v62 = vmul.f32 -1.442695, %v3105_v42  ;;  %4875 = vpow2.f32 %v4485_v35 }
 0x7b3   :  { %v2752_v0 = vpop.f32.mrf.mxu2  ;;  %v7336_v63 = vadd.f32 1.0, %v4874_v25 }
 0x7b4   :  { %v2753_v2 = vadd.f32 %v2752_v0, %v2723_v53  ;;  %4877 = vpow2.f32 %v4494_v62 }
 0x7b5   :  { %v2813_v54 = vpop.f32.mrf.mxu1  ;;  %4879 = vrcp.f32 %v7336_v63  ;;  %vm3149_vm15 = vweird.f32 %v7336_v63 }
 0x7b6   :  { %v2945_v24 = vadd.f32 %v2753_v2, %v5675_v17  ;;  %v2814_v36 = vadd.f32 %v2813_v54, %v2784_v21 }
 0x7b8   :  { %v4486_v34 = vmul.f32 -1.442695, %v2945_v24  ;;  %v3106_v41 = vadd.f32 %v2814_v36, %v8467_v26  ;;  %v4876_v22 = vpop.eup %4875 }
 0x7b9   :  { %v7343_v58 = vadd.f32 1.0, %v4876_v22 }
 0x7ba   :  { %4881 = vpow2.f32 %v4486_v34  ;;  %v4878_v38 = vpop.eup %4877  ;;  %v4495_v30 = vmul.f32 -1.442695, %v3106_v41  ;;  %v3153_v41 = vand.u32 2147483647, %v7336_v63 }
 0x7bb   :  { %v2755_v12 = vpop.f32.mrf.mxu2  ;;  %v7345_v11 = vpop.eup %4879  ;;  %v7349_v5 = vadd.f32 1.0, %v4878_v38  ;;  %vm2989_vm2 = vweird.f32 %v7343_v58 }
 0x7bc   :  { %v2756_v8 = vadd.f32 %v2755_v12, %v2726_v51  ;;  %4883 = vpow2.f32 %v4495_v30  ;;  %v3145_v29 = vmul.f32 %v7345_v11, %v7336_v63  ;;  %v3155_v12 = vand.u32 2147483648, %v7336_v63 }
 0x7bd   :  { %v2815_v46 = vpop.f32.mrf.mxu1  ;;  %4885 = vrcp.f32 %v7343_v58  ;;  %vm3150_vm12 = vweird.f32 %v7345_v11  ;;  %vm7391_vm0 = vcmp.eq.f32.partialorder %v3153_v41, 8.507059e+37  ;;  %vm3164_vm3 = vweird.f32 %v7349_v5 }
 0x7be   :  { %v2946_v27 = vadd.f32 %v2756_v8, %v5675_v17  ;;  %v2816_v33 = vadd.f32 %v2815_v46, %v2786_v4  ;;  %4887 = vrcp.f32 %v7349_v5  ;;  %v3146_v39 = vsub.f32 1.0, %v3145_v29  ;;  %vm7397_vm1 = vmor %vm3149_vm15, %vm3150_vm12 }
 0x7c0   :  { %v4882_v10 = vpop.eup %4881  ;;  %v4487_v53 = vmul.f32 -1.442695, %v2946_v27  ;;  %v3107_v20 = vadd.f32 %v2816_v33, %v8467_v26  ;;  %v3147_v54 = vmul.f32 %v7345_v11, %v3146_v39  ;;  %v7386_v27 = vpop.f32.mrf.mxu3 }
 0x7c1   :  { %v7356_v15 = vadd.f32 1.0, %v4882_v10 }
 0x7c2   :  { %4889 = vpow2.f32 %v4487_v53  ;;  %v4884_v13 = vpop.eup %4883  ;;  %v3148_v30 = vadd.f32 %v7345_v11, %v3147_v54  ;;  %v3156_v53 = vor.u32 1.1754944e-38, %v3155_v12 }
 0x7c3   :  { %v2757_v47 = vpop.f32.mrf.mxu2  ;;  %v7362_v42 = vpop.eup %4885  ;;  %4891 = vrcp.f32 %v7356_v15  ;;  %v7370_v25 = vadd.f32 1.0, %v4884_v13  ;;  %vm3004_vm7 = vweird.f32 %v7356_v15 }
 0x7c4   :  { %v2758_v21 = vadd.f32 %v2757_v47, %v2728_v19  ;;  %v4496_v19 = vmul.f32 -1.442695, %v3107_v20  ;;  %v7367_v35 = vpop.eup %4887  ;;  %v2985_v34 = vmul.f32 %v7362_v42, %v7343_v58  ;;  %vm2990_vm4 = vweird.f32 %v7362_v42 }
 0x7c5   :  { %v2818_v51 = vpop.f32.mrf.mxu1  ;;  %v3160_v8 = vmul.f32 %v7367_v35, %v7349_v5  ;;  %vm3165_vm6 = vweird.f32 %v7367_v35  ;;  %vm7465_vm9 = vmor %vm2989_vm2, %vm2990_vm4  ;;  %vm3179_vm12 = vweird.f32 %v7370_v25 }
 0x7c6   :  { %v2819_v4 = vadd.f32 %v2818_v51, %v2789_v1  ;;  %v2947_v43 = vadd.f32 %v2758_v21, %v5675_v17  ;;  %v7365_v1 = vpop.f32.mrf.mxu0  ;;  %4893 = vpow2.f32 %v4496_v19  ;;  %v2986_v47 = vsub.f32 1.0, %v2985_v34  ;;  %vm7484_vm10 = vmor %vm3164_vm3, %vm3165_vm6 }
 0x7c7   :  { %v2995_v21 = vand.u32 2147483648, %v7343_v58  ;;  %v3161_v63 = vsub.f32 1.0, %v3160_v8 }
 0x7c8   :  { %v3108_v56 = vadd.f32 %v2819_v4, %v8467_v26  ;;  %v4488_v0 = vmul.f32 -1.442695, %v2947_v43  ;;  %v4890_v24 = vpop.eup %4889  ;;  %v2993_v43 = vand.u32 2147483647, %v7343_v58  ;;  %v2987_v54 = vmul.f32 %v7362_v42, %v2986_v47 }
 0x7c9   :  { %v7379_v22 = vpop.eup %4891  ;;  %v3162_v12 = vmul.f32 %v7367_v35, %v3161_v63  ;;  %v3008_v63 = vand.u32 2147483647, %v7356_v15 }
 0x7ca   :  { %v4497_v36 = vmul.f32 -1.442695, %v3108_v56  ;;  %4895 = vpow2.f32 %v4488_v0  ;;  %v3000_v39 = vmul.f32 %v7379_v22, %v7356_v15  ;;  %v3152_v56 = vsel %vm7397_vm1, %v7345_v11, %v3148_v30 }
 0x7cb   :  { %v2760_v3 = vpop.f32.mrf.mxu2  ;;  %4897 = vrcp.f32 %v7370_v25  ;;  %v2996_v11 = vor.u32 1.1754944e-38, %v2995_v21  ;;  %vm7425_vm5 = vcmp.eq.f32.partialorder %v2993_v43, 8.507059e+37  ;;  %v2988_v21 = vadd.f32 %v7362_v42, %v2987_v54 }
 0x7cc   :  { %v2761_v62 = vadd.f32 %v2760_v3, %v2731_v7  ;;  %v7382_v7 = vadd.f32 1.0, %v4890_v24  ;;  %4899 = vpow2.f32 %v4497_v36  ;;  %v4894_v10 = vpop.eup %4893  ;;  %vm7490_vm11 = vcmp.eq.f32.partialorder %v3008_v63, 8.507059e+37 }
 0x7cd   :  { %v2820_v2 = vpop.f32.mrf.mxu1  ;;  %vm3005_vm14 = vweird.f32 %v7379_v22 }
 0x7ce   :  { %v2821_v46 = vadd.f32 %v2820_v2, %v2791_v32  ;;  %v2948_v38 = vadd.f32 %v2761_v62, %v5675_v17  ;;  %v3170_v32 = vand.u32 2147483648, %v7349_v5  ;;  %4901 = vrcp.f32 %v7382_v7  ;;  %v7411_v0 = vpop.f32.mrf.mxu0  ;;  %vm7524_vm15 = vmor %vm3004_vm7, %vm3005_vm14 }
 0x7cf   :  { %v7414_v2 = vadd.f32 1.0, %v4894_v10  ;;  %v3168_v62 = vand.u32 2147483647, %v7349_v5 }
 0x7d0   :  { %v3109_v20 = vadd.f32 %v2821_v46, %v8467_v26  ;;  %v4489_v19 = vmul.f32 -1.442695, %v2948_v38  ;;  %v4896_v3 = vpop.eup %4895  ;;  %v7420_v36 = vor.u32 1.1754944e-38, %v3170_v32  ;;  %v7431_v46 = vsel %vm7391_vm0, %v3156_v53, %v3152_v56 }
 0x7d1   :  { %v7418_v24 = vpop.eup %4897  ;;  %v3001_v38 = vsub.f32 1.0, %v3000_v39  ;;  %v7433_v30 = vadd.f32 1.0, %v4896_v3  ;;  %vm7441_vm8 = vcmp.eq.f32.partialorder %v3168_v62, 8.507059e+37  ;;  %v7471_v54 = vmul.f32 %v7431_v46, %v7301_v16 }
 0x7d2   :  { %v4900_v34 = vpop.eup %4899  ;;  %v4498_v41 = vmul.f32 -1.442695, %v3109_v20  ;;  %4903 = vpow2.f32 %v4489_v19  ;;  %v7454_v20 = vpop.f32.mrf.mxu3  ;;  %v3163_v19 = vadd.f32 %v7367_v35, %v3162_v12  ;;  %v3200_v62 = vand.u32 2147483648, %v7414_v2 }
 0x7d3   :  { %v2762_v33 = vpop.f32.mrf.mxu2  ;;  %4905 = vrcp.f32 %v7414_v2  ;;  %v7451_v29 = vadd.f32 1.0, %v4900_v34  ;;  %v3002_v39 = vmul.f32 %v7379_v22, %v3001_v38  ;;  %v3010_v34 = vand.u32 2147483648, %v7356_v15 }
 0x7d4   :  { %v2763_v47 = vadd.f32 %v2762_v33, %v7340_v60  ;;  %v7445_v51 = vpop.eup %4901  ;;  %v3175_v60 = vmul.f32 %v7418_v24, %v7370_v25  ;;  %4907 = vpow2.f32 %v4498_v41  ;;  %vm3180_vm13 = vweird.f32 %v7418_v24 }
 0x7d5   :  { %v2823_v4 = vpop.f32.mrf.mxu1  ;;  %4909 = vrcp.f32 %v7433_v30  ;;  %v3015_v12 = vmul.f32 %v7445_v51, %v7382_v7  ;;  %v3003_v5 = vadd.f32 %v7379_v22, %v3002_v39  ;;  %v7510_v3 = vor.u32 1.1754944e-38, %v3200_v62  ;;  %vm7583_vm3 = vmor %vm3179_vm12, %vm3180_vm13 }
 0x7d6   :  { %v2824_v13 = vadd.f32 %v2823_v4, %v7347_v55  ;;  %v3185_v55 = vand.u32 2147483648, %v7370_v25  ;;  %v3176_v16 = vsub.f32 1.0, %v3175_v60  ;;  %4911 = vrcp.f32 %v7451_v29 }
 0x7d7   :  { %v3011_v57 = vor.u32 1.1754944e-38, %v3010_v34  ;;  %v3016_v28 = vsub.f32 1.0, %v3015_v12  ;;  %vm3019_vm0 = vweird.f32 %v7382_v7  ;;  %v3023_v15 = vand.u32 2147483647, %v7382_v7 }
 0x7d8   :  { %v3110_v10 = vadd.f32 %v2824_v13, %v8467_v26  ;;  %v7449_v33 = vor.u32 1.1754944e-38, %v3185_v55  ;;  %v2949_v13 = vadd.f32 %v2763_v47, %v5675_v17  ;;  %v2992_v55 = vsel %vm7465_vm9, %v7362_v42, %v2988_v21  ;;  %v4904_v58 = vpop.eup %4903 }
 0x7d9   :  { %v7494_v47 = vpop.eup %4905  ;;  %v3167_v21 = vsel %vm7484_vm10, %v7367_v35, %v3163_v19  ;;  %v7512_v39 = vadd.f32 1.0, %v4904_v58  ;;  %v3177_v35 = vmul.f32 %v7418_v24, %v3176_v16  ;;  %v3215_v19 = vand.u32 2147483648, %v7451_v29 }
 0x7da   :  { %v4499_v56 = vmul.f32 -1.442695, %v3110_v10  ;;  %v7496_v10 = vpop.f32.mrf.mxu0  ;;  %v4490_v60 = vmul.f32 -1.442695, %v2949_v13  ;;  %v4908_v63 = vpop.eup %4907  ;;  %v3025_v62 = vand.u32 2147483648, %v7382_v7  ;;  %v3017_v58 = vmul.f32 %v7445_v51, %v3016_v28 }
 0x7db   :  { %v2765_v32 = vpop.f32.mrf.mxu2  ;;  %v7514_v41 = vpop.eup %4909  ;;  %v7542_v34 = vadd.f32 1.0, %v4908_v63  ;;  %v3178_v63 = vadd.f32 %v7418_v24, %v3177_v35  ;;  %vm3020_vm1 = vweird.f32 %v7445_v51  ;;  %vm7575_vm2 = vcmp.eq.f32.partialorder %v3023_v15, 8.507059e+37 }
 0x7dc   :  { %v2766_v38 = vadd.f32 %v2765_v32, %v7358_v45  ;;  %4913 = vpow2.f32 %v4499_v56  ;;  %v7507_v32 = vsel %vm7425_vm5, %v2996_v11, %v2992_v55  ;;  %v3007_v56 = vsel %vm7524_vm15, %v7379_v22, %v3003_v5  ;;  %v7540_v55 = vpop.eup %4911  ;;  %v7546_v12 = vpop.f32.mrf.mxu3  ;;  %vm7606_vm6 = vmor %vm3019_vm0, %vm3020_vm1 }
 0x7dd   :  { %v2825_v4 = vpop.f32.mrf.mxu1  ;;  %4915 = vpow2.f32 %v4490_v60  ;;  %v3030_v16 = vmul.f32 %v7514_v41, %v7433_v30  ;;  %v7555_v60 = vsel %vm7490_vm11, %v3011_v57, %v3007_v56  ;;  %v3018_v8 = vadd.f32 %v7445_v51, %v3017_v58 }
 0x7de   :  { %v2826_v45 = vadd.f32 %v2825_v4, %v7365_v1  ;;  %v3190_v1 = vmul.f32 %v7494_v47, %v7414_v2  ;;  %v2950_v11 = vadd.f32 %v2766_v38, %v5675_v17  ;;  %v7531_v4 = vsel %vm7441_vm8, %v7420_v36, %v3167_v21 }
 0x7df   :  { %4917 = vrcp.f32 %v7512_v39  ;;  %vm3195_vm4 = vweird.f32 %v7494_v47  ;;  %v3183_v15 = vand.u32 2147483647, %v7370_v25  ;;  %v3230_v58 = vand.u32 2147483648, %v7542_v34 }
 0x7e0   :  { %v3111_v36 = vadd.f32 %v2826_v45, %v8467_v26  ;;  %v3191_v5 = vsub.f32 1.0, %v3190_v1  ;;  %v4491_v21 = vmul.f32 -1.442695, %v2950_v11  ;;  %v7559_v26 = vmul.f32 %v7531_v4, %v7304_v44 }
 0x7e1   :  { %v7563_v45 = vor.u32 1.1754944e-38, %v3215_v19  ;;  %4919 = vrcp.f32 %v7542_v34  ;;  %v3182_v22 = vsel %vm7583_vm3, %v7418_v24, %v3178_v63  ;;  %vm3194_vm5 = vweird.f32 %v7414_v2 }
 0x7e2   :  { %v4914_v38 = vpop.eup %4913  ;;  %v4500_v1 = vmul.f32 -1.442695, %v3111_v36  ;;  %v7570_v57 = vpop.f32.mrf.mxu0  ;;  %4921 = vpow2.f32 %v4491_v21  ;;  %v3022_v24 = vsel %vm7606_vm6, %v7445_v51, %v3018_v8  ;;  %vm3184_vm7 = vcmp.eq.f32.partialorder %v3183_v15, 8.507059e+37  ;;  %vm7656_vm11 = vmor %vm3194_vm5, %vm3195_vm4 }
 0x7e3   :  { %v2767_v43 = vpop.f32.mrf.mxu2  ;;  %v7572_v44 = vadd.f32 1.0, %v4914_v38  ;;  %vm3034_vm8 = vweird.f32 %v7433_v30  ;;  %vm3035_vm9 = vweird.f32 %v7514_v41  ;;  %vm3210_vm10 = vweird.f32 %v7540_v55 }
 0x7e4   :  { %v2768_v28 = vadd.f32 %v2767_v43, %v7386_v27  ;;  %v3031_v27 = vsub.f32 1.0, %v3030_v16  ;;  %v4916_v43 = vpop.eup %4915  ;;  %4923 = vpow2.f32 %v4500_v1  ;;  %v2842_v63 = vpop.f32.mrf.mxu3  ;;  %v7621_v1 = vor.u32 1.1754944e-38, %v3230_v58  ;;  %vm7674_vm14 = vmor %vm3034_vm8, %vm3035_vm9 }
 0x7e5   :  { %v2924_v13 = vpop.f32.mrf.mxu1  ;;  %v7591_v36 = vpop.eup %4917  ;;  %v7610_v21 = vadd.f32 1.0, %v4916_v43  ;;  %4925 = vrcp.f32 %v7572_v44  ;;  %vm3209_vm13 = vweird.f32 %v7451_v29  ;;  %vm3049_vm0 = vweird.f32 %v7512_v39 }
 0x7e6   :  { %v2925_v53 = vadd.f32 %v2924_v13, %v7411_v0  ;;  %v3205_v0 = vmul.f32 %v7540_v55, %v7451_v29  ;;  %v3192_v13 = vmul.f32 %v7494_v47, %v3191_v5  ;;  %v2951_v16 = vadd.f32 %v2768_v28, %v5675_v17  ;;  %vm7732_vm3 = vmor %vm3209_vm13, %vm3210_vm10 }
 0x7e7   :  { %v3026_v28 = vor.u32 1.1754944e-38, %v3025_v62  ;;  %v3045_v7 = vmul.f32 %v7591_v36, %v7512_v39  ;;  %4927 = vrcp.f32 %v7610_v21  ;;  %vm3050_vm1 = vweird.f32 %v7591_v36 }
 0x7e8   :  { %v3272_v42 = vadd.f32 %v2925_v53, %v5726_v14  ;;  %v3206_v53 = vsub.f32 1.0, %v3205_v0  ;;  %v7617_v0 = vpop.eup %4919  ;;  %v3193_v19 = vadd.f32 %v7494_v47, %v3192_v13  ;;  %vm3064_vm8 = vweird.f32 %v7610_v21 }
 0x7e9   :  { %v4922_v51 = vpop.eup %4921  ;;  %v3027_v62 = vsel %vm7575_vm2, %v3026_v28, %v3022_v24  ;;  %v3220_v43 = vmul.f32 %v7617_v0, %v7542_v34  ;;  %v3198_v24 = vand.u32 2147483647, %v7414_v2  ;;  %vm7722_vm2 = vmor %vm3049_vm0, %vm3050_vm1  ;;  %vm3225_vm4 = vweird.f32 %v7617_v0 }
 0x7ea   :  { %v3280_v5 = vmul.f32 %v3272_v42, %v7507_v32  ;;  %v3032_v32 = vmul.f32 %v7514_v41, %v3031_v27  ;;  %v4492_v42 = vmul.f32 -1.442695, %v2951_v16  ;;  %v3207_v8 = vmul.f32 %v7540_v55, %v3206_v53  ;;  %v2902_v16 = vpop.f32.mrf.mxu0 }
 0x7eb   :  { %v2866_v11 = vpop.f32.mrf.mxu2  ;;  %v3046_v53 = vsub.f32 1.0, %v3045_v7  ;;  %vm3199_vm15 = vcmp.eq.f32.partialorder %v3198_v24, 8.507059e+37  ;;  %v3055_v24 = vand.u32 2147483648, %v7512_v39  ;;  %vm3239_vm1 = vweird.f32 %v7572_v44 }
 0x7ec   :  { %v2867_v56 = vadd.f32 %v2866_v11, %v7454_v20  ;;  %v7624_v11 = vsel %vm3184_vm7, %v7449_v33, %v3182_v22  ;;  %v7636_v33 = vadd.f32 %v7514_v41, %v3032_v32  ;;  %v3038_v22 = vand.u32 2147483647, %v7433_v30 }
 0x7ed   :  { %v2926_v38 = vpop.f32.mrf.mxu1  ;;  %v3208_v32 = vadd.f32 %v7540_v55, %v3207_v8  ;;  %vm3224_vm7 = vweird.f32 %v7542_v34 }
 0x7ee   :  { %v3264_v20 = vadd.f32 %v2867_v56, %v5721_v48  ;;  %v2927_v25 = vadd.f32 %v2926_v38, %v7496_v10  ;;  %v4924_v56 = vpop.eup %4923  ;;  %v3245_v38 = vand.u32 2147483648, %v7572_v44  ;;  %vm7691_vm12 = vcmp.eq.f32.partialorder %v3038_v22, 8.507059e+37  ;;  %vm7819_vm13 = vmor %vm3224_vm7, %vm3225_vm4 }
 0x7ef   :  { %v7641_v58 = vpop.eup %4925  ;;  %v7661_v28 = vadd.f32 1.0, %v4924_v56 }
 0x7f0   :  { %v3288_v10 = vadd.f32 %v3280_v5, %v3264_v20  ;;  %v3273_v27 = vadd.f32 %v2927_v25, %v5726_v14  ;;  %v7645_v5 = vadd.f32 1.0, %v4922_v51  ;;  %v3040_v25 = vand.u32 2147483648, %v7433_v30 }
 0x7f1   :  { %v3235_v7 = vmul.f32 %v7641_v58, %v7572_v44  ;;  %v3197_v51 = vsel %vm7656_vm11, %v7494_v47, %v3193_v19  ;;  %v3037_v30 = vsel %vm7674_vm14, %v7514_v41, %v7636_v33  ;;  %vm3240_vm0 = vweird.f32 %v7641_v58 }
 0x7f2   :  { %4929 = vtanh.f32 %v3288_v10  ;;  %v3281_v17 = vmul.f32 %v3273_v27, %v7555_v60  ;;  %v3221_v10 = vsub.f32 1.0, %v3220_v43  ;;  %v3306_v60 = vsub.f32 1.0, %v7624_v11  ;;  %vm7898_vm7 = vmor %vm3239_vm1, %vm3240_vm0 }
 0x7f3   :  { %v2868_v35 = vpop.f32.mrf.mxu2  ;;  %4931 = vpow2.f32 %v4492_v42  ;;  %v3047_v27 = vmul.f32 %v7591_v36, %v3046_v53  ;;  %v7684_v43 = vor.u32 1.1754944e-38, %v3245_v38  ;;  %v2844_v53 = vpop.f32.mrf.mxu3  ;;  %v7701_v41 = vsel %vm3199_vm15, %v7510_v3, %v3197_v51 }
 0x7f4   :  { %v2869_v15 = vadd.f32 %v2868_v35, %v7546_v12  ;;  %4933 = vrcp.f32 %v7645_v5  ;;  %v7697_v38 = vmul.f32 %v7617_v0, %v3221_v10  ;;  %v3236_v33 = vsub.f32 1.0, %v3235_v7  ;;  %v2905_v51 = vpop.f32.mrf.mxu0 }
 0x7f5   :  { %v2929_v20 = vpop.f32.mrf.mxu1 }
 0x7f6   :  { %v3265_v12 = vadd.f32 %v2869_v15, %v5721_v48  ;;  %v2930_v13 = vadd.f32 %v2929_v20, %v7570_v57  ;;  %v7666_v57 = vmul.f32 %v7624_v11, %v7309_v59  ;;  %v7682_v59 = vpop.eup %4927  ;;  %v3041_v15 = vor.u32 1.1754944e-38, %v3040_v25 }
 0x7f7   :  { %v8597_v25 = vsub.f32 1.0, %v7431_v46  ;;  %v3060_v3 = vmul.f32 %v7682_v59, %v7610_v21  ;;  %vm3065_vm9 = vweird.f32 %v7682_v59 }
 0x7f8   :  { %v3289_v42 = vadd.f32 %v3281_v17, %v3265_v12  ;;  %v4930_v56 = vpop.eup %4929  ;;  %v3274_v47 = vadd.f32 %v2930_v13, %v5726_v14  ;;  %v3048_v17 = vadd.f32 %v7591_v36, %v3047_v27  ;;  %v3042_v46 = vsel %vm7691_vm12, %v3041_v15, %v3037_v30  ;;  %vm7804_vm10 = vmor %vm3064_vm8, %vm3065_vm9 }
 0x7f9   :  { %v4932_v19 = vpop.eup %4931  ;;  %v3312_v12 = vmul.f32 %v4930_v56, %v8597_v25  ;;  %v3307_v27 = vsub.f32 1.0, %v7701_v41  ;;  %v3053_v56 = vand.u32 2147483647, %v7512_v39  ;;  %v3260_v30 = vand.u32 2147483648, %v7661_v28 }
 0x7fa   :  { %4935 = vtanh.f32 %v3289_v42  ;;  %v7712_v10 = vadd.f32 1.0, %v4932_v19  ;;  %v3282_v42 = vmul.f32 %v3274_v47, %v3027_v62  ;;  %v7715_v2 = vpop.eup %4933  ;;  %v3213_v62 = vand.u32 2147483647, %v7451_v29 }
 0x7fb   :  { %4937 = vrcp.f32 %v7661_v28  ;;  %v2871_v20 = vpop.f32.mrf.mxu2  ;;  %v7739_v15 = vmul.f32 %v7701_v41, %v7312_v9  ;;  %v3052_v39 = vsel %vm7722_vm2, %v7591_v36, %v3048_v17  ;;  %v8602_v29 = vsub.f32 1.0, %v7531_v4 }
 0x7fc   :  { %v2872_v22 = vadd.f32 %v2871_v20, %v2842_v63  ;;  %v7747_v20 = vadd.f32 %v7471_v54, %v3312_v12  ;;  %v3212_v25 = vsel %vm7732_vm3, %v7540_v55, %v3208_v32  ;;  %v7755_v9 = vmul.f32 %v7641_v58, %v3236_v33 }
 0x7fd   :  { %v2931_v13 = vpop.f32.mrf.mxu1  ;;  %4939 = vrcp.f32 %v7712_v10  ;;  %v3056_v17 = vor.u32 1.1754944e-38, %v3055_v24  ;;  %vm3054_vm5 = vcmp.eq.f32.partialorder %v3053_v56, 8.507059e+37  ;;  %vm3214_vm6 = vcmp.eq.f32.partialorder %v3213_v62, 8.507059e+37 }
 0x7fe   :  { %v3266_v63 = vadd.f32 %v2872_v22, %v5721_v48  ;;  %v2932_v7 = vadd.f32 %v2931_v13, %v2902_v16  ;;  %v3061_v13 = vsub.f32 1.0, %v3060_v3  ;;  %v7766_v32 = vsel %vm3214_vm6, %v7563_v45, %v3212_v25  ;;  %v2847_v3 = vpop.f32.mrf.mxu3  ;;  %v2907_v25 = vpop.f32.mrf.mxu0 }
 0x7ff   :  { %v3057_v33 = vsel %vm3054_vm5, %v3056_v17, %v3052_v39  ;;  %v3364_v24 = vmul.f32 %v7747_v20, %v7747_v20  ;;  %v3075_v56 = vmul.f32 %v7715_v2, %v7645_v5  ;;  %v3070_v17 = vand.u32 2147483648, %v7610_v21 }
 0x800   :  { %v4936_v47 = vpop.eup %4935  ;;  %v3290_v35 = vadd.f32 %v3282_v42, %v3266_v63  ;;  %v3275_v36 = vadd.f32 %v2932_v7, %v5726_v14  ;;  %v3062_v7 = vmul.f32 %v7682_v59, %v3061_v13  ;;  %vm3079_vm12 = vweird.f32 %v7645_v5 }
 0x801   :  { %v7744_v19 = vpop.eup %4937  ;;  %v3313_v22 = vmul.f32 %v4936_v47, %v8602_v29  ;;  %v3308_v29 = vsub.f32 1.0, %v7766_v32  ;;  %vm3080_vm15 = vweird.f32 %v7715_v2  ;;  %vm3094_vm4 = vweird.f32 %v7712_v10 }
 0x802   :  { %4941 = vtanh.f32 %v3290_v35  ;;  %v3250_v55 = vmul.f32 %v7744_v19, %v7661_v28  ;;  %vm7870_vm2 = vmor %vm3079_vm12, %vm3080_vm15  ;;  %vm3255_vm6 = vweird.f32 %v7744_v19  ;;  %vm3254_vm8 = vweird.f32 %v7661_v28 }
 0x803   :  { %v7761_v54 = vadd.f32 %v7559_v26, %v3313_v22  ;;  %v2873_v4 = vpop.f32.mrf.mxu2  ;;  %v7781_v16 = vpop.eup %4939 }
 0x804   :  { %v2874_v12 = vadd.f32 %v2873_v4, %v2844_v53  ;;  %v3283_v53 = vmul.f32 %v3275_v36, %v3042_v46  ;;  %v3251_v35 = vsub.f32 1.0, %v3250_v55  ;;  %v3068_v46 = vand.u32 2147483647, %v7610_v21 }
 0x805   :  { %v3336_v26 = vadd.f32 %v7761_v54, %v7747_v20  ;;  %v3365_v42 = vmul.f32 %v7761_v54, %v7761_v54  ;;  %v2934_v63 = vpop.f32.mrf.mxu1  ;;  %v3063_v36 = vadd.f32 %v7682_v59, %v3062_v7  ;;  %v3076_v55 = vsub.f32 1.0, %v3075_v56 }
 0x806   :  { %v3267_v8 = vadd.f32 %v2874_v12, %v5721_v48  ;;  %v2935_v45 = vadd.f32 %v2934_v63, %v2905_v51  ;;  %v7790_v12 = vmul.f32 %v7766_v32, %v7317_v37  ;;  %v7796_v7 = vmul.f32 %v7744_v19, %v3251_v35 }
 0x807   :  { %v3337_v62 = vrot.slane %v3336_v26, 4  ;;  %v3372_v47 = vadd.f32 %v3365_v42, %v3364_v24  ;;  %vm7808_vm11 = vcmp.eq.f32.partialorder %v3068_v46, 8.507059e+37  ;;  %v3067_v11 = vsel %vm7804_vm10, %v7682_v59, %v3063_v36 }
 0x808   :  { %v3291_v39 = vadd.f32 %v3283_v53, %v3267_v8  ;;  %v4942_v22 = vpop.eup %4941  ;;  %v3276_v4 = vadd.f32 %v2935_v45, %v5726_v14  ;;  %v3223_v53 = vadd.f32 %v7617_v0, %v7697_v38  ;;  %v3077_v46 = vmul.f32 %v7715_v2, %v3076_v55 }
 0x809   :  { %v3338_v51 = vadd.f32 %v3337_v62, %v3336_v26  ;;  %v3373_v13 = vrot.slane %v3372_v47, 4  ;;  %v3228_v26 = vand.u32 2147483647, %v7542_v34  ;;  %v3314_v8 = vmul.f32 %v4942_v22, %v3306_v60  ;;  %v2849_v22 = vpop.f32.mrf.mxu3 }
 0x80a   :  { %4943 = vtanh.f32 %v3291_v39  ;;  %v3071_v60 = vor.u32 1.1754944e-38, %v3070_v17  ;;  %v3227_v59 = vsel %vm7819_vm13, %v7617_v0, %v3223_v53  ;;  %v2910_v53 = vpop.f32.mrf.mxu0  ;;  %v3085_v56 = vand.u32 2147483648, %v7645_v5  ;;  %vm7953_vm13 = vmor %vm3254_vm8, %vm3255_vm6 }
 0x80b   :  { %v3339_v24 = vrot.slane %v3338_v51, 2  ;;  %v3374_v42 = vadd.f32 %v3373_v13, %v3372_v47  ;;  %v2876_v63 = vpop.f32.mrf.mxu2  ;;  %vm7828_vm14 = vcmp.eq.f32.partialorder %v3228_v26, 8.507059e+37  ;;  %v7833_v17 = vadd.f32 %v7666_v57, %v3314_v8 }
 0x80c   :  { %v2877_v45 = vadd.f32 %v2876_v63, %v2847_v3  ;;  %v3284_v3 = vmul.f32 %v3276_v4, %v3057_v33  ;;  %v3072_v0 = vsel %vm7808_vm11, %v3071_v60, %v3067_v11  ;;  %v3078_v63 = vadd.f32 %v7715_v2, %v3077_v46 }
 0x80d   :  { %v3340_v38 = vadd.f32 %v3339_v24, %v3338_v51  ;;  %v3375_v62 = vrot.slane %v3374_v42, 2  ;;  %v2936_v47 = vpop.f32.mrf.mxu1  ;;  %v3083_v57 = vand.u32 2147483647, %v7645_v5  ;;  %vm3095_vm5 = vweird.f32 %v7781_v16 }
 0x80e   :  { %v3268_v35 = vadd.f32 %v2877_v45, %v5721_v48  ;;  %v2937_v39 = vadd.f32 %v2936_v47, %v2907_v25  ;;  %v3090_v25 = vmul.f32 %v7781_v16, %v7712_v10  ;;  %v3366_v45 = vmul.f32 %v7833_v17, %v7833_v17  ;;  %vm7910_vm9 = vmor %vm3094_vm4, %vm3095_vm5 }
 0x80f   :  { %v3341_v51 = vrot.slane %v3340_v38, 1  ;;  %v3376_v13 = vadd.f32 %v3375_v62, %v3374_v42  ;;  %vm3084_vm3 = vcmp.eq.f32.partialorder %v3083_v57, 8.507059e+37 }
 0x810   :  { %v4944_v34 = vpop.eup %4943  ;;  %v3292_v33 = vadd.f32 %v3284_v3, %v3268_v35  ;;  %v3277_v42 = vadd.f32 %v2937_v39, %v5726_v14  ;;  %v3232_v3 = vsel %vm7828_vm14, %v7621_v1, %v3227_v59  ;;  %v3086_v1 = vor.u32 1.1754944e-38, %v3085_v56 }
 0x811   :  { %v3342_v4 = vadd.f32 %v3341_v51, %v3340_v38  ;;  %v3377_v55 = vrot.slane %v3376_v13, 1  ;;  %v3315_v24 = vmul.f32 %v4944_v34, %v3307_v27  ;;  %v3091_v38 = vsub.f32 1.0, %v3090_v25  ;;  %v2852_v25 = vpop.f32.mrf.mxu3 }
 0x812   :  { %4945 = vtanh.f32 %v3292_v33  ;;  %v3285_v21 = vmul.f32 %v3277_v42, %v3072_v0  ;;  %v3082_v34 = vsel %vm7870_vm2, %v7715_v2, %v3078_v63  ;;  %v7879_v59 = vadd.f32 %v7641_v58, %v7755_v9  ;;  %v2912_v57 = vpop.f32.mrf.mxu0 }
 0x813   :  { %v3378_v26 = vadd.f32 %v3377_v55, %v3376_v13  ;;  %v7847_v8 = vmul.f32 0.0625, %v3342_v4  ;;  %v7850_v41 = vadd.f32 %v7739_v15, %v3315_v24  ;;  %v2878_v27 = vpop.f32.mrf.mxu2  ;;  %v3092_v33 = vmul.f32 %v7781_v16, %v3091_v38 }
 0x814   :  { %v2879_v37 = vadd.f32 %v2878_v27, %v2849_v22  ;;  %v3087_v0 = vsel %vm3084_vm3, %v3086_v1, %v3082_v34  ;;  %v3243_v2 = vand.u32 2147483647, %v7572_v44 }
 0x815   :  { %v3404_v62 = vmul.f32 0.0625, %v3378_v26  ;;  %v3408_v47 = vmul.f32 %v7847_v8, %v7847_v8  ;;  %v3343_v11 = vadd.f32 %v7850_v41, %v7833_v17  ;;  %v3367_v15 = vmul.f32 %v7850_v41, %v7850_v41  ;;  %v2939_v60 = vpop.f32.mrf.mxu1 }
 0x816   :  { %v3269_v35 = vadd.f32 %v2879_v37, %v5721_v48  ;;  %v2940_v39 = vadd.f32 %v2939_v60, %v2910_v53  ;;  %v3093_v37 = vadd.f32 %v7781_v16, %v3092_v33  ;;  %v3098_v60 = vand.u32 2147483647, %v7712_v10  ;;  %v7967_v33 = vld [vmem:[#allocation10 + $0x8] sm:$0xff] }
 0x817   :  { %v3412_v22 = vsub.f32 %v3404_v62, %v3408_v47  ;;  %v3344_v51 = vrot.slane %v3343_v11, 4  ;;  %v3379_v13 = vadd.f32 %v3367_v15, %v3366_v45  ;;  %v3100_v47 = vand.u32 2147483648, %v7712_v10 }
 0x818   :  { %v3293_v36 = vadd.f32 %v3285_v21, %v3269_v35  ;;  %v4946_v5 = vpop.eup %4945  ;;  %v3278_v42 = vadd.f32 %v2940_v39, %v5726_v14  ;;  %v3309_v35 = vsub.f32 1.0, %v3232_v3  ;;  %v3325_v39 = vmul.f32 %v3232_v3, %v7320_v31 }
 0x819   :  { %v3416_v4 = vmax.f32 %v3412_v22, 0.0  ;;  %v3345_v55 = vadd.f32 %v3344_v51, %v3343_v11  ;;  %v3380_v24 = vrot.slane %v3379_v13, 4  ;;  %v3316_v27 = vmul.f32 %v4946_v5, %v3308_v29 }
 0x81a   :  { %4947 = vtanh.f32 %v3293_v36  ;;  %v3286_v29 = vmul.f32 %v3278_v42, %v3087_v0  ;;  %v3097_v31 = vsel %vm7910_vm9, %v7781_v16, %v3093_v37  ;;  %v3101_v36 = vor.u32 1.1754944e-38, %v3100_v47 }
 0x81b   :  { %v7884_v63 = vadd.f32 1e-05, %v3416_v4  ;;  %v3346_v53 = vrot.slane %v3345_v55, 2  ;;  %v3381_v26 = vadd.f32 %v3380_v24, %v3379_v13  ;;  %v2881_v9 = vpop.f32.mrf.mxu2  ;;  %v7915_v51 = vadd.f32 %v7790_v12, %v3316_v27 }
 0x81c   :  { %v2882_v45 = vadd.f32 %v2881_v9, %v2852_v25  ;;  %v3242_v13 = vsel %vm7898_vm7, %v7641_v58, %v7879_v59  ;;  %vm7924_vm10 = vcmp.eq.f32.partialorder %v3243_v2, 8.507059e+37  ;;  %vm3099_vm11 = vcmp.eq.f32.partialorder %v3098_v60, 8.507059e+37  ;;  %v2854_v59 = vpop.f32.mrf.mxu3 }
 0x81d   :  { %4949 = vrsqrt.f32 %v7884_v63  ;;  %v3347_v56 = vadd.f32 %v3346_v53, %v3345_v55  ;;  %v3382_v38 = vrot.slane %v3381_v26, 2  ;;  %v2941_v62 = vpop.f32.mrf.mxu1  ;;  %v3253_v5 = vadd.f32 %v7744_v19, %v7796_v7 }
 0x81e   :  { %v3270_v11 = vadd.f32 %v2882_v45, %v5721_v48  ;;  %v2942_v15 = vadd.f32 %v2941_v62, %v2912_v57  ;;  %v3102_v16 = vsel %vm3099_vm11, %v3101_v36, %v3097_v31  ;;  %v3368_v42 = vmul.f32 %v7915_v51, %v7915_v51  ;;  %v4656_v57 = vld [vmem:[#allocation7 + $0xb8] sm:$0xff]  ;;  %v4654_v31 = vld [vmem:[#allocation7 + $0xa8] sm:$0xff] }
 0x81f   :  { %v3383_v21 = vadd.f32 %v3382_v38, %v3381_v26  ;;  %v3348_v46 = vrot.slane %v3347_v56, 1  ;;  %v3247_v27 = vsel %vm7924_vm10, %v7684_v43, %v3242_v13  ;;  %v3258_v62 = vand.u32 2147483647, %v7661_v28  ;;  %3765 = vmatpush.bf16.msrb.mxu3 %v4656_v57 }
 0x820   :  { %v4948_v22 = vpop.eup %4947  ;;  %v3294_v34 = vadd.f32 %v3286_v29, %v3270_v11  ;;  %v3279_v12 = vadd.f32 %v2942_v15, %v5726_v14  ;;  %v3261_v43 = vor.u32 1.1754944e-38, %v3260_v30  ;;  %vm3430_vm15 = vweird.f32 %v7884_v63 }
 0x821   :  { %v3384_v10 = vrot.slane %v3383_v21, 1  ;;  %v3317_v3 = vmul.f32 %v4948_v22, %v3309_v35  ;;  %v3349_v1 = vadd.f32 %v3348_v46, %v3347_v56  ;;  %v3310_v46 = vsub.f32 1.0, %v3247_v27 }
 0x822   :  { %4951 = vtanh.f32 %v3294_v34  ;;  %v3287_v45 = vmul.f32 %v3279_v12, %v3102_v16  ;;  %vm3259_vm12 = vcmp.eq.f32.partialorder %v3258_v62, 8.507059e+37  ;;  %v4653_v16 = vld [vmem:[#allocation7 + $0xa0] sm:$0xff] }
 0x823   :  { %v4950_v58 = vpop.eup %4949  ;;  %v3385_v25 = vadd.f32 %v3384_v10, %v3383_v21  ;;  %v7931_v4 = vadd.f32 %v3325_v39, %v3317_v3  ;;  %v2883_v55 = vpop.f32.mrf.mxu2  ;;  %v7933_v24 = vmul.f32 0.0625, %v3349_v1  ;;  %v3257_v21 = vsel %vm7953_vm13, %v7744_v19, %v3253_v5 }
 0x824   :  { %v3425_v0 = vmul.f32 %v4950_v58, %v7884_v63  ;;  %v2884_v2 = vadd.f32 %v2883_v55, %v2854_v59  ;;  %vm3431_vm14 = vweird.f32 %v4950_v58  ;;  %v3262_v34 = vsel %vm3259_vm12, %v3261_v43, %v3257_v21 }
 0x825   :  { %v3405_v14 = vmul.f32 0.0625, %v3385_v25  ;;  %v3350_v7 = vadd.f32 %v7931_v4, %v7915_v51  ;;  %v3369_v53 = vmul.f32 %v7931_v4, %v7931_v4  ;;  %v3409_v26 = vmul.f32 %v7933_v24, %v7933_v24  ;;  %vm3432_vm0 = vmor %vm3430_vm15, %vm3431_vm14 }
 0x826   :  { %v3426_v9 = vmul.f32 %v4950_v58, %v3425_v0  ;;  %v3271_v37 = vadd.f32 %v2884_v2, %v5721_v48  ;;  %v4655_v48 = vld [vmem:[#allocation7 + $0xb0] sm:$0xff]  ;;  %v3326_v1 = vmul.f32 %v3247_v27, %v7325_v49  ;;  %v3311_v59 = vsub.f32 1.0, %v3262_v34  ;;  %v4652_v27 = vld [vmem:[#allocation7 + $0x98] sm:$0xff] }
 0x827   :  { %v3351_v56 = vrot.slane %v3350_v7, 4  ;;  %v3386_v38 = vadd.f32 %v3369_v53, %v3368_v42  ;;  %v3413_v47 = vsub.f32 %v3405_v14, %v3409_v26  ;;  %3766 = vmatpush.bf16.msrb.mxu3 %v4655_v48 }
 0x828   :  { %v3427_v29 = vmul.f32 0.5, %v3426_v9  ;;  %v3295_v11 = vadd.f32 %v3287_v45, %v3271_v37  ;;  %v4952_v39 = vpop.eup %4951 }
 0x829   :  { %v3352_v15 = vadd.f32 %v3351_v56, %v3350_v7  ;;  %v3387_v60 = vrot.slane %v3386_v38, 4  ;;  %v3417_v35 = vmax.f32 %v3413_v47, 0.0  ;;  %v3318_v3 = vmul.f32 %v4952_v39, %v3310_v46 }
 0x82a   :  { %v3428_v44 = vsub.f32 1.5, %v3427_v29  ;;  %4953 = vtanh.f32 %v3295_v11 }
 0x82b   :  { %v3353_v22 = vrot.slane %v3352_v15, 2  ;;  %v3388_v13 = vadd.f32 %v3387_v60, %v3386_v38  ;;  %v7962_v28 = vadd.f32 1e-05, %v3417_v35  ;;  %3767 = vmatpush.bf16.msrb.mxu3 %v4654_v31  ;;  %v7971_v42 = vadd.f32 %v3326_v1, %v3318_v3  ;;  %v4650_v31 = vld [vmem:[#allocation7 + $0x88] sm:$0xff] }
 0x82c   :  { %v3429_v30 = vmul.f32 %v4950_v58, %v3428_v44 }
 0x82d   :  { %v3354_v10 = vadd.f32 %v3353_v22, %v3352_v15  ;;  %v3389_v19 = vrot.slane %v3388_v13, 2  ;;  %4955 = vrsqrt.f32 %v7962_v28  ;;  %v3370_v56 = vmul.f32 %v7971_v42, %v7971_v42  ;;  %v4651_v15 = vld [vmem:[#allocation7 + $0x90] sm:$0xff] }
 0x82e   :  { %v3433_v36 = vsel %vm3432_vm0, %v4950_v58, %v3429_v30  ;;  %v3327_v58 = vmul.f32 %v3262_v34, %v7328_v52  ;;  %vm3440_vm2 = vweird.f32 %v7962_v28 }
 0x82f   :  { %v3464_v12 = vmul.f32 %v7967_v33, %v3433_v36  ;;  %v3390_v5 = vadd.f32 %v3389_v19, %v3388_v13  ;;  %v3355_v25 = vrot.slane %v3354_v10, 1  ;;  %3768 = vmatpush.bf16.msrb.mxu3 %v4653_v16 }
 0x830   :  { %v4954_v63 = vpop.eup %4953 }
 0x831   :  { %v3468_v55 = vmul.f32 %v3464_v12, %v7847_v8  ;;  %v3391_v0 = vrot.slane %v3390_v5, 1  ;;  %v3319_v2 = vmul.f32 %v4954_v63, %v3311_v59  ;;  %v3356_v14 = vadd.f32 %v3355_v25, %v3354_v10  ;;  %v4649_v63 = vld [vmem:[#allocation7 + $0x80] sm:$0xff] }
 0x832   :  { %v3488_v53 = vperm.slane %v3464_v12, 0 }
 0x833   :  { %v4956_v49 = vpop.eup %4955  ;;  %v3476_v7 = vrot.slane %v3468_v55, 7  ;;  %v3392_v26 = vadd.f32 %v3391_v0, %v3390_v5  ;;  %v7974_v9 = vadd.f32 %v3327_v58, %v3319_v2  ;;  %v7977_v37 = vmul.f32 0.0625, %v3356_v14  ;;  %3769 = vmatpush.bf16.msrb.mxu3 %v4652_v27 }
 0x834   :  { %v3435_v45 = vmul.f32 %v4956_v49, %v7962_v28  ;;  %v3492_v32 = vmul.f32 %v3488_v53, %v7747_v20  ;;  %v3493_v43 = vmul.f32 %v3488_v53, %v7761_v54  ;;  %vm3441_vm1 = vweird.f32 %v4956_v49 }
 0x835   :  { %v3484_v8 = vsub.f32 %v7967_v33, %v3476_v7  ;;  %v3406_v57 = vmul.f32 0.0625, %v3392_v26  ;;  %v3357_v52 = vadd.f32 %v7974_v9, %v7971_v42  ;;  %v3371_v38 = vmul.f32 %v7974_v9, %v7974_v9  ;;  %vm3442_vm3 = vmor %vm3440_vm2, %vm3441_vm1 }
 0x836   :  { %v3436_v62 = vmul.f32 %v4956_v49, %v3435_v45  ;;  %v3410_v47 = vmul.f32 %v7977_v37, %v7977_v37 }
 0x837   :  { %v3500_v29 = vperm.slane %v3484_v8, 1  ;;  %v3358_v11 = vrot.slane %v3357_v52, 4  ;;  %v3393_v48 = vadd.f32 %v3371_v38, %v3370_v56  ;;  %3770 = vmatpush.bf16.msrb.mxu3 %v4651_v15 }
 0x838   :  { %v3437_v60 = vmul.f32 0.5, %v3436_v62  ;;  %v3414_v21 = vsub.f32 %v3406_v57, %v3410_v47 }
 0x839   :  { %v3505_v35 = vadd.f32 %v3500_v29, %v3493_v43  ;;  %v3504_v39 = vadd.f32 %v3500_v29, %v3492_v32  ;;  %v3359_v44 = vadd.f32 %v3358_v11, %v3357_v52  ;;  %v3394_v46 = vrot.slane %v3393_v48, 4 }
 0x83a   :  { %v3438_v22 = vsub.f32 1.5, %v3437_v60  ;;  %v3418_v13 = vmax.f32 %v3414_v21, 0.0 }
 0x83b   :  { %v7991_v30 = vmax.f32 %v7210_v40, %v3504_v39  ;;  %v7994_v20 = vmax.f32 %v7212_v50, %v3505_v35  ;;  %v3360_v54 = vrot.slane %v3359_v44, 2  ;;  %v3395_v34 = vadd.f32 %v3394_v46, %v3393_v48  ;;  %3771 = vmatpush.bf16.msrb.mxu3 %v4650_v31 }
 0x83c   :  { %v3439_v10 = vmul.f32 %v4956_v49, %v3438_v22  ;;  %v7997_v19 = vadd.f32 1e-05, %v3418_v13 }
 0x83d   :  { %v3520_v3 = vadd.f32 %v7994_v20, %v7991_v30  ;;  %v3548_v36 = vmul.f32 %v7991_v30, %v7991_v30  ;;  %v3549_v40 = vmul.f32 %v7994_v20, %v7994_v20  ;;  %v3361_v50 = vadd.f32 %v3360_v54, %v3359_v44 }
 0x83e   :  { %v3396_v28 = vrot.slane %v3395_v34, 2  ;;  %v3443_v1 = vsel %vm3442_vm3, %v4956_v49, %v3439_v10  ;;  %4957 = vrsqrt.f32 %v7997_v19  ;;  %vm3450_vm5 = vweird.f32 %v7997_v19 }
 0x83f   :  { %v3521_v12 = vrot.slane %v3520_v3, 4  ;;  %v3556_v5 = vadd.f32 %v3549_v40, %v3548_v36  ;;  %v3465_v59 = vmul.f32 %v7967_v33, %v3443_v1  ;;  %v3362_v16 = vrot.slane %v3361_v50, 1  ;;  %3772 = vmatpush.bf16.msrb.mxu3 %v4649_v63 }
 0x840   :  { %v3397_v25 = vadd.f32 %v3396_v28, %v3395_v34 }
 0x841   :  { %v3522_v55 = vadd.f32 %v3521_v12, %v3520_v3  ;;  %v3557_v0 = vrot.slane %v3556_v5, 4  ;;  %v3469_v2 = vmul.f32 %v3465_v59, %v7933_v24  ;;  %v3489_v14 = vperm.slane %v3465_v59, 0 }
 0x842   :  { %v3398_v58 = vrot.slane %v3397_v25, 1  ;;  %v3363_v7 = vadd.f32 %v3362_v16, %v3361_v50 }
 0x843   :  { %v3523_v53 = vrot.slane %v3522_v55, 2  ;;  %v3558_v26 = vadd.f32 %v3557_v0, %v3556_v5  ;;  %v3477_v49 = vrot.slane %v3469_v2, 7  ;;  %v3494_v24 = vmul.f32 %v3489_v14, %v7833_v17 }
 0x844   :  { %v4958_v27 = vpop.eup %4957  ;;  %v3399_v45 = vadd.f32 %v3398_v58, %v3397_v25  ;;  %v8009_v8 = vmul.f32 0.0625, %v3363_v7  ;;  %v3495_v47 = vmul.f32 %v3489_v14, %v7850_v41 }
 0x845   :  { %v3524_v57 = vadd.f32 %v3523_v53, %v3522_v55  ;;  %v3559_v56 = vrot.slane %v3558_v26, 2  ;;  %v3485_v52 = vsub.f32 %v7967_v33, %v3477_v49  ;;  %v3445_v38 = vmul.f32 %v4958_v27, %v7997_v19 }
 0x846   :  { %v3407_v62 = vmul.f32 0.0625, %v3399_v45  ;;  %v3411_v32 = vmul.f32 %v8009_v8, %v8009_v8  ;;  %vm3451_vm4 = vweird.f32 %v4958_v27 }
 0x847   :  { %v3525_v43 = vrot.slane %v3524_v57, 1  ;;  %v3560_v29 = vadd.f32 %v3559_v56, %v3558_v26  ;;  %v3501_v11 = vperm.slane %v3485_v52, 1  ;;  %v3446_v48 = vmul.f32 %v4958_v27, %v3445_v38  ;;  %vm3452_vm6 = vmor %vm3450_vm5, %vm3451_vm4 }
 0x848   :  { %v3415_v15 = vsub.f32 %v3407_v62, %v3411_v32 }
 0x849   :  { %v3526_v60 = vadd.f32 %v3525_v43, %v3524_v57  ;;  %v3561_v21 = vrot.slane %v3560_v29, 1  ;;  %v3506_v35 = vadd.f32 %v3501_v11, %v3494_v24  ;;  %v3507_v39 = vadd.f32 %v3501_v11, %v3495_v47 }
 0x84a   :  { %v3447_v44 = vmul.f32 0.5, %v3446_v48  ;;  %v3419_v46 = vmax.f32 %v3415_v15, 0.0 }
 0x84b   :  { %v3562_v22 = vadd.f32 %v3561_v21, %v3560_v29  ;;  %v8017_v13 = vmul.f32 0.0625, %v3526_v60  ;;  %v8020_v17 = vmax.f32 %v7238_v18, %v3506_v35  ;;  %v8023_v41 = vmax.f32 %v7240_v23, %v3507_v39 }
 0x84c   :  { %v3448_v54 = vsub.f32 1.5, %v3447_v44  ;;  %v3423_v34 = vadd.f32 1e-05, %v3419_v46 }
 0x84d   :  { %v3588_v31 = vmul.f32 0.0625, %v3562_v22  ;;  %v3592_v10 = vmul.f32 %v8017_v13, %v8017_v13  ;;  %v3527_v3 = vadd.f32 %v8023_v41, %v8020_v17  ;;  %v3550_v36 = vmul.f32 %v8020_v17, %v8020_v17 }
 0x84e   :  { %v3551_v18 = vmul.f32 %v8023_v41, %v8023_v41  ;;  %v3449_v40 = vmul.f32 %v4958_v27, %v3448_v54  ;;  %4959 = vrsqrt.f32 %v3423_v34  ;;  %vm3460_vm8 = vweird.f32 %v3423_v34 }
 0x84f   :  { %v3596_v23 = vsub.f32 %v3588_v31, %v3592_v10  ;;  %v3528_v50 = vrot.slane %v3527_v3, 4 }
 0x850   :  { %v3563_v28 = vadd.f32 %v3551_v18, %v3550_v36  ;;  %v3453_v1 = vsel %vm3452_vm6, %v4958_v27, %v3449_v40 }
 0x851   :  { %v3600_v12 = vmax.f32 %v3596_v23, 0.0  ;;  %v3529_v5 = vadd.f32 %v3528_v50, %v3527_v3  ;;  %v3466_v59 = vmul.f32 %v7967_v33, %v3453_v1 }
 0x852   :  { %v3564_v25 = vrot.slane %v3563_v28, 4 }
 0x853   :  { %v3604_v63 = vadd.f32 1e-05, %v3600_v12  ;;  %v3530_v16 = vrot.slane %v3529_v5, 2  ;;  %v3470_v55 = vmul.f32 %v3466_v59, %v7977_v37  ;;  %v3490_v14 = vperm.slane %v3466_v59, 0 }
 0x854   :  { %v4960_v0 = vpop.eup %4959  ;;  %v3565_v2 = vadd.f32 %v3564_v25, %v3563_v28 }
 0x855   :  { %4961 = vrsqrt.f32 %v3604_v63  ;;  %v3531_v58 = vadd.f32 %v3530_v16, %v3529_v5  ;;  %v3478_v19 = vrot.slane %v3470_v55, 7  ;;  %v3455_v53 = vmul.f32 %v4960_v0, %v3423_v34 }
 0x856   :  { %v3566_v7 = vrot.slane %v3565_v2, 2  ;;  %v3496_v56 = vmul.f32 %v3490_v14, %v7915_v51  ;;  %v3497_v52 = vmul.f32 %v3490_v14, %v7931_v4  ;;  %vm3461_vm7 = vweird.f32 %v4960_v0 }
 0x857   :  { %v3532_v26 = vrot.slane %v3531_v58, 1  ;;  %v3486_v49 = vsub.f32 %v7967_v33, %v3478_v19  ;;  %v3456_v45 = vmul.f32 %v4960_v0, %v3455_v53  ;;  %vm3462_vm9 = vmor %vm3460_vm8, %vm3461_vm7  ;;  %vm3614_vm11 = vweird.f32 %v3604_v63 }
 0x858   :  { %v3567_v27 = vadd.f32 %v3566_v7, %v3565_v2 }
 0x859   :  { %v3533_v57 = vadd.f32 %v3532_v26, %v3531_v58  ;;  %v3502_v38 = vperm.slane %v3486_v49, 1  ;;  %v3457_v62 = vmul.f32 0.5, %v3456_v45 }
 0x85a   :  { %v3568_v37 = vrot.slane %v3567_v27, 1 }
 0x85b   :  { %v4962_v24 = vpop.eup %4961  ;;  %v8039_v47 = vmul.f32 0.0625, %v3533_v57  ;;  %v3508_v32 = vadd.f32 %v3502_v38, %v3496_v56  ;;  %v3509_v43 = vadd.f32 %v3502_v38, %v3497_v52  ;;  %v3458_v48 = vsub.f32 1.5, %v3457_v62 }
 0x85c   :  { %v3609_v29 = vmul.f32 %v4962_v24, %v3604_v63  ;;  %v3569_v11 = vadd.f32 %v3568_v37, %v3567_v27  ;;  %vm3615_vm10 = vweird.f32 %v4962_v24 }
 0x85d   :  { %v3593_v15 = vmul.f32 %v8039_v47, %v8039_v47  ;;  %v8044_v60 = vmax.f32 %v7257_v6, %v3508_v32  ;;  %v8047_v51 = vmax.f32 %v7259_v61, %v3509_v43  ;;  %v3459_v35 = vmul.f32 %v4960_v0, %v3458_v48  ;;  %vm3616_vm13 = vmor %vm3614_vm11, %vm3615_vm10 }
 0x85e   :  { %v3610_v4 = vmul.f32 %v4962_v24, %v3609_v29  ;;  %v3589_v21 = vmul.f32 0.0625, %v3569_v11 }
 0x85f   :  { %v3534_v39 = vadd.f32 %v8047_v51, %v8044_v60  ;;  %v3552_v44 = vmul.f32 %v8044_v60, %v8044_v60  ;;  %v3553_v46 = vmul.f32 %v8047_v51, %v8047_v51  ;;  %v3463_v54 = vsel %vm3462_vm9, %v4960_v0, %v3459_v35 }
 0x860   :  { %v3611_v22 = vmul.f32 0.5, %v3610_v4  ;;  %v3597_v6 = vsub.f32 %v3589_v21, %v3593_v15  ;;  %v3467_v10 = vmul.f32 %v7967_v33, %v3463_v54 }
 0x861   :  { %v3535_v31 = vrot.slane %v3534_v39, 4  ;;  %v3570_v61 = vadd.f32 %v3553_v46, %v3552_v44 }
 0x862   :  { %v3612_v3 = vsub.f32 1.5, %v3611_v22  ;;  %v3601_v34 = vmax.f32 %v3597_v6, 0.0  ;;  %v3471_v40 = vmul.f32 %v3467_v10, %v8009_v8  ;;  %v3491_v59 = vperm.slane %v3467_v10, 0 }
 0x863   :  { %v3536_v36 = vadd.f32 %v3535_v31, %v3534_v39  ;;  %v3571_v18 = vrot.slane %v3570_v61, 4 }
 0x864   :  { %v3613_v23 = vmul.f32 %v4962_v24, %v3612_v3  ;;  %v3605_v50 = vadd.f32 1e-05, %v3601_v34  ;;  %v3479_v12 = vrot.slane %v3471_v40, 7  ;;  %v3498_v63 = vmul.f32 %v3491_v59, %v7971_v42  ;;  %v8621_v42 = vld [vmem:[#allocation16_spill] sm:$0xff] }
 0x865   :  { %v3537_v28 = vrot.slane %v3536_v36, 2  ;;  %v3572_v1 = vadd.f32 %v3571_v18, %v3570_v61  ;;  %v3499_v14 = vmul.f32 %v3491_v59, %v7974_v9  ;;  %v8622_v9 = vld [vmem:[#allocation40_spill] sm:$0xff] }
 0x866   :  { %v3617_v5 = vsel %vm3616_vm13, %v4962_v24, %v3613_v23  ;;  %4963 = vrsqrt.f32 %v3605_v50  ;;  %v3487_v0 = vsub.f32 %v7967_v33, %v3479_v12  ;;  %vm3624_vm12 = vweird.f32 %v3605_v50 }
 0x867   :  { %v3648_v25 = vmul.f32 %v7967_v33, %v3617_v5  ;;  %v3538_v16 = vadd.f32 %v3537_v28, %v3536_v36  ;;  %v3573_v55 = vrot.slane %v3572_v1, 2 }
 0x868   :  { %v3503_v7 = vperm.slane %v3487_v0, 1 }
 0x869   :  { %v3652_v2 = vmul.f32 %v3648_v25, %v8017_v13  ;;  %v3672_v58 = vperm.slane %v3648_v25, 2  ;;  %v3539_v8 = vrot.slane %v3538_v16, 1  ;;  %v3574_v19 = vadd.f32 %v3573_v55, %v3572_v1 }
 0x86a   :  { %v3510_v56 = vadd.f32 %v3503_v7, %v3498_v63  ;;  %v3511_v52 = vadd.f32 %v3503_v7, %v3499_v14 }
 0x86b   :  { %v3660_v53 = vrot.slane %v3652_v2, 7  ;;  %v3676_v26 = vmul.f32 %v3672_v58, %v7991_v30  ;;  %v3677_v49 = vmul.f32 %v3672_v58, %v7994_v20  ;;  %v3540_v27 = vadd.f32 %v3539_v8, %v3538_v16 }
 0x86c   :  { %v4964_v45 = vpop.eup %4963  ;;  %v3575_v57 = vrot.slane %v3574_v19, 1  ;;  %v8068_v24 = vmax.f32 %v8621_v42, %v3510_v56  ;;  %v8071_v32 = vmax.f32 %v8622_v9, %v3511_v52 }
 0x86d   :  { %v3668_v13 = vsub.f32 %v7967_v33, %v3660_v53  ;;  %v3619_v38 = vmul.f32 %v4964_v45, %v3605_v50  ;;  %v8065_v37 = vmul.f32 0.0625, %v3540_v27  ;;  %vm3625_vm14 = vweird.f32 %v4964_v45 }
 0x86e   :  { %v3576_v62 = vadd.f32 %v3575_v57, %v3574_v19  ;;  %v3541_v11 = vadd.f32 %v8071_v32, %v8068_v24  ;;  %v3554_v48 = vmul.f32 %v8068_v24, %v8068_v24  ;;  %v3555_v15 = vmul.f32 %v8071_v32, %v8071_v32  ;;  %vm3626_vm15 = vmor %vm3624_vm12, %vm3625_vm14 }
 0x86f   :  { %v3684_v30 = vperm.slane %v3668_v13, 3  ;;  %v3620_v43 = vmul.f32 %v4964_v45, %v3619_v38  ;;  %v3594_v20 = vmul.f32 %v8065_v37, %v8065_v37 }
 0x870   :  { %v3590_v29 = vmul.f32 0.0625, %v3576_v62  ;;  %v3542_v44 = vrot.slane %v3541_v11, 4  ;;  %v3577_v46 = vadd.f32 %v3555_v15, %v3554_v48 }
 0x871   :  { %v3688_v4 = vadd.f32 %v3684_v30, %v3676_v26  ;;  %v3689_v21 = vadd.f32 %v3684_v30, %v3677_v49  ;;  %v3621_v35 = vmul.f32 0.5, %v3620_v43 }
 0x872   :  { %v3598_v39 = vsub.f32 %v3590_v29, %v3594_v20  ;;  %v3543_v31 = vadd.f32 %v3542_v44, %v3541_v11  ;;  %v3578_v61 = vrot.slane %v3577_v46, 4 }
 0x873   :  { %v3696_v22 = vpack.c.bf16 %v3689_v21, %v3688_v4  ;;  %v3622_v6 = vsub.f32 1.5, %v3621_v35 }
 0x874   :  { %v3602_v54 = vmax.f32 %v3598_v39, 0.0  ;;  %v3544_v34 = vrot.slane %v3543_v31, 2  ;;  %v3579_v36 = vadd.f32 %v3578_v61, %v3577_v46 }
 0x875   :  { %3773 = vmatmul.bf16.vlgmr.msrb.gmra.mxu3 %v3696_v22  ;;  %v3623_v10 = vmul.f32 %v4964_v45, %v3622_v6 }
 0x876   :  { %v3606_v3 = vadd.f32 1e-05, %v3602_v54  ;;  %v3545_v23 = vadd.f32 %v3544_v34, %v3543_v31  ;;  %v3580_v28 = vrot.slane %v3579_v36, 2 }
 0x877   :  { %v3627_v18 = vsel %vm3626_vm15, %v4964_v45, %v3623_v10 }
 0x878   :  { %v3649_v40 = vmul.f32 %v7967_v33, %v3627_v18  ;;  %4965 = vrsqrt.f32 %v3606_v3  ;;  %v3546_v5 = vrot.slane %v3545_v23, 1  ;;  %v3581_v59 = vadd.f32 %v3580_v28, %v3579_v36 }
 0x879   :  { %vm3634_vm1 = vweird.f32 %v3606_v3 }
 0x87a   :  { %v3653_v1 = vmul.f32 %v3649_v40, %v8039_v47  ;;  %v3673_v12 = vperm.slane %v3649_v40, 2  ;;  %v3547_v55 = vadd.f32 %v3546_v5, %v3545_v23  ;;  %v3582_v0 = vrot.slane %v3581_v59, 1 }
 0x87b   :  { %v8096_v40 = vperm.slane %v7967_v33, 4 }
 0x87c   :  { %v3661_v25 = vrot.slane %v3653_v1, 7  ;;  %v3678_v16 = vmul.f32 %v3673_v12, %v8020_v17  ;;  %v3679_v50 = vmul.f32 %v3673_v12, %v8023_v41  ;;  %v3587_v8 = vmul.f32 0.0625, %v3547_v55 }
 0x87d   :  { %v3583_v63 = vadd.f32 %v3582_v0, %v3581_v59 }
 0x87e   :  { %v4966_v2 = vpop.eup %4965  ;;  %v3669_v58 = vsub.f32 %v7967_v33, %v3661_v25  ;;  %v3595_v7 = vmul.f32 %v3587_v8, %v3587_v8 }
 0x87f   :  { %v3629_v19 = vmul.f32 %v4966_v2, %v3606_v3  ;;  %v3591_v47 = vmul.f32 0.0625, %v3583_v63  ;;  %vm3635_vm0 = vweird.f32 %v4966_v2 }
 0x880   :  { %v3685_v14 = vperm.slane %v3669_v58, 3  ;;  %vm3636_vm2 = vmor %vm3634_vm1, %vm3635_vm0 }
 0x881   :  { %v3630_v53 = vmul.f32 %v4966_v2, %v3629_v19  ;;  %v3599_v45 = vsub.f32 %v3591_v47, %v3595_v7 }
 0x882   :  { %v3690_v26 = vadd.f32 %v3685_v14, %v3678_v16  ;;  %v3691_v49 = vadd.f32 %v3685_v14, %v3679_v50 }
 0x883   :  { %v3631_v27 = vmul.f32 0.5, %v3630_v53  ;;  %v3603_v41 = vmax.f32 %v3599_v45, 0.0 }
 0x884   :  { %v3697_v57 = vpack.c.bf16 %v3691_v49, %v3690_v26 }
 0x885   :  { %v3632_v17 = vsub.f32 1.5, %v3631_v27  ;;  %v3607_v52 = vadd.f32 1e-05, %v3603_v41 }
 0x886   :  { %3778 = vmatmul.bf16.gmra.mxu3 %v3697_v57 }
 0x887   :  { %v3633_v56 = vmul.f32 %v4966_v2, %v3632_v17  ;;  %4967 = vrsqrt.f32 %v3607_v52  ;;  %vm3644_vm4 = vweird.f32 %v3607_v52 }
 0x889   :  { %v3637_v13 = vsel %vm3636_vm2, %v4966_v2, %v3633_v56 }
 0x88a   :  { %v3650_v38 = vmul.f32 %v7967_v33, %v3637_v13 }
 0x88c   :  { %v3654_v62 = vmul.f32 %v3650_v38, %v8065_v37  ;;  %v3674_v42 = vperm.slane %v3650_v38, 2 }
 0x88d   :  { %v4968_v20 = vpop.eup %4967 }
 0x88e   :  { %v3662_v9 = vrot.slane %v3654_v62, 7  ;;  %v3680_v30 = vmul.f32 %v3674_v42, %v8044_v60  ;;  %v3681_v43 = vmul.f32 %v3674_v42, %v8047_v51  ;;  %v3639_v11 = vmul.f32 %v4968_v20, %v3607_v52 }
 0x88f   :  { %vm3645_vm3 = vweird.f32 %v4968_v20 }
 0x890   :  { %v3670_v29 = vsub.f32 %v7967_v33, %v3662_v9  ;;  %v3640_v15 = vmul.f32 %v4968_v20, %v3639_v11  ;;  %vm3646_vm5 = vmor %vm3644_vm4, %vm3645_vm3 }
 0x892   :  { %v3686_v48 = vperm.slane %v3670_v29, 3  ;;  %v3641_v35 = vmul.f32 0.5, %v3640_v15  ;;  %v4663_v15 = vld [vmem:[#allocation7 + $0xf0] sm:$0xff] }
 0x894   :  { %v3692_v4 = vadd.f32 %v3686_v48, %v3680_v30  ;;  %v3693_v21 = vadd.f32 %v3686_v48, %v3681_v43  ;;  %v3642_v44 = vsub.f32 1.5, %v3641_v35  ;;  %v4664_v30 = vld [vmem:[#allocation7 + $0xf8] sm:$0xff] }
 0x895   :  { %4047 = vmatpush.bf16.msra.mxu2 %v4664_v30 }
 0x896   :  { %v3698_v39 = vpack.c.bf16 %v3693_v21, %v3692_v4  ;;  %v3643_v37 = vmul.f32 %v4968_v20, %v3642_v44 }
 0x898   :  { %3783 = vmatmul.bf16.gmra.mxu3 %v3698_v39  ;;  %v3647_v46 = vsel %vm3646_vm5, %v4968_v20, %v3643_v37 }
 0x899   :  { %v3651_v60 = vmul.f32 %v7967_v33, %v3647_v46  ;;  %4048 = vmatpush.bf16.msra.mxu2 %v4663_v15  ;;  %v4662_v46 = vld [vmem:[#allocation7 + $0xe8] sm:$0xff] }
 0x89b   :  { %v3655_v51 = vmul.f32 %v3651_v60, %v3587_v8  ;;  %v3675_v22 = vperm.slane %v3651_v60, 2 }
 0x89d   :  { %v3663_v6 = vrot.slane %v3655_v51, 7  ;;  %v3682_v54 = vmul.f32 %v3675_v22, %v8068_v24  ;;  %v3683_v31 = vmul.f32 %v3675_v22, %v8071_v32  ;;  %4049 = vmatpush.bf16.msra.mxu2 %v4662_v46 }
 0x89f   :  { %v3671_v61 = vsub.f32 %v7967_v33, %v3663_v6 }
 0x8a1   :  { %v3687_v10 = vperm.slane %v3671_v61, 3 }
 0x8a3   :  { %v3694_v3 = vadd.f32 %v3687_v10, %v3682_v54  ;;  %v3695_v34 = vadd.f32 %v3687_v10, %v3683_v31 }
 0x8a5   :  { %v3699_v36 = vpack.c.bf16 %v3695_v34, %v3694_v3  ;;  %v4661_v34 = vld [vmem:[#allocation7 + $0xe0] sm:$0xff] }
 0x8a6   :  { %4050 = vmatpush.bf16.msra.mxu2 %v4661_v34 }
 0x8a8   :  { %3788 = vmatmul.bf16.gmra.mxu3 %v3699_v36 }
 0x8f8   :  { %v3774_v18 = vpop.f32.mrf.mxu3 }
 0x8f9   :  { %v8099_v23 = vadd.f32 %v3774_v18, %v8096_v40 }
 0x8fb   :  { %v3822_v24 = vmul.f32 %v8099_v23, %v8099_v23 }
 0x900   :  { %v3776_v28 = vpop.f32.mrf.mxu3 }
 0x901   :  { %v8102_v1 = vadd.f32 %v3776_v28, %v8096_v40 }
 0x903   :  { %v3794_v32 = vadd.f32 %v8102_v1, %v8099_v23  ;;  %v3823_v12 = vmul.f32 %v8102_v1, %v8102_v1 }
 0x905   :  { %v3795_v5 = vrot.slane %v3794_v32, 4  ;;  %v3830_v59 = vadd.f32 %v3823_v12, %v3822_v24 }
 0x907   :  { %v3796_v25 = vadd.f32 %v3795_v5, %v3794_v32  ;;  %v3831_v16 = vrot.slane %v3830_v59, 4 }
 0x909   :  { %v3797_v50 = vrot.slane %v3796_v25, 2  ;;  %v3832_v55 = vadd.f32 %v3831_v16, %v3830_v59  ;;  %v3779_v0 = vpop.f32.mrf.mxu3 }
 0x90a   :  { %v8111_v7 = vadd.f32 %v3779_v0, %v8096_v40 }
 0x90b   :  { %v3798_v2 = vadd.f32 %v3797_v50, %v3796_v25  ;;  %v3833_v58 = vrot.slane %v3832_v55, 2  ;;  %v4660_v25 = vld [vmem:[#allocation7 + $0xd8] sm:$0xff] }
 0x90c   :  { %v3824_v57 = vmul.f32 %v8111_v7, %v8111_v7  ;;  %4051 = vmatpush.bf16.msra.mxu2 %v4660_v25 }
 0x90d   :  { %v3799_v8 = vrot.slane %v3798_v2, 1  ;;  %v3834_v19 = vadd.f32 %v3833_v58, %v3832_v55 }
 0x90f   :  { %v3800_v63 = vadd.f32 %v3799_v8, %v3798_v2  ;;  %v3835_v14 = vrot.slane %v3834_v19, 1 }
 0x911   :  { %v3836_v53 = vadd.f32 %v3835_v14, %v3834_v19  ;;  %v8113_v47 = vmul.f32 0.0625, %v3800_v63  ;;  %v3781_v26 = vpop.f32.mrf.mxu3  ;;  %v4659_v14 = vld [vmem:[#allocation7 + $0xd0] sm:$0xff] }
 0x912   :  { %v8116_v49 = vadd.f32 %v3781_v26, %v8096_v40  ;;  %4052 = vmatpush.bf16.msra.mxu2 %v4659_v14 }
 0x913   :  { %v3862_v27 = vmul.f32 0.0625, %v3836_v53  ;;  %v3866_v45 = vmul.f32 %v8113_v47, %v8113_v47 }
 0x914   :  { %v3801_v17 = vadd.f32 %v8116_v49, %v8111_v7  ;;  %v3825_v41 = vmul.f32 %v8116_v49, %v8116_v49 }
 0x915   :  { %v3870_v56 = vsub.f32 %v3862_v27, %v3866_v45 }
 0x916   :  { %v3802_v52 = vrot.slane %v3801_v17, 4  ;;  %v3837_v13 = vadd.f32 %v3825_v41, %v3824_v57 }
 0x917   :  { %v3874_v38 = vmax.f32 %v3870_v56, 0.0  ;;  %v4658_v56 = vld [vmem:[#allocation7 + $0xc8] sm:$0xff] }
 0x918   :  { %v3803_v62 = vadd.f32 %v3802_v52, %v3801_v17  ;;  %v3838_v42 = vrot.slane %v3837_v13, 4  ;;  %4053 = vmatpush.bf16.msra.mxu2 %v4658_v56 }
 0x919   :  { %v3878_v9 = vadd.f32 1e-05, %v3874_v38 }
 0x91a   :  { %v3804_v43 = vrot.slane %v3803_v62, 2  ;;  %v3839_v20 = vadd.f32 %v3838_v42, %v3837_v13 }
 0x91b   :  { %4969 = vrsqrt.f32 %v3878_v9  ;;  %v3784_v29 = vpop.f32.mrf.mxu3  ;;  %vm3888_vm7 = vweird.f32 %v3878_v9 }
 0x91c   :  { %v3805_v11 = vadd.f32 %v3804_v43, %v3803_v62  ;;  %v3840_v48 = vrot.slane %v3839_v20, 2  ;;  %v8127_v37 = vadd.f32 %v3784_v29, %v8096_v40 }
 0x91e   :  { %v3806_v4 = vrot.slane %v3805_v11, 1  ;;  %v3841_v21 = vadd.f32 %v3840_v48, %v3839_v20  ;;  %v3826_v3 = vmul.f32 %v8127_v37, %v8127_v37 }
 0x920   :  { %v3807_v35 = vadd.f32 %v3806_v4, %v3805_v11  ;;  %v3842_v39 = vrot.slane %v3841_v21, 1  ;;  %v4657_v4 = vld [vmem:[#allocation7 + $0xc0] sm:$0xff] }
 0x921   :  { %v4970_v44 = vpop.eup %4969  ;;  %4054 = vmatpush.bf16.msra.mxu2 %v4657_v4 }
 0x922   :  { %v3883_v60 = vmul.f32 %v4970_v44, %v3878_v9  ;;  %v3843_v51 = vadd.f32 %v3842_v39, %v3841_v21  ;;  %v8129_v22 = vmul.f32 0.0625, %v3807_v35  ;;  %vm3889_vm6 = vweird.f32 %v4970_v44 }
 0x923   :  { %v3786_v6 = vpop.f32.mrf.mxu3  ;;  %vm3890_vm8 = vmor %vm3888_vm7, %vm3889_vm6 }
 0x924   :  { %v3884_v54 = vmul.f32 %v4970_v44, %v3883_v60  ;;  %v3863_v31 = vmul.f32 0.0625, %v3843_v51  ;;  %v3867_v61 = vmul.f32 %v8129_v22, %v8129_v22  ;;  %v8134_v10 = vadd.f32 %v3786_v6, %v8096_v40 }
 0x926   :  { %v3885_v36 = vmul.f32 0.5, %v3884_v54  ;;  %v3871_v18 = vsub.f32 %v3863_v31, %v3867_v61  ;;  %v3808_v28 = vadd.f32 %v8134_v10, %v8127_v37  ;;  %v3827_v24 = vmul.f32 %v8134_v10, %v8134_v10 }
 0x928   :  { %v3886_v32 = vsub.f32 1.5, %v3885_v36  ;;  %v3875_v12 = vmax.f32 %v3871_v18, 0.0  ;;  %v3809_v5 = vrot.slane %v3808_v28, 4  ;;  %v3844_v59 = vadd.f32 %v3827_v24, %v3826_v3 }
 0x92a   :  { %v3887_v16 = vmul.f32 %v4970_v44, %v3886_v32  ;;  %v3879_v50 = vadd.f32 1e-05, %v3875_v12  ;;  %v3810_v55 = vadd.f32 %v3809_v5, %v3808_v28  ;;  %v3845_v0 = vrot.slane %v3844_v59, 4 }
 0x92b   :  { %v3789_v8 = vpop.f32.mrf.mxu3 }
 0x92c   :  { %v3891_v2 = vsel %vm3890_vm8, %v4970_v44, %v3887_v16  ;;  %4971 = vrsqrt.f32 %v3879_v50  ;;  %v3811_v58 = vrot.slane %v3810_v55, 2  ;;  %v3846_v63 = vadd.f32 %v3845_v0, %v3844_v59 }
 0x92d   :  { %v3922_v19 = vmul.f32 %v7967_v33, %v3891_v2  ;;  %vm3898_vm10 = vweird.f32 %v3879_v50 }
 0x92e   :  { %v3812_v53 = vadd.f32 %v3811_v58, %v3810_v55  ;;  %v3847_v27 = vrot.slane %v3846_v63, 2 }
 0x92f   :  { %v3926_v26 = vmul.f32 %v3922_v19, %v8113_v47  ;;  %v3946_v45 = vperm.slane %v3922_v19, 5  ;;  %v8150_v47 = vadd.f32 %v3789_v8, %v8096_v40 }
 0x930   :  { %v3813_v57 = vrot.slane %v3812_v53, 1  ;;  %v3848_v41 = vadd.f32 %v3847_v27, %v3846_v63 }
 0x931   :  { %v3934_v17 = vrot.slane %v3926_v26, 7  ;;  %v3950_v9 = vmul.f32 %v3946_v45, %v8099_v23  ;;  %v3951_v30 = vmul.f32 %v3946_v45, %v8102_v1  ;;  %v3828_v44 = vmul.f32 %v8150_v47, %v8150_v47 }
 0x932   :  { %v4972_v52 = vpop.eup %4971  ;;  %v3814_v13 = vadd.f32 %v3813_v57, %v3812_v53  ;;  %v3849_v42 = vrot.slane %v3848_v41, 1 }
 0x933   :  { %v3942_v38 = vsub.f32 %v7967_v33, %v3934_v17  ;;  %v3893_v62 = vmul.f32 %v4972_v52, %v3879_v50  ;;  %v3791_v20 = vpop.f32.mrf.mxu3  ;;  %vm3899_vm9 = vweird.f32 %v4972_v52 }
 0x934   :  { %v8147_v43 = vmul.f32 0.0625, %v3814_v13  ;;  %v3850_v48 = vadd.f32 %v3849_v42, %v3848_v41  ;;  %v8153_v15 = vadd.f32 %v3791_v20, %v8096_v40  ;;  %vm3900_vm11 = vmor %vm3898_vm10, %vm3899_vm9 }
 0x935   :  { %v3958_v29 = vperm.slane %v3942_v38, 6  ;;  %v3894_v11 = vmul.f32 %v4972_v52, %v3893_v62 }
 0x936   :  { %v3868_v21 = vmul.f32 %v8147_v43, %v8147_v43  ;;  %v3864_v1 = vmul.f32 0.0625, %v3850_v48  ;;  %v3815_v46 = vadd.f32 %v8153_v15, %v8150_v47  ;;  %v3829_v40 = vmul.f32 %v8153_v15, %v8153_v15 }
 0x937   :  { %v3962_v35 = vadd.f32 %v3958_v29, %v3950_v9  ;;  %v3963_v23 = vadd.f32 %v3958_v29, %v3951_v30  ;;  %v3895_v39 = vmul.f32 0.5, %v3894_v11 }
 0x938   :  { %v3872_v54 = vsub.f32 %v3864_v1, %v3868_v21  ;;  %v3816_v31 = vrot.slane %v3815_v46, 4  ;;  %v3851_v61 = vadd.f32 %v3829_v40, %v3828_v44 }
 0x939   :  { %v3970_v60 = vmax.f32 %v3962_v35, 0.0  ;;  %v3971_v51 = vmax.f32 %v3963_v23, 0.0  ;;  %v3896_v6 = vsub.f32 1.5, %v3895_v39 }
 0x93a   :  { %v3876_v36 = vmax.f32 %v3872_v54, 0.0  ;;  %v3817_v18 = vadd.f32 %v3816_v31, %v3815_v46  ;;  %v3852_v28 = vrot.slane %v3851_v61, 4 }
 0x93b   :  { %v3978_v3 = vpack.c.bf16 %v3971_v51, %v3970_v60  ;;  %v3897_v34 = vmul.f32 %v4972_v52, %v3896_v6 }
 0x93c   :  { %v3880_v32 = vadd.f32 1e-05, %v3876_v36  ;;  %v3818_v5 = vrot.slane %v3817_v18, 2  ;;  %v3853_v59 = vadd.f32 %v3852_v28, %v3851_v61 }
 0x93d   :  { %v3901_v24 = vsel %vm3900_vm11, %v4972_v52, %v3897_v34  ;;  %4055 = vmatmul.bf16.vlgmr.msra.gmra.mxu2 %v3978_v3 }
 0x93e   :  { %v3923_v12 = vmul.f32 %v7967_v33, %v3901_v24  ;;  %4973 = vrsqrt.f32 %v3880_v32  ;;  %v3819_v16 = vadd.f32 %v3818_v5, %v3817_v18  ;;  %v3854_v55 = vrot.slane %v3853_v59, 2 }
 0x93f   :  { %vm3908_vm14 = vweird.f32 %v3880_v32 }
 0x940   :  { %v3927_v25 = vmul.f32 %v3923_v12, %v8129_v22  ;;  %v3820_v0 = vrot.slane %v3819_v16, 1  ;;  %v3855_v2 = vadd.f32 %v3854_v55, %v3853_v59  ;;  %v3947_v50 = vperm.slane %v3923_v12, 5 }
 0x942   :  { %v3935_v58 = vrot.slane %v3927_v25, 7  ;;  %v3821_v8 = vadd.f32 %v3820_v0, %v3819_v16  ;;  %v3856_v19 = vrot.slane %v3855_v2, 1  ;;  %v3953_v45 = vmul.f32 %v3947_v50, %v8116_v49 }
 0x943   :  { %v3952_v57 = vmul.f32 %v3947_v50, %v8111_v7 }
 0x944   :  { %v3943_v63 = vsub.f32 %v7967_v33, %v3935_v58  ;;  %v4974_v14 = vpop.eup %4973  ;;  %v3857_v26 = vadd.f32 %v3856_v19, %v3855_v2  ;;  %v3861_v27 = vmul.f32 0.0625, %v3821_v8 }
 0x945   :  { %v3903_v53 = vmul.f32 %v4974_v14, %v3880_v32  ;;  %vm3909_vm13 = vweird.f32 %v4974_v14 }
 0x946   :  { %v3959_v17 = vperm.slane %v3943_v63, 6  ;;  %v3865_v41 = vmul.f32 0.0625, %v3857_v26  ;;  %v3869_v56 = vmul.f32 %v3861_v27, %v3861_v27  ;;  %vm3910_vm12 = vmor %vm3908_vm14, %vm3909_vm13 }
 0x947   :  { %v3904_v22 = vmul.f32 %v4974_v14, %v3903_v53 }
 0x948   :  { %v3964_v52 = vadd.f32 %v3959_v17, %v3952_v57  ;;  %v3965_v13 = vadd.f32 %v3959_v17, %v3953_v45  ;;  %v3873_v62 = vsub.f32 %v3865_v41, %v3869_v56 }
 0x949   :  { %v3905_v38 = vmul.f32 0.5, %v3904_v22 }
 0x94a   :  { %v3972_v42 = vmax.f32 %v3964_v52, 0.0  ;;  %v3973_v9 = vmax.f32 %v3965_v13, 0.0  ;;  %v3877_v20 = vmax.f32 %v3873_v62, 0.0 }
 0x94b   :  { %v3906_v30 = vsub.f32 1.5, %v3905_v38 }
 0x94c   :  { %v3979_v29 = vpack.c.bf16 %v3973_v9, %v3972_v42  ;;  %v3881_v48 = vadd.f32 1e-05, %v3877_v20 }
 0x94d   :  { %v3907_v11 = vmul.f32 %v4974_v14, %v3906_v30 }
 0x94e   :  { %4060 = vmatmul.bf16.gmra.mxu2 %v3979_v29  ;;  %4975 = vrsqrt.f32 %v3881_v48  ;;  %vm3918_vm0 = vweird.f32 %v3881_v48 }
 0x94f   :  { %v3911_v7 = vsel %vm3910_vm12, %v4974_v14, %v3907_v11 }
 0x950   :  { %v3924_v49 = vmul.f32 %v7967_v33, %v3911_v7 }
 0x952   :  { %v3928_v4 = vmul.f32 %v3924_v49, %v8147_v43  ;;  %v3948_v21 = vperm.slane %v3924_v49, 5 }
 0x954   :  { %v3936_v35 = vrot.slane %v3928_v4, 7  ;;  %v4976_v23 = vpop.eup %4975  ;;  %v3955_v44 = vmul.f32 %v3948_v21, %v8134_v10  ;;  %v3954_v40 = vmul.f32 %v3948_v21, %v8127_v37 }
 0x955   :  { %v3913_v39 = vmul.f32 %v4976_v23, %v3881_v48  ;;  %vm3919_vm15 = vweird.f32 %v4976_v23 }
 0x956   :  { %v3944_v1 = vsub.f32 %v7967_v33, %v3936_v35  ;;  %vm3920_vm1 = vmor %vm3918_vm0, %vm3919_vm15  ;;  %v4996_v33 = vld [vmem:[#allocation10 + $0x8] sm:$0xff] }
 0x957   :  { %v3914_v46 = vmul.f32 %v4976_v23, %v3913_v39  ;;  %v3998_v2 = vperm.slane %v4996_v33, 7 }
 0x958   :  { %v3960_v60 = vperm.slane %v3944_v1, 6 }
 0x959   :  { %v3915_v51 = vmul.f32 0.5, %v3914_v46 }
 0x95a   :  { %v3966_v6 = vadd.f32 %v3960_v60, %v3954_v40  ;;  %v3967_v54 = vadd.f32 %v3960_v60, %v3955_v44 }
 0x95b   :  { %v3916_v31 = vsub.f32 1.5, %v3915_v51 }
 0x95c   :  { %v3974_v61 = vmax.f32 %v3966_v6, 0.0  ;;  %v3975_v3 = vmax.f32 %v3967_v54, 0.0 }
 0x95d   :  { %v3917_v43 = vmul.f32 %v4976_v23, %v3916_v31 }
 0x95e   :  { %v3980_v34 = vpack.c.bf16 %v3975_v3, %v3974_v61 }
 0x95f   :  { %v3921_v36 = vsel %vm3920_vm1, %v4976_v23, %v3917_v43 }
 0x960   :  { %4065 = vmatmul.bf16.gmra.mxu2 %v3980_v34  ;;  %v3925_v18 = vmul.f32 %v4996_v33, %v3921_v36 }
 0x962   :  { %v3929_v10 = vmul.f32 %v3925_v18, %v3861_v27  ;;  %v3949_v28 = vperm.slane %v3925_v18, 5 }
 0x964   :  { %v3937_v24 = vrot.slane %v3929_v10, 7  ;;  %v3957_v32 = vmul.f32 %v3949_v28, %v8153_v15  ;;  %v3956_v12 = vmul.f32 %v3949_v28, %v8150_v47 }
 0x966   :  { %v3945_v37 = vsub.f32 %v4996_v33, %v3937_v24 }
 0x968   :  { %v3961_v5 = vperm.slane %v3945_v37, 6 }
 0x96a   :  { %v3968_v59 = vadd.f32 %v3961_v5, %v3956_v12  ;;  %v3969_v25 = vadd.f32 %v3961_v5, %v3957_v32 }
 0x96c   :  { %v3976_v16 = vmax.f32 %v3968_v59, 0.0  ;;  %v3977_v55 = vmax.f32 %v3969_v25, 0.0 }
 0x96e   :  { %v3981_v0 = vpack.c.bf16 %v3977_v55, %v3976_v16 }
 0x970   :  { %4070 = vmatmul.bf16.gmra.mxu2 %v3981_v0 }
 0x9c0   :  { %v4056_v58 = vpop.f32.mrf.mxu2 }
 0x9c1   :  { %v4057_v50 = vadd.f32 %v4056_v58, %v3998_v2 }
 0x9c3   :  { %4076 = vst [vmem:[#allocation11] sm:$0xff] %v4057_v50 }
 0x9c8   :  { %v4058_v8 = vpop.f32.mrf.mxu2 }
 0x9c9   :  { %v4059_v19 = vadd.f32 %v4058_v8, %v3998_v2 }
 0x9cb   :  { %4077 = vst [vmem:[#allocation11 + $0x8] sm:$0xff] %v4059_v19 }
 0x9d1   :  { %v4061_v63 = vpop.f32.mrf.mxu2 }
 0x9d2   :  { %v4062_v14 = vadd.f32 %v4061_v63, %v3998_v2 }
 0x9d4   :  { %4078 = vst [vmem:[#allocation11 + $0x10] sm:$0xff] %v4062_v14 }
 0x9d9   :  { %v4063_v15 = vpop.f32.mrf.mxu2 }
 0x9da   :  { %v4064_v53 = vadd.f32 %v4063_v15, %v3998_v2 }
 0x9dc   :  { %4079 = vst [vmem:[#allocation11 + $0x18] sm:$0xff] %v4064_v53 }
 0x9e3   :  { %v4066_v47 = vpop.f32.mrf.mxu2 }
 0x9e4   :  { %v4067_v26 = vadd.f32 %v4066_v47, %v3998_v2 }
 0x9e6   :  { %4080 = vst [vmem:[#allocation11 + $0x20] sm:$0xff] %v4067_v26 }
 0x9eb   :  { %v4068_v27 = vpop.f32.mrf.mxu2 }
 0x9ec   :  { %v4069_v45 = vadd.f32 %v4068_v27, %v3998_v2 }
 0x9ee   :  { %4081 = vst [vmem:[#allocation11 + $0x28] sm:$0xff] %v4069_v45 }
 0x9f3   :  { %v4071_v57 = vpop.f32.mrf.mxu2 }
 0x9f4   :  { %v4072_v17 = vadd.f32 %v4071_v57, %v3998_v2 }
 0x9f6   :  { %4082 = vst [vmem:[#allocation11 + $0x30] sm:$0xff] %v4072_v17 }
 0x9fb   :  { %v4073_v22 = vpop.f32.mrf.mxu2 }
 0x9fc   :  { %v4074_v41 = vadd.f32 %v4073_v22, %v3998_v2 }
 0x9fe   :  { %4083 = vst [vmem:[#allocation11 + $0x38] sm:$0xff] %v4074_v41 }
 0x9ff   :  { %4096 = dma.vmem_to_hbm [thread:$0]  %s4089_s4, 1024, %s4091_s23, [#allocation4], %s5156_s13, %s5156_s13, %s5157_s14  }
 0xa00   :  { %5147 = dma.done.wait [#allocation4], 1024  }
 0xa01   :  { %5148 = vsyncadd [#allocation4], 4294966272 }
 0xa02   :  { %4101 = vsyncpa [#allocation3], 1 }
 0xa03   :  { %4102 = vsyncpa [#allocation6], 1 }
 0xa04   :  { %4103 = vsyncpa [#allocation9], 1 }
 0xa05   :  { %4104 = vsyncpa [#allocation4], 1 }

</bundles_post_ra>
